<compile_context>
chip_gen: v7x
topology: tpu7x:2x2x1
jax: 0.10.0
libtpu: 0.0.40
codegen_flags: <defaults>
</compile_context>

<pallas_src>
import functools

import jax
import jax.numpy as jnp
from jax import lax
from jax.experimental import pallas as pl
from jax.experimental.pallas import tpu as pltpu


def _round_up(x, m):
    return (x + m - 1) // m * m


def _cdiv(a, b):
    return (a + b - 1) // b


def _vmem_capacity_bytes():
    """Physical VMEM per core; conservative (v7x) fallback if the query fails."""
    try:
        cap = getattr(pltpu.get_tpu_info(), "vmem_capacity_bytes", None)
        if cap:
            return int(cap)
    except Exception:
        pass
    return 64 << 20


def _conv_im2col_kernel(x_ref, w_ref, b_ref, o_ref, patch_ref, *, k, s, toh,
                        ow, c):
    """One (batch*row-tile, CO-tile) grid step.

    x_ref:     (1, s*s, TOH+A, W_sub, C) bf16 phase-decomposed input slab
    w_ref:     (k*k*C, TCO)              bf16
    b_ref:     (1, TCO)                  f32
    o_ref:     (1, TOH, OW, TCO)         f32
    patch_ref: (TOH*OW, k*k*C)           bf16 im2col scratch (persists over CO)
    """
    m = toh * ow

    # Build the im2col patch once per (batch, row-tile); the CO axis is marked
    # "arbitrary" so every CO tile on this core reuses the resident patch.
    @pl.when(pl.program_id(1) == 0)
    def _build_patch():
        for kh in range(k):              # static unrolled k*k tap loop
            for kw in range(k):
                phase = (kh % s) * s + (kw % s)
                ah, aw = kh // s, kw // s
                win = x_ref[0, phase, ah:ah + toh, aw:aw + ow, :]
                off = (kh * k + kw) * c
                patch_ref[:, off:off + c] = win.reshape(m, c)

    # Single big-K MXU matmul per CO tile (bf16 inputs, f32 accumulation).
    out = jnp.dot(patch_ref[...], w_ref[...],
                  preferred_element_type=jnp.float32) + b_ref[...]
    o_ref[...] = out.reshape(1, toh, ow, o_ref.shape[-1]).astype(o_ref.dtype)


def _pallas_conv(x_tiles, w2, bias_p, *, k, s, toh, ow, c, co_pad, tco,
                 vmem_limit):
    nr, ph, h_t, w_sub, _ = x_tiles.shape
    kc = k * k * c
    m = toh * ow
    n_co = co_pad // tco

    kernel = functools.partial(_conv_im2col_kernel, k=k, s=s, toh=toh, ow=ow,
                               c=c)
    return pl.pallas_call(
        kernel,
        out_shape=jax.ShapeDtypeStruct((nr, toh, ow, co_pad), jnp.float32),
        grid_spec=pltpu.PrefetchScalarGridSpec(
            num_scalar_prefetch=0,
            # CO varies fastest so the input slab + im2col patch stay resident
            # across CO tiles; (batch*row-tile) axis is "parallel" for megacore.
            grid=(nr, n_co),
            in_specs=[
                pl.BlockSpec((1, ph, h_t, w_sub, c),
                             lambda i, j: (i, 0, 0, 0, 0)),
                pl.BlockSpec((kc, tco), lambda i, j: (0, j)),
                pl.BlockSpec((1, tco), lambda i, j: (0, j)),
            ],
            out_specs=pl.BlockSpec((1, toh, ow, tco),
                                   lambda i, j: (i, 0, 0, j)),
            scratch_shapes=[pltpu.VMEM((m, kc), jnp.bfloat16)],
        ),
        compiler_params=pltpu.CompilerParams(
            dimension_semantics=("parallel", "arbitrary"),
            vmem_limit_bytes=vmem_limit,
        ),
    )(x_tiles, w2, bias_p)


def conv_layer_forward(x, weight, bias, *, kernel_size, stride, row_tile=None):
    """ConvLayer.forward: ReflectionPad2d(k//2) then Conv2d(k, stride).

    x:      (N, C_in, H, W)     float32 (NCHW, PyTorch convention)
    weight: (C_out, C_in, k, k) float32 (OIHW)
    bias:   (C_out,)            float32
    returns (N, C_out, OH, OW)  float32
    """
    N, C, H, W = x.shape
    CO = weight.shape[0]
    k, s = kernel_size, stride
    p = k // 2  # PyTorch ReflectionPad2d(k//2); 'same' spatial size only for odd k, s=1

    # --- layout pass: NCHW -> NHWC, reflection pad, bf16 (no HBM im2col) ---
    x_nhwc = jnp.transpose(x, (0, 2, 3, 1))
    xp = jnp.pad(x_nhwc, ((0, 0), (p, p), (p, p), (0, 0)),
                 mode="reflect").astype(jnp.bfloat16)
    Hp, Wp = H + 2 * p, W + 2 * p
    OH = (Hp - k) // s + 1
    OW = (Wp - k) // s + 1

    # --- stride via phase (space-to-batch) decomposition: kernel slices are
    #     always unit-stride with static offsets ---
    H_sub, W_sub = _cdiv(Hp, s), _cdiv(Wp, s)
    if s > 1:
        xq = jnp.pad(xp, ((0, 0), (0, H_sub * s - Hp), (0, W_sub * s - Wp),
                          (0, 0)))
        xq = xq.reshape(N, H_sub, s, W_sub, s, C)
        xph = jnp.transpose(xq, (0, 2, 4, 1, 3, 5)).reshape(
            N, s * s, H_sub, W_sub, C)
    else:
        xph = xp.reshape(N, 1, Hp, Wp, C)

    # --- weights: OIHW -> (k*k*C_in, C_out_pad); CO padded to 128 lanes ---
    CO_pad = _round_up(CO, 128)
    TCO = 256 if CO_pad % 256 == 0 else 128   # 256-wide MXU on v6e/v7x
    KC = k * k * C
    w2 = jnp.transpose(weight, (2, 3, 1, 0)).reshape(KC, CO)
    w2 = jnp.pad(w2, ((0, 0), (0, CO_pad - CO))).astype(jnp.bfloat16)
    bias_p = jnp.pad(bias.reshape(1, CO),
                     ((0, 0), (0, CO_pad - CO))).astype(jnp.float32)

    # --- OH-row tiling with halo (bounds per-step VMEM; >=2 parallel steps) ---
    A = (k - 1) // s                      # halo rows in the phase sub-images
    vmem_cap = _vmem_capacity_bytes()

    def _need(toh):                       # per-step VMEM estimate (bytes)
        m = toh * OW
        x_blk = 2 * s * s * (toh + A) * W_sub * C * 2   # bf16, double-buffered
        w_blk = 2 * KC * TCO * 2
        o_blk = 2 * m * TCO * 4                         # f32, double-buffered
        patch = m * KC * 2                              # scratch (single)
        tmp = m * TCO * 4 + m * C * 4                   # dot result + win copies
        return x_blk + w_blk + o_blk + patch + tmp + (1 << 20)

    if row_tile is None:
        TOH = OH
        while TOH > 8 and _need(TOH) > vmem_cap // 2:
            TOH = (TOH + 1) // 2
        if N * _cdiv(OH, TOH) < 2 and OH >= 16:
            TOH = _cdiv(OH, 2)            # keep both v7x TensorCores busy
    else:
        TOH = max(1, min(row_tile, OH))
    R = _cdiv(OH, TOH)
    H_t = TOH + A

    rows_needed = R * TOH + A
    if rows_needed > H_sub:
        xph = jnp.pad(xph, ((0, 0), (0, 0), (0, rows_needed - H_sub),
                            (0, 0), (0, 0)))
    if R > 1:
        x_tiles = jnp.stack(
            [xph[:, :, r * TOH:r * TOH + H_t] for r in range(R)], axis=1)
        x_tiles = x_tiles.reshape(N * R, s * s, H_t, W_sub, C)
    else:
        x_tiles = xph[:, :, :H_t]

    vmem_limit = int(min(max(2 * _need(TOH), 16 << 20), (vmem_cap * 3) // 4))

    out = _pallas_conv(x_tiles, w2, bias_p, k=k, s=s, toh=TOH, ow=OW, c=C,
                       co_pad=CO_pad, tco=TCO, vmem_limit=vmem_limit)
    # (N*R, TOH, OW, CO_pad) -> (N, OH, OW, CO) -> NCHW
    out = out.reshape(N, R * TOH, OW, CO_pad)[:, :OH, :, :CO]
    # TODO(synk): chained NHWC consumers should take the kernel's NHWC (and
    # optionally bf16) output directly and skip this extra HBM transpose pass;
    # for very small C_in a wrapper-side space-to-depth would further widen the
    # contraction / lane usage.
    return jnp.transpose(out, (0, 3, 1, 2))


if __name__ == "__main__":
    def _ref_conv(x, weight, bias, k, s):
        p = k // 2
        xp = jnp.pad(x, ((0, 0), (0, 0), (p, p), (p, p)), mode="reflect")
        return lax.conv_general_dilated(
            xp, weight, window_strides=(s, s), padding="VALID",
            dimension_numbers=("NCHW", "OIHW", "NCHW")) + bias.reshape(1, -1, 1, 1)

    def _ref_conv_bf16(x, weight, bias, k, s):
        # same math on bf16-quantized inputs -> tight check of the kernel
        xq = x.astype(jnp.bfloat16).astype(jnp.float32)
        wq = weight.astype(jnp.bfloat16).astype(jnp.float32)
        return _ref_conv(xq, wq, bias, k, s)

    key = jax.random.PRNGKey(0)

    # --- case 1: ConvLayer(4, 8, kernel_size=3, stride=1) on 2x4x16x16 ---
    N, C_in, H, W = 2, 4, 16, 16
    C_out, ksz, st = 8, 3, 1
    k1, k2, k3, key = jax.random.split(key, 4)
    x = jax.random.normal(k1, (N, C_in, H, W), dtype=jnp.float32)
    w = jax.random.normal(k2, (C_out, C_in, ksz, ksz), dtype=jnp.float32) * 0.1
    b = jax.random.normal(k3, (C_out,), dtype=jnp.float32) * 0.1

    fwd = jax.jit(functools.partial(conv_layer_forward,
                                    kernel_size=ksz, stride=st))
    out = jax.block_until_ready(fwd(x, w, b))
    assert out.shape == (N, C_out, H, W), out.shape
    assert jnp.allclose(out, _ref_conv_bf16(x, w, b, ksz, st),
                        atol=2e-3, rtol=2e-3)
    assert jnp.allclose(out, _ref_conv(x, w, b, ksz, st),
                        atol=5e-2, rtol=5e-2)

    # --- case 2: stride=2 + forced multi row-tiling (exercises the phase
    #     decomposition, halo slabs, and the CO-persistent im2col scratch) ---
    N2, H2, W2, st2 = 1, 17, 17, 2
    k1, k2, k3, key = jax.random.split(key, 4)
    x2 = jax.random.normal(k1, (N2, C_in, H2, W2), dtype=jnp.float32)
    w2_ = jax.random.normal(k2, (C_out, C_in, ksz, ksz), dtype=jnp.float32) * 0.1
    b2 = jax.random.normal(k3, (C_out,), dtype=jnp.float32) * 0.1

    fwd2 = jax.jit(functools.partial(conv_layer_forward, kernel_size=ksz,
                                     stride=st2, row_tile=4))
    out2 = jax.block_until_ready(fwd2(x2, w2_, b2))
    ref2 = _ref_conv(x2, w2_, b2, ksz, st2)
    assert out2.shape == ref2.shape, (out2.shape, ref2.shape)
    assert jnp.allclose(out2, _ref_conv_bf16(x2, w2_, b2, ksz, st2),
                        atol=2e-3, rtol=2e-3)
    assert jnp.allclose(out2, ref2, atol=5e-2, rtol=5e-2)

    print("KERNEL_OK")
</pallas_src>

<mosaic_0001>
module attributes {stable_mosaic.version = 11 : i64} {
  func.func @_conv_im2col_kernel(%arg0: i32, %arg1: i32, %arg2: memref<1x1x18x18x4xbf16, #tpu.memory_space<vmem>>, %arg3: memref<36x128xbf16, #tpu.memory_space<vmem>>, %arg4: memref<1x128xf32, #tpu.memory_space<vmem>>, %arg5: memref<1x16x16x128xf32, #tpu.memory_space<vmem>>, %arg6: memref<256x36xbf16, #tpu.memory_space<vmem>>) attributes {dimension_semantics = [#tpu.dimension_semantics<parallel>, #tpu.dimension_semantics<arbitrary>], iteration_bounds = array<i64: 2, 1>, scalar_prefetch = 0 : i64, scratch_operands = 1 : i64, tpu.core_type = #tpu.core_type<tc>, window_params = [{transform_indices = @transform_0, window_bounds = array<i64: 1, 1, 18, 18, 4>}, {transform_indices = @transform_1, window_bounds = array<i64: 36, 128>}, {transform_indices = @transform_2, window_bounds = array<i64: 1, 128>}, {transform_indices = @transform_3, window_bounds = array<i64: 1, 16, 16, 128>}]} {
    %c0_i32 = arith.constant 0 : i32
    %0 = arith.cmpi eq, %arg1, %c0_i32 : i32
    %1 = arith.extui %0 : i1 to i32
    %c0_i32_0 = arith.constant 0 : i32
    %2 = arith.cmpi ne, %1, %c0_i32_0 : i32
    scf.if %2 {
      %c0_10 = arith.constant 0 : index
      %c0_11 = arith.constant 0 : index
      %c0_12 = arith.constant 0 : index
      %c0_13 = arith.constant 0 : index
      %c0_14 = arith.constant 0 : index
      %11 = vector.load %arg2[%c0_10, %c0_11, %c0_12, %c0_13, %c0_14] : memref<1x1x18x18x4xbf16, #tpu.memory_space<vmem>>, vector<1x1x16x16x4xbf16>
      %12 = vector.shape_cast %11 : vector<1x1x16x16x4xbf16> to vector<16x16x4xbf16>
      %13 = vector.shape_cast %12 : vector<16x16x4xbf16> to vector<256x4xbf16>
      %c0_15 = arith.constant 0 : index
      %c0_16 = arith.constant 0 : index
      %14 = vector.load %arg6[%c0_15, %c0_16] : memref<256x36xbf16, #tpu.memory_space<vmem>>, vector<256x4xbf16>
      tpu.vector_store %arg6[%c0_15, %c0_16], %13 {strides = array<i32>} : memref<256x36xbf16, #tpu.memory_space<vmem>>, vector<256x4xbf16>,
      %c0_17 = arith.constant 0 : index
      %c0_18 = arith.constant 0 : index
      %c0_19 = arith.constant 0 : index
      %c1 = arith.constant 1 : index
      %c0_20 = arith.constant 0 : index
      %15 = vector.load %arg2[%c0_17, %c0_18, %c0_19, %c1, %c0_20] : memref<1x1x18x18x4xbf16, #tpu.memory_space<vmem>>, vector<1x1x16x16x4xbf16>
      %16 = vector.shape_cast %15 : vector<1x1x16x16x4xbf16> to vector<16x16x4xbf16>
      %17 = vector.shape_cast %16 : vector<16x16x4xbf16> to vector<256x4xbf16>
      %c0_21 = arith.constant 0 : index
      %c4 = arith.constant 4 : index
      %18 = vector.load %arg6[%c0_21, %c4] : memref<256x36xbf16, #tpu.memory_space<vmem>>, vector<256x4xbf16>
      tpu.vector_store %arg6[%c0_21, %c4], %17 {strides = array<i32>} : memref<256x36xbf16, #tpu.memory_space<vmem>>, vector<256x4xbf16>,
      %c0_22 = arith.constant 0 : index
      %c0_23 = arith.constant 0 : index
      %c0_24 = arith.constant 0 : index
      %c2 = arith.constant 2 : index
      %c0_25 = arith.constant 0 : index
      %19 = vector.load %arg2[%c0_22, %c0_23, %c0_24, %c2, %c0_25] : memref<1x1x18x18x4xbf16, #tpu.memory_space<vmem>>, vector<1x1x16x16x4xbf16>
      %20 = vector.shape_cast %19 : vector<1x1x16x16x4xbf16> to vector<16x16x4xbf16>
      %21 = vector.shape_cast %20 : vector<16x16x4xbf16> to vector<256x4xbf16>
      %c0_26 = arith.constant 0 : index
      %c8 = arith.constant 8 : index
      %22 = vector.load %arg6[%c0_26, %c8] : memref<256x36xbf16, #tpu.memory_space<vmem>>, vector<256x4xbf16>
      tpu.vector_store %arg6[%c0_26, %c8], %21 {strides = array<i32>} : memref<256x36xbf16, #tpu.memory_space<vmem>>, vector<256x4xbf16>,
      %c0_27 = arith.constant 0 : index
      %c0_28 = arith.constant 0 : index
      %c1_29 = arith.constant 1 : index
      %c0_30 = arith.constant 0 : index
      %c0_31 = arith.constant 0 : index
      %23 = vector.load %arg2[%c0_27, %c0_28, %c1_29, %c0_30, %c0_31] : memref<1x1x18x18x4xbf16, #tpu.memory_space<vmem>>, vector<1x1x16x16x4xbf16>
      %24 = vector.shape_cast %23 : vector<1x1x16x16x4xbf16> to vector<16x16x4xbf16>
      %25 = vector.shape_cast %24 : vector<16x16x4xbf16> to vector<256x4xbf16>
      %c0_32 = arith.constant 0 : index
      %c12 = arith.constant 12 : index
      %26 = vector.load %arg6[%c0_32, %c12] : memref<256x36xbf16, #tpu.memory_space<vmem>>, vector<256x4xbf16>
      tpu.vector_store %arg6[%c0_32, %c12], %25 {strides = array<i32>} : memref<256x36xbf16, #tpu.memory_space<vmem>>, vector<256x4xbf16>,
      %c0_33 = arith.constant 0 : index
      %c0_34 = arith.constant 0 : index
      %c1_35 = arith.constant 1 : index
      %c1_36 = arith.constant 1 : index
      %c0_37 = arith.constant 0 : index
      %27 = vector.load %arg2[%c0_33, %c0_34, %c1_35, %c1_36, %c0_37] : memref<1x1x18x18x4xbf16, #tpu.memory_space<vmem>>, vector<1x1x16x16x4xbf16>
      %28 = vector.shape_cast %27 : vector<1x1x16x16x4xbf16> to vector<16x16x4xbf16>
      %29 = vector.shape_cast %28 : vector<16x16x4xbf16> to vector<256x4xbf16>
      %c0_38 = arith.constant 0 : index
      %c16 = arith.constant 16 : index
      %30 = vector.load %arg6[%c0_38, %c16] : memref<256x36xbf16, #tpu.memory_space<vmem>>, vector<256x4xbf16>
      tpu.vector_store %arg6[%c0_38, %c16], %29 {strides = array<i32>} : memref<256x36xbf16, #tpu.memory_space<vmem>>, vector<256x4xbf16>,
      %c0_39 = arith.constant 0 : index
      %c0_40 = arith.constant 0 : index
      %c1_41 = arith.constant 1 : index
      %c2_42 = arith.constant 2 : index
      %c0_43 = arith.constant 0 : index
      %31 = vector.load %arg2[%c0_39, %c0_40, %c1_41, %c2_42, %c0_43] : memref<1x1x18x18x4xbf16, #tpu.memory_space<vmem>>, vector<1x1x16x16x4xbf16>
      %32 = vector.shape_cast %31 : vector<1x1x16x16x4xbf16> to vector<16x16x4xbf16>
      %33 = vector.shape_cast %32 : vector<16x16x4xbf16> to vector<256x4xbf16>
      %c0_44 = arith.constant 0 : index
      %c20 = arith.constant 20 : index
      %34 = vector.load %arg6[%c0_44, %c20] : memref<256x36xbf16, #tpu.memory_space<vmem>>, vector<256x4xbf16>
      tpu.vector_store %arg6[%c0_44, %c20], %33 {strides = array<i32>} : memref<256x36xbf16, #tpu.memory_space<vmem>>, vector<256x4xbf16>,
      %c0_45 = arith.constant 0 : index
      %c0_46 = arith.constant 0 : index
      %c2_47 = arith.constant 2 : index
      %c0_48 = arith.constant 0 : index
      %c0_49 = arith.constant 0 : index
      %35 = vector.load %arg2[%c0_45, %c0_46, %c2_47, %c0_48, %c0_49] : memref<1x1x18x18x4xbf16, #tpu.memory_space<vmem>>, vector<1x1x16x16x4xbf16>
      %36 = vector.shape_cast %35 : vector<1x1x16x16x4xbf16> to vector<16x16x4xbf16>
      %37 = vector.shape_cast %36 : vector<16x16x4xbf16> to vector<256x4xbf16>
      %c0_50 = arith.constant 0 : index
      %c24 = arith.constant 24 : index
      %38 = vector.load %arg6[%c0_50, %c24] : memref<256x36xbf16, #tpu.memory_space<vmem>>, vector<256x4xbf16>
      tpu.vector_store %arg6[%c0_50, %c24], %37 {strides = array<i32>} : memref<256x36xbf16, #tpu.memory_space<vmem>>, vector<256x4xbf16>,
      %c0_51 = arith.constant 0 : index
      %c0_52 = arith.constant 0 : index
      %c2_53 = arith.constant 2 : index
      %c1_54 = arith.constant 1 : index
      %c0_55 = arith.constant 0 : index
      %39 = vector.load %arg2[%c0_51, %c0_52, %c2_53, %c1_54, %c0_55] : memref<1x1x18x18x4xbf16, #tpu.memory_space<vmem>>, vector<1x1x16x16x4xbf16>
      %40 = vector.shape_cast %39 : vector<1x1x16x16x4xbf16> to vector<16x16x4xbf16>
      %41 = vector.shape_cast %40 : vector<16x16x4xbf16> to vector<256x4xbf16>
      %c0_56 = arith.constant 0 : index
      %c28 = arith.constant 28 : index
      %42 = vector.load %arg6[%c0_56, %c28] : memref<256x36xbf16, #tpu.memory_space<vmem>>, vector<256x4xbf16>
      tpu.vector_store %arg6[%c0_56, %c28], %41 {strides = array<i32>} : memref<256x36xbf16, #tpu.memory_space<vmem>>, vector<256x4xbf16>,
      %c0_57 = arith.constant 0 : index
      %c0_58 = arith.constant 0 : index
      %c2_59 = arith.constant 2 : index
      %c2_60 = arith.constant 2 : index
      %c0_61 = arith.constant 0 : index
      %43 = vector.load %arg2[%c0_57, %c0_58, %c2_59, %c2_60, %c0_61] : memref<1x1x18x18x4xbf16, #tpu.memory_space<vmem>>, vector<1x1x16x16x4xbf16>
      %44 = vector.shape_cast %43 : vector<1x1x16x16x4xbf16> to vector<16x16x4xbf16>
      %45 = vector.shape_cast %44 : vector<16x16x4xbf16> to vector<256x4xbf16>
      %c0_62 = arith.constant 0 : index
      %c32 = arith.constant 32 : index
      %46 = vector.load %arg6[%c0_62, %c32] : memref<256x36xbf16, #tpu.memory_space<vmem>>, vector<256x4xbf16>
      tpu.vector_store %arg6[%c0_62, %c32], %45 {strides = array<i32>} : memref<256x36xbf16, #tpu.memory_space<vmem>>, vector<256x4xbf16>,
    } else {
    }
    %c0 = arith.constant 0 : index
    %c0_1 = arith.constant 0 : index
    %3 = vector.load %arg6[%c0, %c0_1] : memref<256x36xbf16, #tpu.memory_space<vmem>>, vector<256x36xbf16>
    %c0_2 = arith.constant 0 : index
    %c0_3 = arith.constant 0 : index
    %4 = vector.load %arg3[%c0_2, %c0_3] : memref<36x128xbf16, #tpu.memory_space<vmem>>, vector<36x128xbf16>
    %cst = arith.constant dense<0.000000e+00> : vector<256x128xf32>
    %5 = tpu.matmul %3, %4, %cst {dimension_numbers = #tpu.dot_dimension_numbers<[1], [0], [0], [1], [0, 0, 1, 1], [], []>} : vector<256x36xbf16>, vector<36x128xbf16>, vector<256x128xf32> -> vector<256x128xf32>
    %c0_4 = arith.constant 0 : index
    %c0_5 = arith.constant 0 : index
    %6 = vector.load %arg4[%c0_4, %c0_5] : memref<1x128xf32, #tpu.memory_space<vmem>>, vector<1x128xf32>
    %7 = vector.broadcast %6 : vector<1x128xf32> to vector<256x128xf32>
    %8 = arith.addf %5, %7 : vector<256x128xf32>
    %9 = vector.shape_cast %8 : vector<256x128xf32> to vector<1x16x16x128xf32>
    %c0_6 = arith.constant 0 : index
    %c0_7 = arith.constant 0 : index
    %c0_8 = arith.constant 0 : index
    %c0_9 = arith.constant 0 : index
    %10 = vector.load %arg5[%c0_6, %c0_7, %c0_8, %c0_9] : memref<1x16x16x128xf32, #tpu.memory_space<vmem>>, vector<1x16x16x128xf32>
    tpu.vector_store %arg5[%c0_6, %c0_7, %c0_8, %c0_9], %9 {strides = array<i32>} : memref<1x16x16x128xf32, #tpu.memory_space<vmem>>, vector<1x16x16x128xf32>,
    return
  }
  func.func @transform_0(%arg0: i32, %arg1: i32) -> (i32, i32, i32, i32, i32) {
    %c0_i32 = arith.constant 0 : i32
    %c0_i32_0 = arith.constant 0 : i32
    %c0_i32_1 = arith.constant 0 : i32
    %c0_i32_2 = arith.constant 0 : i32
    %c0_i32_3 = arith.constant 0 : i32
    return %arg0, %c0_i32, %c0_i32_0, %c0_i32_1, %c0_i32_2 : i32, i32, i32, i32, i32
  }
  func.func @transform_1(%arg0: i32, %arg1: i32) -> (i32, i32) {
    %c0_i32 = arith.constant 0 : i32
    %c0_i32_0 = arith.constant 0 : i32
    return %c0_i32, %arg1 : i32, i32
  }
  func.func @transform_2(%arg0: i32, %arg1: i32) -> (i32, i32) {
    %c0_i32 = arith.constant 0 : i32
    %c0_i32_0 = arith.constant 0 : i32
    return %c0_i32, %arg1 : i32, i32
  }
  func.func @transform_3(%arg0: i32, %arg1: i32) -> (i32, i32, i32, i32) {
    %c0_i32 = arith.constant 0 : i32
    %c0_i32_0 = arith.constant 0 : i32
    %c0_i32_1 = arith.constant 0 : i32
    return %arg0, %c0_i32, %c0_i32_0, %arg1 : i32, i32, i32, i32
  }
}

</mosaic_0001>

<bundles_post_ra>
// kernel: conv_layer_forward.1
= control target key start
LH: loop header
LB: loop body
LE: loop exit
PB: predicated region body
PF: predicated region fallthrough
CT: control target
= control target key end

     0   :  { %s4408_s12 = smov 0   ;;  %s4410_s13 = smov 0   ;;  %s5615_s0 = inlined_call_operand.vmem [shape: bf16[2,1,18,18,4], index: 0, kind: input, shape index: {}]   ;;  %s5616_s1 = inlined_call_operand.vmem [shape: bf16[36,128], index: 1, kind: input, shape index: {}]   ;;  %s5617_s2 = inlined_call_operand.vmem [shape: f32[1,128], index: 2, kind: input, shape index: {}]   ;;  %s5618_s3 = inlined_call_operand.vmem [shape: f32[2,16,16,128], index: 3, kind: output, shape index: {}]  }
   0x1   :  { %s4412_s14 = smov 0  }
   0x2 LB: > { %s25_s15 = sadd.s32 1, %s4374_s13  ;;  %p3732_p0 = scmp.ge.s32.totalorder %s4378_s14, 1  ;;  %s4378_s14 = sphi %s4412_s14, %s13_s14   ;;  %s4374_s13 = sphi %s4410_s13, %s5624_s13   ;;  %s4370_s12 = sphi %s4408_s12, %s5623_s12  }
   0x3   : > { %p27_p1 = scmp.ge.s32.totalorder %s25_s15, 2  ;;  %p168_p2 = scmp.lt.s32.totalorder %s4378_s14, 3 }
   0x5   : > { %s5626_s15 = smov (%p27_p1, %s25_s15), 0  ;;  %p169_p3 = pnand %p3732_p0, %p168_p2 }
   0x6   : > { %p202_p4 = scmp.lt.s32.totalorder (!%p169_p3), %s4370_s12, 1  ;;  %vm1016_vm0 = vcmask (!%p169_p3), 1042432   ;;  %vm1017_vm1 = vcmask (!%p169_p3), 1046532   ;;  %s4380_s20 = smov (!%p169_p3), 12   ;;  %vm420_vm3 = vsmask.f32 (!%p169_p3), 3328 }
   0x7   : > { %172 = sbr.rel (%p169_p3) target bundleno = 659 (0x293), region = 32  ;;  %vm4434_vm2 = vmor (!%p169_p3), %vm1016_vm0, %vm1017_vm1  ;;  %vm421_vm4 = vsmask.f32 (!%p169_p3), 7440  ;;  %s4381_s21 = smov (!%p169_p3), 8   ;;  %vm355_vm6 = vcmask (!%p169_p3), 31744   ;;  %vm903_vm7 = vcmask (!%p169_p3), 64544  }
   0x8   : > { %vm4484_vm5 = vmor (!%p169_p3), %vm420_vm3, %vm421_vm4  ;;  %s4382_s22 = smov (!%p169_p3), 4   ;;  %s4383_s23 = smov (!%p169_p3), 16   ;;  %vm1227_vm8 = vcmask (!%p169_p3), 97344   ;;  %vm1405_vm9 = vcmask (!%p169_p3), 130144   ;;  %vm1950_vm10 = vcmask (!%p169_p3), 162944   ;;  %vm2271_vm11 = vcmask (!%p169_p3), 195744  }
   0x9   : > { %s4384_s24 = smov (!%p169_p3), 20   ;;  %s4385_s25 = smov (!%p169_p3), 24   ;;  %vm2449_vm12 = vcmask (!%p169_p3), 228544   ;;  %vm2994_vm13 = vcmask (!%p169_p3), 261344   ;;  %vm3315_vm14 = vcmask (!%p169_p3), 294144   ;;  %vm3375_vm15 = vcmask (!%p169_p3), 293888  }
   0xa   : > { %s4386_s26 = smov (!%p169_p3), 28   ;;  %s4387_s27 = smov (!%p169_p3), 32   ;;  %vm3424_vm0 = vcmask (!%p169_p3), 1041408  }
   0xe   : > { %s5628_s12 = smov (!%p202_p4, %s4370_s12), 1 }
   0xf   : > { %s4272_s16 = smul.u32 216, %s5628_s12  ;;  %s4206_s7 = sshll.u32 %s5628_s12, 8 }
  0x11   : > { %s4432_s19 = scalar_lea.vmem %s5615_s0, %s4272_s16  ;;  %s5540_s16 = scalar_lea.vmem %s5618_s3, %s4206_s7 }
  0x12   : > { %v4305_v1 = vld [vmem:[%s4432_s19 + $0x6c] sm:$0xff]   ;;  %v944_v3 = vld [vmem:[%s4432_s19 + $0x60] sm:$0xe]  ;;  %v945_v4 = vld [vmem:[%s4432_s19 + $0x64] sm:$0xf] }
  0x13   : > { %v4306_v2 = vld [vmem:[%s4432_s19 + $0xc] sm:$0xff]   ;;  %1373 = vrot.lane.b32.xlu1 %v4305_v1, %s4380_s20  ;;  %v946_v5 = vld [vmem:[%s4432_s19 + $0x68] sm:$0x1]  ;;  %v3776_v6 = vrot.slane %v944_v3, 9  ;;  %v1077_v7 = vrot.slane %v945_v4, 5 }
  0x14   : > { %1357 = vrot.lane.b32.xlu0 %v4306_v2, %s4380_s20  ;;  %v1080_v8 = vrot.slane %v946_v5, 5  ;;  %v920_v9 = vld [vmem:[%s4432_s19] sm:$0xe]  ;;  %v921_v10 = vld [vmem:[%s4432_s19 + $0x4] sm:$0xf] }
  0x15   : > { %v922_v11 = vld [vmem:[%s4432_s19 + $0x8] sm:$0x1]  ;;  %v3768_v12 = vrot.slane %v920_v9, 9  ;;  %v1078_v13 = vsel %vm4434_vm2, %v3776_v6, %v1077_v7  ;;  %v1079_v14 = vrot.slane %v1077_v7, 4  ;;  %v1021_v15 = vrot.slane %v921_v10, 5 }
  0x16   : > { %v1024_v16 = vrot.slane %v922_v11, 5  ;;  %v947_v17 = vld [vmem:[%s4432_s19 + $0x6c] sm:$0xe]  ;;  %v948_v18 = vld [vmem:[%s4432_s19 + $0x70] sm:$0xf] }
  0x17   : > { %v949_v19 = vld [vmem:[%s4432_s19 + $0x74] sm:$0x1]  ;;  %v3777_v20 = vrot.slane %v947_v17, 9  ;;  %v1081_v21 = vsel %vm4434_vm2, %v1079_v14, %v1080_v8  ;;  %v1022_v22 = vsel %vm4434_vm2, %v3768_v12, %v1021_v15  ;;  %v1023_v23 = vrot.slane %v1021_v15, 4  ;;  %v923_v25 = vld [vmem:[%s4432_s19 + $0xc] sm:$0xe] }
  0x18   : > { %v1084_v24 = vrot.slane %v948_v18, 5  ;;  %v924_v26 = vld [vmem:[%s4432_s19 + $0x10] sm:$0xf]  ;;  %v3792_v27 = vcombine.low %v1078_v13, %v1081_v21  ;;  %v1087_v28 = vrot.slane %v949_v19, 5  ;;  %v925_v29 = vld [vmem:[%s4432_s19 + $0x14] sm:$0x1] }
  0x19   : > { %v3769_v30 = vrot.slane %v923_v25, 9  ;;  %v1028_v31 = vrot.slane %v924_v26, 5  ;;  %v1025_v32 = vsel %vm4434_vm2, %v1023_v23, %v1024_v16  ;;  %v1031_v35 = vrot.slane %v925_v29, 5  ;;  %v375_v36 = vld [vmem:[%s4432_s19 + $0xc] sm:$0xf] }
  0x1a   : > { %v1085_v33 = vsel %vm4434_vm2, %v3777_v20, %v1084_v24  ;;  %v1086_v34 = vrot.slane %v1084_v24, 4  ;;  %v376_v37 = vld [vmem:[%s4432_s19 + $0x10] sm:$0xf]  ;;  %1195 = vrot.lane.b32.xlu1 %v3792_v27, %s4381_s21  ;;  %v3784_v38 = vcombine.low %v1022_v22, %v1025_v32  ;;  %v377_v41 = vld [vmem:[%s4432_s19 + $0x14] sm:$0x1]  ;;  %v448_v42 = vshrl.u32 %v375_v36, 16 }
  0x1b   : > { %v1029_v39 = vsel %vm4434_vm2, %v3769_v30, %v1028_v31  ;;  %v1030_v40 = vrot.slane %v1028_v31, 4  ;;  %v372_v43 = vld [vmem:[%s4432_s19] sm:$0xf]  ;;  %v451_v45 = vshll.u32 %v375_v36, 16  ;;  %v457_v46 = vshll.u32 %v376_v37, 16 }
  0x1c   : > { %v1088_v44 = vsel %vm4434_vm2, %v1086_v34, %v1087_v28  ;;  %v461_v47 = vshrl.u32 %v376_v37, 16  ;;  %v373_v48 = vld [vmem:[%s4432_s19 + $0x4] sm:$0xf]  ;;  %1179 = vrot.lane.b32.xlu0 %v3784_v38, %s4381_s21  ;;  %v450_v51 = vrot.slane %v448_v42, 4  ;;  %v467_v52 = vshll.u32 %v377_v41, 16 }
  0x1d   : > { %v3793_v49 = vcombine.low %v1085_v33, %v1088_v44  ;;  %v1032_v50 = vsel %vm4434_vm2, %v1030_v40, %v1031_v35  ;;  %v374_v53 = vld [vmem:[%s4432_s19 + $0x8] sm:$0x1]  ;;  %v453_v55 = vrot.slane %v451_v45, 5  ;;  %v459_v56 = vrot.slane %v457_v46, 5  ;;  %v399_v58 = vld [vmem:[%s4432_s19 + $0x6c] sm:$0xf] }
  0x1e   : > { %v3785_v54 = vcombine.low %v1029_v39, %v1032_v50  ;;  %v463_v57 = vrot.slane %v461_v47, 4  ;;  %v469_v59 = vrot.slane %v467_v52, 5  ;;  %v424_v60 = vshrl.u32 %v372_v43, 16  ;;  %v400_v4 = vld [vmem:[%s4432_s19 + $0x70] sm:$0xf] }
  0x1f   : > { %1197 = vrot.lane.b32.xlu1 %v3793_v49, %s4381_s21  ;;  %v427_v61 = vshll.u32 %v372_v43, 16  ;;  %v433_v62 = vshll.u32 %v373_v48, 16  ;;  %v454_v63 = vor.u32 %v453_v55, %v450_v51  ;;  %v437_v2 = vshrl.u32 %v373_v48, 16  ;;  %v401_v9 = vld [vmem:[%s4432_s19 + $0x74] sm:$0x1] }
  0x20   : > { %v464_v1 = vor.u32 %v463_v57, %v459_v56  ;;  %v443_v3 = vshll.u32 %v374_v53, 16  ;;  %1181 = vrot.lane.b32.xlu0 %v3785_v54, %s4381_s21  ;;  %v426_v6 = vrot.slane %v424_v60, 4  ;;  %v640_v10 = vshrl.u32 %v399_v58, 16  ;;  %v396_v11 = vld [vmem:[%s4432_s19 + $0x60] sm:$0xf] }
  0x21   : > { %v429_v7 = vrot.slane %v427_v61, 5  ;;  %v435_v8 = vrot.slane %v433_v62, 5  ;;  %v455_v12 = vrot.slane %v454_v63, 4  ;;  %v439_v14 = vrot.slane %v437_v2, 4  ;;  %v397_v16 = vld [vmem:[%s4432_s19 + $0x64] sm:$0xf] }
  0x22   : > { %v465_v13 = vrot.slane %v464_v1, 4  ;;  %v445_v15 = vrot.slane %v443_v3, 5  ;;  %v642_v18 = vrot.slane %v640_v10, 4  ;;  %v643_v19 = vshll.u32 %v399_v58, 16  ;;  %v398_v35 = vld [vmem:[%s4432_s19 + $0x68] sm:$0x1] }
  0x23   : > { %v430_v17 = vor.u32 %v429_v7, %v426_v6  ;;  %v649_v20 = vshll.u32 %v400_v4, 16  ;;  %v460_v21 = vsel %vm4484_vm5, %v455_v12, %v459_v56  ;;  %v440_v23 = vor.u32 %v439_v14, %v435_v8  ;;  %v3872_v38 = vld [vmem:[%s4432_s19 + $0x6c] sm:$0xf]  ;;  %v3873_v43 = vld [vmem:[%s4432_s19 + $0x70] sm:$0xf]  ;;  %v4307_v6 = vld [vmem:[%s4432_s19 + $0x78] sm:$0xff]  }
  0x24   : > { %v470_v22 = vsel %vm4484_vm5, %v465_v13, %v469_v59  ;;  %v653_v24 = vshrl.u32 %v400_v4, 16  ;;  %v645_v27 = vrot.slane %v643_v19, 5  ;;  %v659_v31 = vshll.u32 %v401_v9, 16  ;;  %v3874_v54 = vld [vmem:[%s4432_s19 + $0x74] sm:$0x1] }
  0x25   : > { %v3753_v25 = vcombine.low %v460_v21, %v470_v22  ;;  %v431_v26 = vrot.slane %v430_v17, 4  ;;  %v651_v28 = vrot.slane %v649_v20, 5  ;;  %v441_v29 = vrot.slane %v440_v23, 4  ;;  %v3848_v57 = vld [vmem:[%s4432_s19 + $0xc] sm:$0xf] }
  0x26   : > { %v655_v30 = vrot.slane %v653_v24, 4  ;;  %v616_v32 = vshrl.u32 %v396_v11, 16  ;;  %v646_v34 = vor.u32 %v645_v27, %v642_v18  ;;  %v619_v36 = vshll.u32 %v396_v11, 16  ;;  %v3849_v62 = vld [vmem:[%s4432_s19 + $0x10] sm:$0xf] }
  0x27   : > { %857 = vrot.lane.b32.xlu1 %v3753_v25, %s4382_s22  ;;  %v436_v33 = vsel %vm4484_vm5, %v431_v26, %v435_v8  ;;  %v625_v37 = vshll.u32 %v397_v16, 16  ;;  %v446_v39 = vsel %vm4484_vm5, %v441_v29, %v445_v15  ;;  %v661_v41 = vrot.slane %v659_v31, 5  ;;  %v3850_v12 = vld [vmem:[%s4432_s19 + $0x14] sm:$0x1]  ;;  %v3875_v15 = vld [vmem:[%s4432_s19 + $0x78] sm:$0xf] }
  0x28   : > { %v656_v40 = vor.u32 %v655_v30, %v651_v28  ;;  %v618_v42 = vrot.slane %v616_v32, 4  ;;  %v3752_v44 = vcombine.low %v436_v33, %v446_v39  ;;  %v647_v45 = vrot.slane %v646_v34, 4  ;;  %v3876_v27 = vld [vmem:[%s4432_s19 + $0x7c] sm:$0xf]  ;;  %v3877_v33 = vld [vmem:[%s4432_s19 + $0x80] sm:$0x1] }
  0x29   : > { %v621_v46 = vrot.slane %v619_v36, 5  ;;  %v627_v47 = vrot.slane %v625_v37, 5  ;;  %v629_v49 = vshrl.u32 %v397_v16, 16  ;;  %v635_v50 = vshll.u32 %v398_v35, 16  ;;  %v3851_v34 = vld [vmem:[%s4432_s19 + $0x18] sm:$0xf] }
  0x2a   : > { %v657_v48 = vrot.slane %v656_v40, 4  ;;  %v1663_v51 = vshrl.u32 %v3872_v38, 16  ;;  %855 = vrot.lane.b32.xlu0 %v3752_v44, %s4382_s22  ;;  %v652_v52 = vsel %vm4484_vm5, %v647_v45, %v651_v28  ;;  %v1666_v55 = vshll.u32 %v3872_v38, 16  ;;  %v3852_v39 = vld [vmem:[%s4432_s19 + $0x1c] sm:$0xf] }
  0x2b   : > { %v622_v53 = vor.u32 %v621_v46, %v618_v42  ;;  %v1672_v56 = vshll.u32 %v3873_v43, 16  ;;  %v631_v59 = vrot.slane %v629_v49, 4  ;;  %v637_v60 = vrot.slane %v635_v50, 5  ;;  %v4308_v40 = vld [vmem:[%s4432_s19 + $0x18] sm:$0xff]   ;;  %v3853_v45 = vld [vmem:[%s4432_s19 + $0x20] sm:$0x1] }
  0x2c   : > { %v662_v58 = vsel %vm4484_vm5, %v657_v48, %v661_v41  ;;  %v1665_v61 = vrot.slane %v1663_v51, 4  ;;  %v1668_v2 = vrot.slane %v1666_v55, 5  ;;  %v1676_v7 = vshrl.u32 %v3873_v43, 16  ;;  %v3936_v50 = vld [vmem:[%s4432_s19 + $0x6c] sm:$0xe] }
  0x2d   : > { %v3761_v63 = vcombine.low %v652_v52, %v662_v58  ;;  %v623_v1 = vrot.slane %v622_v53, 4  ;;  %v1674_v3 = vrot.slane %v1672_v56, 5  ;;  %v632_v4 = vor.u32 %v631_v59, %v627_v47  ;;  %v3937_v55 = vld [vmem:[%s4432_s19 + $0x70] sm:$0xf] }
  0x2e   : > { %v1682_v8 = vshll.u32 %v3874_v54, 16  ;;  %v1471_v9 = vshrl.u32 %v3848_v57, 16  ;;  %v1669_v11 = vor.u32 %v1668_v2, %v1665_v61  ;;  %v1474_v13 = vshll.u32 %v3848_v57, 16  ;;  %v3912_v61 = vld [vmem:[%s4432_s19 + $0xc] sm:$0xe] }
  0x2f   : > { %873 = vrot.lane.b32.xlu1 %v3761_v63, %s4382_s22  ;;  %v628_v10 = vsel %vm4484_vm5, %v623_v1, %v627_v47  ;;  %v1480_v14 = vshll.u32 %v3849_v62, 16  ;;  %v633_v16 = vrot.slane %v632_v4, 4  ;;  %v1678_v17 = vrot.slane %v1676_v7, 4 }
  0x30   : > { %v1684_v18 = vrot.slane %v1682_v8, 5  ;;  %v1473_v19 = vrot.slane %v1471_v9, 4  ;;  %v1670_v20 = vrot.slane %v1669_v11, 4  ;;  %v1476_v21 = vrot.slane %v1474_v13, 5  ;;  %v3914_v9 = vld [vmem:[%s4432_s19 + $0x14] sm:$0x1] }
  0x31   : > { %v1482_v22 = vrot.slane %v1480_v14, 5  ;;  %v1484_v23 = vshrl.u32 %v3849_v62, 16  ;;  %v638_v24 = vsel %vm4484_vm5, %v633_v16, %v637_v60  ;;  %v1679_v25 = vor.u32 %v1678_v17, %v1674_v3  ;;  %v3938_v60 = vld [vmem:[%s4432_s19 + $0x74] sm:$0x1] }
  0x32   : > { %v1490_v26 = vshll.u32 %v3850_v12, 16  ;;  %v1687_v28 = vshrl.u32 %v3875_v15, 16  ;;  %v3760_v29 = vcombine.low %v628_v10, %v638_v24  ;;  %v1675_v30 = vsel %vm4484_vm5, %v1670_v20, %v1674_v3  ;;  %v3913_v3 = vld [vmem:[%s4432_s19 + $0x10] sm:$0xf] }
  0x33   : > { %1375 = vrot.lane.b32.xlu1 %v4307_v6, %s4380_s20  ;;  %v1477_v31 = vor.u32 %v1476_v21, %v1473_v19  ;;  %v1486_v32 = vrot.slane %v1484_v23, 4  ;;  %v1680_v35 = vrot.slane %v1679_v25, 4  ;;  %v1690_v38 = vshll.u32 %v3875_v15, 16 }
  0x34   : > { %v1492_v36 = vrot.slane %v1490_v26, 5  ;;  %v1689_v37 = vrot.slane %v1687_v28, 4  ;;  %871 = vrot.lane.b32.xlu0 %v3760_v29, %s4382_s22  ;;  %v1696_v43 = vshll.u32 %v3876_v27, 16  ;;  %v1700_v44 = vshrl.u32 %v3876_v27, 16  ;;  %v3940_v27 = vld [vmem:[%s4432_s19 + $0x7c] sm:$0xf] }
  0x35   : > { %v1478_v41 = vrot.slane %v1477_v31, 4  ;;  %v1487_v42 = vor.u32 %v1486_v32, %v1482_v22  ;;  %v1685_v46 = vsel %vm4484_vm5, %v1680_v35, %v1684_v18  ;;  %v1692_v47 = vrot.slane %v1690_v38, 5  ;;  %v3941_v28 = vld [vmem:[%s4432_s19 + $0x80] sm:$0x1]  ;;  %v3916_v38 = vld [vmem:[%s4432_s19 + $0x1c] sm:$0xf] }
  0x36   : > { %v1706_v48 = vshll.u32 %v3877_v33, 16  ;;  %v1495_v49 = vshrl.u32 %v3851_v34, 16  ;;  %v3904_v51 = vcombine.low %v1675_v30, %v1685_v46  ;;  %v1698_v54 = vrot.slane %v1696_v43, 5  ;;  %v3915_v33 = vld [vmem:[%s4432_s19 + $0x18] sm:$0xe] }
  0x37   : > { %v1483_v52 = vsel %vm4484_vm5, %v1478_v41, %v1482_v22  ;;  %v1488_v53 = vrot.slane %v1487_v42, 4  ;;  %v1693_v56 = vor.u32 %v1692_v47, %v1689_v37  ;;  %v1702_v57 = vrot.slane %v1700_v44, 4  ;;  %v3939_v22 = vld [vmem:[%s4432_s19 + $0x78] sm:$0xe] }
  0x38   : > { %v1708_v58 = vrot.slane %v1706_v48, 5  ;;  %v1497_v59 = vrot.slane %v1495_v49, 4  ;;  %1359 = vrot.lane.b32.xlu0 %v4308_v40, %s4380_s20  ;;  %1918 = vrot.lane.b32.xlu1 %v3904_v51, %s4383_s23  ;;  %v1498_v63 = vshll.u32 %v3851_v34, 16  ;;  %v1504_v1 = vshll.u32 %v3852_v39, 16  ;;  %v4064_v44 = vld [vmem:[%s4432_s19 + $0x78] sm:$0xf] }
  0x39   : > { %v1493_v62 = vsel %vm4484_vm5, %v1488_v53, %v1492_v36  ;;  %v1508_v2 = vshrl.u32 %v3852_v39, 16  ;;  %v1694_v6 = vrot.slane %v1693_v56, 4  ;;  %v1703_v7 = vor.u32 %v1702_v57, %v1698_v54  ;;  %v3917_v39 = vld [vmem:[%s4432_s19 + $0x20] sm:$0x1] }
  0x3a   : > { %v3896_v4 = vcombine.low %v1483_v52, %v1493_v62  ;;  %v1514_v8 = vshll.u32 %v3853_v45, 16  ;;  %v1500_v10 = vrot.slane %v1498_v63, 5  ;;  %v1506_v11 = vrot.slane %v1504_v1, 5  ;;  %v4065_v45 = vld [vmem:[%s4432_s19 + $0x7c] sm:$0xf] }
  0x3b   : > { %v1510_v12 = vrot.slane %v1508_v2, 4  ;;  %v3968_v13 = vrot.slane %v3936_v50, 9  ;;  %v1699_v14 = vsel %vm4484_vm5, %v1694_v6, %v1698_v54  ;;  %v1704_v15 = vrot.slane %v1703_v7, 4  ;;  %v4066_v54 = vld [vmem:[%s4432_s19 + $0x80] sm:$0x1] }
  0x3c   : > { %v1516_v16 = vrot.slane %v1514_v8, 5  ;;  %v2121_v17 = vrot.slane %v3937_v55, 5  ;;  %1902 = vrot.lane.b32.xlu0 %v3896_v4, %s4383_s23  ;;  %v1501_v18 = vor.u32 %v1500_v10, %v1497_v59  ;;  %v2124_v20 = vrot.slane %v3938_v60, 5  ;;  %v4040_v59 = vld [vmem:[%s4432_s19 + $0x18] sm:$0xf] }
  0x3d   : > { %v1511_v19 = vor.u32 %v1510_v12, %v1506_v11  ;;  %v3960_v21 = vrot.slane %v3912_v61, 9  ;;  %v1709_v23 = vsel %vm4484_vm5, %v1704_v15, %v1708_v58  ;;  %v2065_v26 = vrot.slane %v3913_v3, 5  ;;  %v4041_v1 = vld [vmem:[%s4432_s19 + $0x1c] sm:$0xf]  ;;  %v4042_v10 = vld [vmem:[%s4432_s19 + $0x20] sm:$0x1] }
  0x3e   : > { %v2122_v24 = vsel %vm4434_vm2, %v3968_v13, %v2121_v17  ;;  %v2123_v25 = vrot.slane %v2121_v17, 4  ;;  %v3905_v29 = vcombine.low %v1699_v14, %v1709_v23  ;;  %v1502_v30 = vrot.slane %v1501_v18, 4  ;;  %v4309_v17 = vld [vmem:[%s4432_s19 + $0x78] sm:$0xff]  }
  0x3f   : > { %v1512_v31 = vrot.slane %v1511_v19, 4  ;;  %v2068_v32 = vrot.slane %v3914_v9, 5  ;;  %v2066_v35 = vsel %vm4434_vm2, %v3960_v21, %v2065_v26  ;;  %v2067_v36 = vrot.slane %v2065_v26, 4 }
  0x40   : > { %v2125_v34 = vsel %vm4434_vm2, %v2123_v25, %v2124_v20  ;;  %v3969_v37 = vrot.slane %v3939_v22, 9  ;;  %1920 = vrot.lane.b32.xlu1 %v3905_v29, %s4383_s23  ;;  %v1507_v40 = vsel %vm4484_vm5, %v1502_v30, %v1506_v11  ;;  %v2128_v43 = vrot.slane %v3940_v27, 5  ;;  %v4068_v22 = vld [vmem:[%s4432_s19 + $0x88] sm:$0xf]  ;;  %v4310_v27 = vld [vmem:[%s4432_s19 + $0x18] sm:$0xff]  }
  0x41   : > { %v1517_v41 = vsel %vm4484_vm5, %v1512_v31, %v1516_v16  ;;  %v3984_v42 = vcombine.low %v2122_v24, %v2125_v34  ;;  %v2069_v47 = vsel %vm4434_vm2, %v2067_v36, %v2068_v32  ;;  %v2131_v48 = vrot.slane %v3941_v28, 5  ;;  %v4067_v16 = vld [vmem:[%s4432_s19 + $0x84] sm:$0xf] }
  0x42   : > { %v3897_v46 = vcombine.low %v1507_v40, %v1517_v41  ;;  %v3961_v49 = vrot.slane %v3915_v33, 9  ;;  %v3976_v50 = vcombine.low %v2066_v35, %v2069_v47  ;;  %v2129_v51 = vsel %vm4434_vm2, %v3969_v37, %v2128_v43  ;;  %v4069_v35 = vld [vmem:[%s4432_s19 + $0x8c] sm:$0x1]  ;;  %v4043_v37 = vld [vmem:[%s4432_s19 + $0x24] sm:$0xf] }
  0x43   : > { %v2130_v52 = vrot.slane %v2128_v43, 4  ;;  %v2072_v53 = vrot.slane %v3916_v38, 5  ;;  %v2075_v55 = vrot.slane %v3917_v39, 5  ;;  %v2707_v56 = vshrl.u32 %v4064_v44, 16  ;;  %v4311_v38 = vld [vmem:[%s4432_s19 + $0x84] sm:$0xff]  }
  0x44   : > { %1904 = vrot.lane.b32.xlu0 %v3897_v46, %s4383_s23  ;;  %v2710_v57 = vshll.u32 %v4064_v44, 16  ;;  %v2716_v58 = vshll.u32 %v4065_v45, 16  ;;  %2239 = vrot.lane.b32.xlu1 %v3984_v42, %s4384_s24  ;;  %v2720_v63 = vshrl.u32 %v4065_v45, 16  ;;  %v2726_v9 = vshll.u32 %v4066_v54, 16  ;;  %v4044_v43 = vld [vmem:[%s4432_s19 + $0x28] sm:$0xf] }
  0x45   : > { %v2132_v60 = vsel %vm4434_vm2, %v2130_v52, %v2131_v48  ;;  %v2073_v61 = vsel %vm4434_vm2, %v3961_v49, %v2072_v53  ;;  %v2074_v62 = vrot.slane %v2072_v53, 4  ;;  %v2709_v3 = vrot.slane %v2707_v56, 4  ;;  %v4045_v48 = vld [vmem:[%s4432_s19 + $0x2c] sm:$0x1]  ;;  %v4128_v53 = vld [vmem:[%s4432_s19 + $0x78] sm:$0xe] }
  0x46   : > { %v3985_v2 = vcombine.low %v2129_v51, %v2132_v60  ;;  %v2712_v4 = vrot.slane %v2710_v57, 5  ;;  %v2718_v6 = vrot.slane %v2716_v58, 5  ;;  %v2722_v8 = vrot.slane %v2720_v63, 4  ;;  %v4312_v54 = vld [vmem:[%s4432_s19 + $0x24] sm:$0xff]  }
  0x47   : > { %v2076_v7 = vsel %vm4434_vm2, %v2074_v62, %v2075_v55  ;;  %v2515_v11 = vshrl.u32 %v4040_v59, 16  ;;  %v2518_v14 = vshll.u32 %v4040_v59, 16  ;;  %v2524_v15 = vshll.u32 %v4041_v1, 16  ;;  %v4129_v59 = vld [vmem:[%s4432_s19 + $0x7c] sm:$0xf] }
  0x48   : > { %2223 = vrot.lane.b32.xlu0 %v3976_v50, %s4384_s24  ;;  %v3977_v12 = vcombine.low %v2073_v61, %v2076_v7  ;;  %v2713_v13 = vor.u32 %v2712_v4, %v2709_v3  ;;  %2241 = vrot.lane.b32.xlu1 %v3985_v2, %s4384_s24  ;;  %v2723_v18 = vor.u32 %v2722_v8, %v2718_v6  ;;  %v2728_v19 = vrot.slane %v2726_v9, 5  ;;  %v4104_v7 = vld [vmem:[%s4432_s19 + $0x18] sm:$0xe]  ;;  %v4105_v8 = vld [vmem:[%s4432_s19 + $0x1c] sm:$0xf] }
  0x49   : > { %v2517_v20 = vrot.slane %v2515_v11, 4  ;;  %v2528_v21 = vshrl.u32 %v4041_v1, 16  ;;  %v2520_v24 = vrot.slane %v2518_v14, 5  ;;  %v2526_v25 = vrot.slane %v2524_v15, 5  ;;  %v4130_v1 = vld [vmem:[%s4432_s19 + $0x80] sm:$0x1] }
  0x4a   : > { %v2714_v23 = vrot.slane %v2713_v13, 4  ;;  %v2534_v26 = vshll.u32 %v4042_v10, 16  ;;  %v2724_v28 = vrot.slane %v2723_v18, 4  ;;  %v2731_v30 = vshrl.u32 %v4067_v16, 16 }
  0x4b   : > { %v2530_v29 = vrot.slane %v2528_v21, 4  ;;  %v2734_v31 = vshll.u32 %v4067_v16, 16  ;;  %v2521_v33 = vor.u32 %v2520_v24, %v2517_v20  ;;  %v2740_v36 = vshll.u32 %v4068_v22, 16 }
  0x4c   : > { %2225 = vrot.lane.b32.xlu0 %v3977_v12, %s4384_s24  ;;  %v2719_v32 = vsel %vm4484_vm5, %v2714_v23, %v2718_v6  ;;  %v2536_v34 = vrot.slane %v2534_v26, 5  ;;  %2417 = vrot.lane.b32.xlu1 %v4309_v17, %s4385_s25  ;;  %v2729_v39 = vsel %vm4484_vm5, %v2724_v28, %v2728_v19  ;;  %v2733_v41 = vrot.slane %v2731_v30, 4  ;;  %v4106_v17 = vld [vmem:[%s4432_s19 + $0x20] sm:$0x1] }
  0x4d   : > { %v2531_v40 = vor.u32 %v2530_v29, %v2526_v25  ;;  %v2736_v42 = vrot.slane %v2734_v31, 5  ;;  %v4096_v44 = vcombine.low %v2719_v32, %v2729_v39  ;;  %v2522_v45 = vrot.slane %v2521_v33, 4  ;;  %v404_v32 = vld [vmem:[%s4432_s19 + $0x80] sm:$0x1] }
  0x4e   : > { %v2742_v46 = vrot.slane %v2740_v36, 5  ;;  %v2744_v47 = vshrl.u32 %v4068_v22, 16  ;;  %v2750_v51 = vshll.u32 %v4069_v35, 16  ;;  %v2539_v52 = vshrl.u32 %v4043_v37, 16  ;;  %v402_v22 = vld [vmem:[%s4432_s19 + $0x78] sm:$0xf] }
  0x4f   : > { %v2532_v49 = vrot.slane %v2531_v40, 4  ;;  %v2737_v50 = vor.u32 %v2736_v42, %v2733_v41  ;;  %v2527_v55 = vsel %vm4484_vm5, %v2522_v45, %v2526_v25  ;;  %v2542_v57 = vshll.u32 %v4043_v37, 16  ;;  %v378_v37 = vld [vmem:[%s4432_s19 + $0x18] sm:$0xf] }
  0x50   : > { %2401 = vrot.lane.b32.xlu0 %v4310_v27, %s4385_s25  ;;  %v2746_v56 = vrot.slane %v2744_v47, 4  ;;  %v2548_v58 = vshll.u32 %v4044_v43, 16  ;;  %2419 = vrot.lane.b32.xlu1 %v4311_v38, %s4385_s25  ;;  %v2752_v62 = vrot.slane %v2750_v51, 5  ;;  %v2541_v63 = vrot.slane %v2539_v52, 4  ;;  %v403_v27 = vld [vmem:[%s4432_s19 + $0x7c] sm:$0xf] }
  0x51   : > { %v2537_v60 = vsel %vm4484_vm5, %v2532_v49, %v2536_v34  ;;  %v2738_v61 = vrot.slane %v2737_v50, 4  ;;  %v2544_v4 = vrot.slane %v2542_v57, 5  ;;  %v2552_v10 = vshrl.u32 %v4044_v43, 16  ;;  %v379_v38 = vld [vmem:[%s4432_s19 + $0x1c] sm:$0xf] }
  0x52   : > { %v4088_v2 = vcombine.low %v2527_v55, %v2537_v60  ;;  %v2747_v3 = vor.u32 %v2746_v56, %v2742_v46  ;;  %v2550_v6 = vrot.slane %v2548_v58, 5  ;;  %v2558_v11 = vshll.u32 %v4045_v48, 16  ;;  %v380_v43 = vld [vmem:[%s4432_s19 + $0x20] sm:$0x1]  ;;  %v4131_v48 = vld [vmem:[%s4432_s19 + $0x84] sm:$0xe] }
  0x53   : > { %v2743_v9 = vsel %vm4484_vm5, %v2738_v61, %v2742_v46  ;;  %v4160_v12 = vrot.slane %v4128_v53, 9  ;;  %v2545_v14 = vor.u32 %v2544_v4, %v2541_v63  ;;  %v3165_v15 = vrot.slane %v4129_v59, 5  ;;  %v4132_v53 = vld [vmem:[%s4432_s19 + $0x88] sm:$0xf]  ;;  %v4107_v59 = vld [vmem:[%s4432_s19 + $0x24] sm:$0xe] }
  0x54   : > { %2403 = vrot.lane.b32.xlu0 %v4312_v54, %s4385_s25  ;;  %v2748_v13 = vrot.slane %v2747_v3, 4  ;;  %v3168_v16 = vrot.slane %v4130_v1, 5  ;;  %2962 = vrot.lane.b32.xlu1 %v4096_v44, %s4386_s26  ;;  %v2554_v18 = vrot.slane %v2552_v10, 4  ;;  %v2560_v19 = vrot.slane %v2558_v11, 5  ;;  %v4133_v54 = vld [vmem:[%s4432_s19 + $0x8c] sm:$0x1] }
  0x55   : > { %v4152_v20 = vrot.slane %v4104_v7, 9  ;;  %v3109_v21 = vrot.slane %v4105_v8, 5  ;;  %v2546_v24 = vrot.slane %v2545_v14, 4  ;;  %v3166_v25 = vsel %vm4434_vm2, %v4160_v12, %v3165_v15  ;;  %v4108_v1 = vld [vmem:[%s4432_s19 + $0x28] sm:$0xf] }
  0x56   : > { %v2753_v23 = vsel %vm4484_vm5, %v2748_v13, %v2752_v62  ;;  %v3167_v26 = vrot.slane %v3165_v15, 4  ;;  %v2555_v29 = vor.u32 %v2554_v18, %v2550_v6  ;;  %v3112_v35 = vrot.slane %v4106_v17, 5  ;;  %v4109_v7 = vld [vmem:[%s4432_s19 + $0x2c] sm:$0x1]  ;;  %v405_v12 = vld [vmem:[%s4432_s19 + $0x84] sm:$0xf] }
  0x57   : > { %v4097_v28 = vcombine.low %v2743_v9, %v2753_v23  ;;  %v3110_v30 = vsel %vm4434_vm2, %v4152_v20, %v3109_v21  ;;  %v3111_v31 = vrot.slane %v3109_v21, 4  ;;  %v2551_v33 = vsel %vm4484_vm5, %v2546_v24, %v2550_v6  ;;  %v406_v21 = vld [vmem:[%s4432_s19 + $0x88] sm:$0xf] }
  0x58   : > { %2946 = vrot.lane.b32.xlu0 %v4088_v2, %s4386_s26  ;;  %v3169_v34 = vsel %vm4434_vm2, %v3167_v26, %v3168_v16  ;;  %v664_v36 = vshrl.u32 %v402_v22, 16  ;;  %v2556_v39 = vrot.slane %v2555_v29, 4  ;;  %v667_v41 = vshll.u32 %v402_v22, 16 }
  0x59   : > { %2964 = vrot.lane.b32.xlu1 %v4097_v28, %s4386_s26  ;;  %v4176_v40 = vcombine.low %v3166_v25, %v3169_v34  ;;  %v673_v42 = vshll.u32 %v403_v27, 16  ;;  %v3113_v44 = vsel %vm4434_vm2, %v3111_v31, %v3112_v35  ;;  %v677_v46 = vshrl.u32 %v403_v27, 16 }
  0x5a   : > { %v666_v45 = vrot.slane %v664_v36, 4  ;;  %v683_v47 = vshll.u32 %v404_v32, 16  ;;  %v2561_v49 = vsel %vm4484_vm5, %v2556_v39, %v2560_v19  ;;  %v4168_v50 = vcombine.low %v3110_v30, %v3113_v44  ;;  %v381_v39 = vld [vmem:[%s4432_s19 + $0x24] sm:$0xf] }
  0x5b   : > { %v669_v51 = vrot.slane %v667_v41, 5  ;;  %v675_v52 = vrot.slane %v673_v42, 5  ;;  %v4089_v55 = vcombine.low %v2551_v33, %v2561_v49  ;;  %v679_v56 = vrot.slane %v677_v46, 4  ;;  %v407_v33 = vld [vmem:[%s4432_s19 + $0x8c] sm:$0x1] }
  0x5c   : > { %v685_v57 = vrot.slane %v683_v47, 5  ;;  %v472_v58 = vshrl.u32 %v378_v37, 16  ;;  %v475_v61 = vshll.u32 %v378_v37, 16  ;;  %v481_v62 = vshll.u32 %v379_v38, 16  ;;  %v950_v46 = vld [vmem:[%s4432_s19 + $0x78] sm:$0xe] }
  0x5d   : > { %3283 = vrot.lane.b32.xlu1 %v4176_v40, %s4387_s27  ;;  %v670_v60 = vor.u32 %v669_v51, %v666_v45  ;;  %v485_v63 = vshrl.u32 %v379_v38, 16  ;;  %2948 = vrot.lane.b32.xlu0 %v4089_v55, %s4386_s26  ;;  %v680_v2 = vor.u32 %v679_v56, %v675_v52  ;;  %v491_v4 = vshll.u32 %v380_v43, 16  ;;  %v382_v40 = vld [vmem:[%s4432_s19 + $0x28] sm:$0xf]  ;;  %v383_v45 = vld [vmem:[%s4432_s19 + $0x2c] sm:$0x1] }
  0x5e   : > { %v474_v3 = vrot.slane %v472_v58, 4  ;;  %v4161_v6 = vrot.slane %v4131_v48, 9  ;;  %v477_v9 = vrot.slane %v475_v61, 5  ;;  %v483_v10 = vrot.slane %v481_v62, 5  ;;  %v951_v51 = vld [vmem:[%s4432_s19 + $0x7c] sm:$0xf] }
  0x5f   : > { %v671_v8 = vrot.slane %v670_v60, 4  ;;  %v487_v11 = vrot.slane %v485_v63, 4  ;;  %v681_v13 = vrot.slane %v680_v2, 4  ;;  %v493_v14 = vrot.slane %v491_v4, 5  ;;  %v952_v56 = vld [vmem:[%s4432_s19 + $0x80] sm:$0x1] }
  0x60   : > { %v3172_v15 = vrot.slane %v4132_v53, 5  ;;  %v3175_v16 = vrot.slane %v4133_v54, 5  ;;  %v478_v18 = vor.u32 %v477_v9, %v474_v3  ;;  %v4153_v20 = vrot.slane %v4107_v59, 9  ;;  %v926_v61 = vld [vmem:[%s4432_s19 + $0x18] sm:$0xe] }
  0x61   : > { %v676_v17 = vsel %vm4484_vm5, %v671_v8, %v675_v52  ;;  %v488_v19 = vor.u32 %v487_v11, %v483_v10  ;;  %3267 = vrot.lane.b32.xlu0 %v4168_v50, %s4387_s27  ;;  %v686_v22 = vsel %vm4484_vm5, %v681_v13, %v685_v57  ;;  %v3116_v25 = vrot.slane %v4108_v1, 5  ;;  %v927_v3 = vld [vmem:[%s4432_s19 + $0x1c] sm:$0xf]  ;;  %v928_v9 = vld [vmem:[%s4432_s19 + $0x20] sm:$0x1] }
  0x62   : > { %v3173_v23 = vsel %vm4434_vm2, %v4161_v6, %v3172_v15  ;;  %v3174_v24 = vrot.slane %v3172_v15, 4  ;;  %v3762_v26 = vcombine.low %v676_v17, %v686_v22  ;;  %v479_v27 = vrot.slane %v478_v18, 4  ;;  %v4335_v15 = vld [vmem:[%s5616_s1] sm:$0xff]  }
  0x63   : > { %v489_v28 = vrot.slane %v488_v19, 4  ;;  %v3119_v29 = vrot.slane %v4109_v7, 5  ;;  %v3117_v31 = vsel %vm4434_vm2, %v4153_v20, %v3116_v25  ;;  %v3118_v32 = vrot.slane %v3116_v25, 4  ;;  %v954_v20 = vld [vmem:[%s4432_s19 + $0x88] sm:$0xf]  ;;  %4226 = vmatprep.subr.bf16.mxu0 %v4335_v15  ;;  %4264 = vmatprep.subr.bf16.mxu1 %v4335_v15 }
  0x64   : > { %v3176_v30 = vsel %vm4434_vm2, %v3174_v24, %v3175_v16  ;;  %v688_v34 = vshrl.u32 %v405_v12, 16  ;;  %875 = vrot.lane.b32.xlu1 %v3762_v26, %s4382_s22  ;;  %v484_v35 = vsel %vm4484_vm5, %v479_v27, %v483_v10  ;;  %v691_v38 = vshll.u32 %v405_v12, 16  ;;  %v929_v26 = vld [vmem:[%s4432_s19 + $0x24] sm:$0xe]  ;;  %v4336_v27 = vld [vmem:[%s5616_s1 + $0x8] sm:$0xff]   ;;  %4227 = vmatpush3.bf16.msra.mxu0 %v4335_v15 }
  0x65   : > { %v494_v36 = vsel %vm4484_vm5, %v489_v28, %v493_v14  ;;  %v4177_v37 = vcombine.low %v3173_v23, %v3176_v30  ;;  %v3120_v42 = vsel %vm4434_vm2, %v3118_v32, %v3119_v29  ;;  %v697_v44 = vshll.u32 %v406_v21, 16  ;;  %v953_v14 = vld [vmem:[%s4432_s19 + $0x84] sm:$0xe]  ;;  %v930_v32 = vld [vmem:[%s4432_s19 + $0x28] sm:$0xf]  ;;  %4267 = vmatpush3.bf16.msra.mxu1 %v4335_v15  ;;  %4228 = vmatprep.subr.bf16.mxu0 %v4336_v27 }
  0x66   : > { %v3754_v41 = vcombine.low %v484_v35, %v494_v36  ;;  %v690_v43 = vrot.slane %v688_v34, 4  ;;  %v4169_v47 = vcombine.low %v3117_v31, %v3120_v42  ;;  %v693_v48 = vrot.slane %v691_v38, 5  ;;  %v3878_v42 = vld [vmem:[%s4432_s19 + $0x84] sm:$0xf]  ;;  %4265 = vmatprep.subr.bf16.mxu1 %v4336_v27 }
  0x67   : > { %v701_v49 = vshrl.u32 %v406_v21, 16  ;;  %v707_v50 = vshll.u32 %v407_v33, 16  ;;  %v699_v52 = vrot.slane %v697_v44, 5  ;;  %v496_v53 = vshrl.u32 %v381_v39, 16  ;;  %v955_v21 = vld [vmem:[%s4432_s19 + $0x8c] sm:$0x1] }
  0x68   : > { %859 = vrot.lane.b32.xlu0 %v3754_v41, %s4382_s22  ;;  %v499_v54 = vshll.u32 %v381_v39, 16  ;;  %v505_v55 = vshll.u32 %v382_v40, 16  ;;  %3285 = vrot.lane.b32.xlu1 %v4177_v37, %s4387_s27  ;;  %v694_v57 = vor.u32 %v693_v48, %v690_v43  ;;  %v509_v60 = vshrl.u32 %v382_v40, 16  ;;  %v931_v37 = vld [vmem:[%s4432_s19 + $0x2c] sm:$0x1] }
  0x69   : > { %v703_v58 = vrot.slane %v701_v49, 4  ;;  %v709_v59 = vrot.slane %v707_v50, 5  ;;  %v498_v62 = vrot.slane %v496_v53, 4  ;;  %v515_v2 = vshll.u32 %v383_v45, 16  ;;  %v3879_v43 = vld [vmem:[%s4432_s19 + $0x88] sm:$0xf]  ;;  %4229 = vmatpush3.bf16.msra.mxu0 %v4336_v27  ;;  %4268 = vmatpush3.bf16.msra.mxu1 %v4336_v27 }
  0x6a   : > { %v501_v63 = vrot.slane %v499_v54, 5  ;;  %v507_v1 = vrot.slane %v505_v55, 5  ;;  %v695_v4 = vrot.slane %v694_v57, 4  ;;  %v511_v7 = vrot.slane %v509_v60, 4  ;;  %v3880_v48 = vld [vmem:[%s4432_s19 + $0x8c] sm:$0x1] }
  0x6b   : > { %v704_v6 = vor.u32 %v703_v58, %v699_v52  ;;  %v3778_v8 = vrot.slane %v950_v46, 9  ;;  %v517_v11 = vrot.slane %v515_v2, 5  ;;  %v1091_v12 = vrot.slane %v951_v51, 5  ;;  %v3854_v53 = vld [vmem:[%s4432_s19 + $0x24] sm:$0xf] }
  0x6c   : > { %3269 = vrot.lane.b32.xlu0 %v4169_v47, %s4387_s27  ;;  %v502_v10 = vor.u32 %v501_v63, %v498_v62  ;;  %v1094_v13 = vrot.slane %v952_v56, 5  ;;  %v700_v16 = vsel %vm4484_vm5, %v695_v4, %v699_v52  ;;  %v512_v18 = vor.u32 %v511_v7, %v507_v1  ;;  %v3855_v54 = vld [vmem:[%s4432_s19 + $0x28] sm:$0xf] }
  0x6d   : > { %v705_v17 = vrot.slane %v704_v6, 4  ;;  %v3770_v19 = vrot.slane %v926_v61, 9  ;;  %v1092_v23 = vsel %vm4434_vm2, %v3778_v8, %v1091_v12  ;;  %v1093_v24 = vrot.slane %v1091_v12, 4 }
  0x6e   : > { %v503_v22 = vrot.slane %v502_v10, 4  ;;  %v1035_v25 = vrot.slane %v927_v3, 5  ;;  %v513_v29 = vrot.slane %v512_v18, 4  ;;  %v1038_v30 = vrot.slane %v928_v9, 5 }
  0x6f   : > { %v710_v28 = vsel %vm4484_vm5, %v705_v17, %v709_v59  ;;  %v3779_v31 = vrot.slane %v953_v14, 9  ;;  %v1095_v35 = vsel %vm4434_vm2, %v1093_v24, %v1094_v13  ;;  %v1098_v41 = vrot.slane %v954_v20, 5  ;;  %v3856_v59 = vld [vmem:[%s4432_s19 + $0x2c] sm:$0x1]  ;;  %v4313_v20 = vld [vmem:[%s4432_s19 + $0x84] sm:$0xff]  }
  0x70   : > { %v3763_v33 = vcombine.low %v700_v16, %v710_v28  ;;  %v508_v34 = vsel %vm4484_vm5, %v503_v22, %v507_v1  ;;  %v1036_v36 = vsel %vm4434_vm2, %v3770_v19, %v1035_v25  ;;  %v518_v38 = vsel %vm4484_vm5, %v513_v29, %v517_v11  ;;  %v3881_v1 = vld [vmem:[%s4432_s19 + $0x90] sm:$0xf]  ;;  %v3882_v19 = vld [vmem:[%s4432_s19 + $0x94] sm:$0xf]  ;;  %v3883_v29 = vld [vmem:[%s4432_s19 + $0x98] sm:$0x1] }
  0x71   : > { %v3794_v39 = vcombine.low %v1092_v23, %v1095_v35  ;;  %v1037_v40 = vrot.slane %v1035_v25, 4  ;;  %v3755_v44 = vcombine.low %v508_v34, %v518_v38  ;;  %v1101_v45 = vrot.slane %v955_v21, 5  ;;  %v3857_v35 = vld [vmem:[%s4432_s19 + $0x30] sm:$0xf] }
  0x72   : > { %877 = vrot.lane.b32.xlu1 %v3763_v33, %s4382_s22  ;;  %v3771_v46 = vrot.slane %v929_v26, 9  ;;  %v1042_v47 = vrot.slane %v930_v32, 5  ;;  %v1099_v50 = vsel %vm4434_vm2, %v3779_v31, %v1098_v41  ;;  %v1100_v51 = vrot.slane %v1098_v41, 4  ;;  %v4315_v41 = vld [vmem:[%s4432_s19 + $0x90] sm:$0xff]  }
  0x73   : > { %v1039_v49 = vsel %vm4434_vm2, %v1037_v40, %v1038_v30  ;;  %v1045_v52 = vrot.slane %v931_v37, 5  ;;  %861 = vrot.lane.b32.xlu0 %v3755_v44, %s4382_s22  ;;  %v1711_v58 = vshrl.u32 %v3878_v42, 16  ;;  %v1714_v61 = vshll.u32 %v3878_v42, 16  ;;  %v4314_v30 = vld [vmem:[%s4432_s19 + $0x24] sm:$0xff]   ;;  %v3858_v40 = vld [vmem:[%s4432_s19 + $0x34] sm:$0xf] }
  0x74   : > { %v3786_v55 = vcombine.low %v1036_v36, %v1039_v49  ;;  %v1043_v56 = vsel %vm4434_vm2, %v3771_v46, %v1042_v47  ;;  %v1044_v57 = vrot.slane %v1042_v47, 4  ;;  %v1102_v60 = vsel %vm4434_vm2, %v1100_v51, %v1101_v45  ;;  %v4316_v42 = vld [vmem:[%s4432_s19 + $0x30] sm:$0xff]  }
  0x75   : > { %v1720_v62 = vshll.u32 %v3879_v43, 16  ;;  %v1724_v63 = vshrl.u32 %v3879_v43, 16  ;;  %v3795_v2 = vcombine.low %v1099_v50, %v1102_v60  ;;  %v1713_v4 = vrot.slane %v1711_v58, 4  ;;  %v3859_v50 = vld [vmem:[%s4432_s19 + $0x38] sm:$0x1] }
  0x76   : > { %1199 = vrot.lane.b32.xlu1 %v3794_v39, %s4381_s21  ;;  %v1046_v3 = vsel %vm4434_vm2, %v1044_v57, %v1045_v52  ;;  %v1730_v6 = vshll.u32 %v3880_v48, 16  ;;  %v1716_v8 = vrot.slane %v1714_v61, 5  ;;  %v1519_v12 = vshrl.u32 %v3854_v53, 16  ;;  %v3943_v57 = vld [vmem:[%s4432_s19 + $0x88] sm:$0xf] }
  0x77   : > { %v3787_v7 = vcombine.low %v1043_v56, %v1046_v3  ;;  %v1722_v9 = vrot.slane %v1720_v62, 5  ;;  %v1726_v10 = vrot.slane %v1724_v63, 4  ;;  %1183 = vrot.lane.b32.xlu0 %v3786_v55, %s4381_s21  ;;  %v1522_v13 = vshll.u32 %v3854_v53, 16  ;;  %v3942_v56 = vld [vmem:[%s4432_s19 + $0x84] sm:$0xe] }
  0x78   : > { %v1732_v11 = vrot.slane %v1730_v6, 5  ;;  %v1528_v14 = vshll.u32 %v3855_v54, 16  ;;  %v1717_v15 = vor.u32 %v1716_v8, %v1713_v4  ;;  %v1532_v17 = vshrl.u32 %v3855_v54, 16  ;;  %v3944_v62 = vld [vmem:[%s4432_s19 + $0x8c] sm:$0x1] }
  0x79   : > { %v1727_v16 = vor.u32 %v1726_v10, %v1722_v9  ;;  %v1538_v18 = vshll.u32 %v3856_v59, 16  ;;  %v1521_v21 = vrot.slane %v1519_v12, 4  ;;  %v1524_v22 = vrot.slane %v1522_v13, 5  ;;  %v3918_v63 = vld [vmem:[%s4432_s19 + $0x24] sm:$0xe] }
  0x7a   : > { %1201 = vrot.lane.b32.xlu1 %v3795_v2, %s4381_s21  ;;  %v1530_v23 = vrot.slane %v1528_v14, 5  ;;  %v1735_v24 = vshrl.u32 %v3881_v1, 16  ;;  %v1718_v25 = vrot.slane %v1717_v15, 4  ;;  %v1534_v27 = vrot.slane %v1532_v17, 4  ;;  %v3919_v6 = vld [vmem:[%s4432_s19 + $0x28] sm:$0xf] }
  0x7b   : > { %v1728_v26 = vrot.slane %v1727_v16, 4  ;;  %v1540_v28 = vrot.slane %v1538_v18, 5  ;;  %1185 = vrot.lane.b32.xlu0 %v3787_v7, %s4381_s21  ;;  %v1525_v31 = vor.u32 %v1524_v22, %v1521_v21  ;;  %v1738_v33 = vshll.u32 %v3881_v1, 16  ;;  %v3945_v16 = vld [vmem:[%s4432_s19 + $0x90] sm:$0xe] }
  0x7c   : > { %v1737_v32 = vrot.slane %v1735_v24, 4  ;;  %v1744_v34 = vshll.u32 %v3882_v19, 16  ;;  %v1723_v36 = vsel %vm4484_vm5, %v1718_v25, %v1722_v9  ;;  %v1535_v38 = vor.u32 %v1534_v27, %v1530_v23  ;;  %v3946_v17 = vld [vmem:[%s4432_s19 + $0x94] sm:$0xf]  ;;  %v3947_v22 = vld [vmem:[%s4432_s19 + $0x98] sm:$0x1] }
  0x7d   : > { %v1733_v37 = vsel %vm4484_vm5, %v1728_v26, %v1732_v11  ;;  %v1748_v39 = vshrl.u32 %v3882_v19, 16  ;;  %v1526_v44 = vrot.slane %v1525_v31, 4  ;;  %v1740_v45 = vrot.slane %v1738_v33, 5  ;;  %v3920_v11 = vld [vmem:[%s4432_s19 + $0x2c] sm:$0x1] }
  0x7e   : > { %1377 = vrot.lane.b32.xlu1 %v4313_v20, %s4380_s20  ;;  %v3906_v43 = vcombine.low %v1723_v36, %v1733_v37  ;;  %v1746_v46 = vrot.slane %v1744_v34, 5  ;;  %v1536_v47 = vrot.slane %v1535_v38, 4  ;;  %v1754_v49 = vshll.u32 %v3883_v29, 16  ;;  %v3921_v27 = vld [vmem:[%s4432_s19 + $0x30] sm:$0xe] }
  0x7f   : > { %v1750_v48 = vrot.slane %v1748_v39, 4  ;;  %v1543_v51 = vshrl.u32 %v3857_v35, 16  ;;  %1361 = vrot.lane.b32.xlu0 %v4314_v30, %s4380_s20  ;;  %v1531_v52 = vsel %vm4484_vm5, %v1526_v44, %v1530_v23  ;;  %v1741_v53 = vor.u32 %v1740_v45, %v1737_v32  ;;  %v3922_v32 = vld [vmem:[%s4432_s19 + $0x34] sm:$0xf]  ;;  %v3923_v37 = vld [vmem:[%s4432_s19 + $0x38] sm:$0x1] }
  0x80   : > { %v1546_v54 = vshll.u32 %v3857_v35, 16  ;;  %v1552_v55 = vshll.u32 %v3858_v40, 16  ;;  %v1541_v58 = vsel %vm4484_vm5, %v1536_v47, %v1540_v28  ;;  %v1756_v60 = vrot.slane %v1754_v49, 5  ;;  %v4070_v38 = vld [vmem:[%s4432_s19 + $0x90] sm:$0xf] }
  0x81   : > { %v1751_v59 = vor.u32 %v1750_v48, %v1746_v46  ;;  %v1545_v61 = vrot.slane %v1543_v51, 4  ;;  %v3898_v1 = vcombine.low %v1531_v52, %v1541_v58  ;;  %v1742_v2 = vrot.slane %v1741_v53, 4  ;;  %v4072_v44 = vld [vmem:[%s4432_s19 + $0x98] sm:$0x1]  ;;  %v4046_v45 = vld [vmem:[%s4432_s19 + $0x30] sm:$0xf] }
  0x82   : > { %1379 = vrot.lane.b32.xlu1 %v4315_v41, %s4380_s20  ;;  %v1548_v3 = vrot.slane %v1546_v54, 5  ;;  %v1554_v4 = vrot.slane %v1552_v55, 5  ;;  %v1556_v8 = vshrl.u32 %v3858_v40, 16  ;;  %v1562_v9 = vshll.u32 %v3859_v50, 16 }
  0x83   : > { %v1752_v7 = vrot.slane %v1751_v59, 4  ;;  %v3970_v10 = vrot.slane %v3942_v56, 9  ;;  %1363 = vrot.lane.b32.xlu0 %v4316_v42, %s4380_s20  ;;  %v1747_v12 = vsel %vm4484_vm5, %v1742_v2, %v1746_v46  ;;  %v2135_v14 = vrot.slane %v3943_v57, 5  ;;  %v4047_v59 = vld [vmem:[%s4432_s19 + $0x34] sm:$0xf] }
  0x84   : > { %v1549_v13 = vor.u32 %v1548_v3, %v1545_v61  ;;  %v2138_v15 = vrot.slane %v3944_v62, 5  ;;  %v1558_v19 = vrot.slane %v1556_v8, 4  ;;  %v1564_v20 = vrot.slane %v1562_v9, 5 }
  0x85   : > { %v1757_v18 = vsel %vm4484_vm5, %v1752_v7, %v1756_v60  ;;  %v3962_v21 = vrot.slane %v3918_v63, 9  ;;  %v2136_v25 = vsel %vm4434_vm2, %v3970_v10, %v2135_v14  ;;  %v2137_v26 = vrot.slane %v2135_v14, 4  ;;  %v4780_v46 = vpop.permute.xlu1 %1373 }
  0x86   : > { %1922 = vrot.lane.b32.xlu1 %v3906_v43, %s4383_s23  ;;  %v3907_v23 = vcombine.low %v1747_v12, %v1757_v18  ;;  %v1550_v24 = vrot.slane %v1549_v13, 4  ;;  %v1559_v28 = vor.u32 %v1558_v19, %v1554_v4  ;;  %v2079_v29 = vrot.slane %v3919_v6, 5  ;;  %v4071_v43 = vld [vmem:[%s4432_s19 + $0x94] sm:$0xf]  ;;  %v4073_v12 = vld [vmem:[%s4432_s19 + $0x9c] sm:$0xf] }
  0x87   : > { %v2082_v30 = vrot.slane %v3920_v11, 5  ;;  %v3971_v31 = vrot.slane %v3945_v16, 9  ;;  %1906 = vrot.lane.b32.xlu0 %v3898_v1, %s4383_s23  ;;  %v2139_v34 = vsel %vm4434_vm2, %v2137_v26, %v2138_v15  ;;  %v2142_v35 = vrot.slane %v3946_v17, 5  ;;  %v4799_v11 = vpop.permute.xlu0 %1357  ;;  %v4074_v18 = vld [vmem:[%s4432_s19 + $0xa0] sm:$0xf] }
  0x88   : > { %v1555_v33 = vsel %vm4484_vm5, %v1550_v24, %v1554_v4  ;;  %v2145_v36 = vrot.slane %v3947_v22, 5  ;;  %v1560_v39 = vrot.slane %v1559_v28, 4  ;;  %v3986_v40 = vcombine.low %v2136_v25, %v2139_v34  ;;  %v4048_v4 = vld [vmem:[%s4432_s19 + $0x38] sm:$0x1]  ;;  %v4317_v24 = vld [vmem:[%s4432_s19 + $0x90] sm:$0xff]  }
  0x89   : > { %v2080_v41 = vsel %vm4434_vm2, %v3962_v21, %v2079_v29  ;;  %v2081_v42 = vrot.slane %v2079_v29, 4  ;;  %v2143_v47 = vsel %vm4434_vm2, %v3971_v31, %v2142_v35  ;;  %v2144_v48 = vrot.slane %v2142_v35, 4  ;;  %v4049_v29 = vld [vmem:[%s4432_s19 + $0x3c] sm:$0xf] }
  0x8a   : > { %1924 = vrot.lane.b32.xlu1 %v3907_v23, %s4383_s23  ;;  %v3963_v49 = vrot.slane %v3921_v27, 9  ;;  %v2086_v50 = vrot.slane %v3922_v32, 5  ;;  %v1565_v51 = vsel %vm4484_vm5, %v1560_v39, %v1564_v20  ;;  %v2089_v53 = vrot.slane %v3923_v37, 5  ;;  %v4075_v23 = vld [vmem:[%s4432_s19 + $0xa4] sm:$0x1] }
  0x8b   : > { %v2083_v52 = vsel %vm4434_vm2, %v2081_v42, %v2082_v30  ;;  %v2755_v54 = vshrl.u32 %v4070_v38, 16  ;;  %v3899_v55 = vcombine.low %v1555_v33, %v1565_v51  ;;  %v2146_v57 = vsel %vm4434_vm2, %v2144_v48, %v2145_v36  ;;  %v4050_v51 = vld [vmem:[%s4432_s19 + $0x40] sm:$0xf] }
  0x8c   : > { %v3978_v56 = vcombine.low %v2080_v41, %v2083_v52  ;;  %v2087_v58 = vsel %vm4434_vm2, %v3963_v49, %v2086_v50  ;;  %v3987_v60 = vcombine.low %v2143_v47, %v2146_v57  ;;  %v2088_v61 = vrot.slane %v2086_v50, 4  ;;  %v4802_v13 = vpop.permute.xlu1 %1195  ;;  %v4320_v57 = vld [vmem:[%s4432_s19 + $0x3c] sm:$0xff]  }
  0x8d   : > { %v2757_v62 = vrot.slane %v2755_v54, 4  ;;  %v2758_v63 = vshll.u32 %v4070_v38, 16  ;;  %1908 = vrot.lane.b32.xlu0 %v3899_v55, %s4383_s23  ;;  %v2764_v1 = vshll.u32 %v4071_v43, 16  ;;  %v2768_v2 = vshrl.u32 %v4071_v43, 16  ;;  %v4318_v38 = vld [vmem:[%s4432_s19 + $0x30] sm:$0xff]  }
  0x8e   : > { %2243 = vrot.lane.b32.xlu1 %v3986_v40, %s4384_s24  ;;  %v2774_v3 = vshll.u32 %v4072_v44, 16  ;;  %v2563_v6 = vshrl.u32 %v4046_v45, 16  ;;  %v2090_v7 = vsel %vm4434_vm2, %v2088_v61, %v2089_v53  ;;  %v2566_v9 = vshll.u32 %v4046_v45, 16  ;;  %v4813_v43 = vpop.permute.xlu0 %1179  ;;  %v4319_v45 = vld [vmem:[%s4432_s19 + $0x9c] sm:$0xff]   ;;  %v4051_v55 = vld [vmem:[%s4432_s19 + $0x44] sm:$0x1] }
  0x8f   : > { %v2760_v8 = vrot.slane %v2758_v63, 5  ;;  %v2572_v10 = vshll.u32 %v4047_v59, 16  ;;  %v3979_v14 = vcombine.low %v2087_v58, %v2090_v7  ;;  %v2766_v15 = vrot.slane %v2764_v1, 5 }
  0x90   : > { %v2770_v16 = vrot.slane %v2768_v2, 4  ;;  %v2776_v17 = vrot.slane %v2774_v3, 5  ;;  %v2565_v20 = vrot.slane %v2563_v6, 4  ;;  %v2568_v21 = vrot.slane %v2566_v9, 5 }
  0x91   : > { %v2761_v19 = vor.u32 %v2760_v8, %v2757_v62  ;;  %v2574_v22 = vrot.slane %v2572_v10, 5  ;;  %2227 = vrot.lane.b32.xlu0 %v3978_v56, %s4384_s24  ;;  %v2576_v26 = vshrl.u32 %v4047_v59, 16  ;;  %v2582_v27 = vshll.u32 %v4048_v4, 16  ;;  %v4815_v44 = vpop.permute.xlu1 %1197  ;;  %v4134_v62 = vld [vmem:[%s4432_s19 + $0x90] sm:$0xe] }
  0x92   : > { %2245 = vrot.lane.b32.xlu1 %v3987_v60, %s4384_s24  ;;  %v2771_v25 = vor.u32 %v2770_v16, %v2766_v15  ;;  %v2779_v28 = vshrl.u32 %v4073_v12, 16  ;;  %v2569_v31 = vor.u32 %v2568_v21, %v2565_v20  ;;  %v2782_v32 = vshll.u32 %v4073_v12, 16  ;;  %v4135_v4 = vld [vmem:[%s4432_s19 + $0x94] sm:$0xf]  ;;  %v4136_v10 = vld [vmem:[%s4432_s19 + $0x98] sm:$0x1]  ;;  %v4839_v20 = vpop.permute.xlu0 %1181 }
  0x93   : > { %v2762_v30 = vrot.slane %v2761_v19, 4  ;;  %v2788_v33 = vshll.u32 %v4074_v18, 16  ;;  %v2578_v35 = vrot.slane %v2576_v26, 4  ;;  %v2584_v36 = vrot.slane %v2582_v27, 5  ;;  %v4110_v12 = vld [vmem:[%s4432_s19 + $0x30] sm:$0xe] }
  0x94   : > { %v2772_v34 = vrot.slane %v2771_v25, 4  ;;  %v2781_v37 = vrot.slane %v2779_v28, 4  ;;  %v2570_v40 = vrot.slane %v2569_v31, 4  ;;  %v2784_v41 = vrot.slane %v2782_v32, 5  ;;  %v4112_v19 = vld [vmem:[%s4432_s19 + $0x38] sm:$0x1] }
  0x95   : > { %v2767_v39 = vsel %vm4484_vm5, %v2762_v30, %v2766_v15  ;;  %v2790_v42 = vrot.slane %v2788_v33, 5  ;;  %2229 = vrot.lane.b32.xlu0 %v3979_v14, %s4384_s24  ;;  %v2579_v48 = vor.u32 %v2578_v35, %v2574_v22  ;;  %v2792_v49 = vshrl.u32 %v4074_v18, 16  ;;  %v4111_v18 = vld [vmem:[%s4432_s19 + $0x34] sm:$0xf]  ;;  %v408_v30 = vld [vmem:[%s4432_s19 + $0x90] sm:$0xf] }
  0x96   : > { %2421 = vrot.lane.b32.xlu1 %v4317_v24, %s4385_s25  ;;  %v2777_v47 = vsel %vm4484_vm5, %v2772_v34, %v2776_v17  ;;  %v2798_v50 = vshll.u32 %v4075_v23, 16  ;;  %v2575_v53 = vsel %vm4484_vm5, %v2570_v40, %v2574_v22  ;;  %v2785_v54 = vor.u32 %v2784_v41, %v2781_v37  ;;  %v409_v35 = vld [vmem:[%s4432_s19 + $0x94] sm:$0xf]  ;;  %v410_v40 = vld [vmem:[%s4432_s19 + $0x98] sm:$0x1] }
  0x97   : > { %v4098_v52 = vcombine.low %v2767_v39, %v2777_v47  ;;  %v2587_v56 = vshrl.u32 %v4049_v29, 16  ;;  %v2580_v58 = vrot.slane %v2579_v48, 4  ;;  %v2794_v59 = vrot.slane %v2792_v49, 4  ;;  %v384_v41 = vld [vmem:[%s4432_s19 + $0x30] sm:$0xf] }
  0x98   : > { %v2800_v60 = vrot.slane %v2798_v50, 5  ;;  %v2590_v61 = vshll.u32 %v4049_v29, 16  ;;  %v2786_v63 = vrot.slane %v2785_v54, 4  ;;  %v2596_v2 = vshll.u32 %v4050_v51, 16  ;;  %v385_v49 = vld [vmem:[%s4432_s19 + $0x34] sm:$0xf] }
  0x99   : > { %v2589_v1 = vrot.slane %v2587_v56, 4  ;;  %v2600_v3 = vshrl.u32 %v4050_v51, 16  ;;  %2405 = vrot.lane.b32.xlu0 %v4318_v38, %s4385_s25  ;;  %v2585_v6 = vsel %vm4484_vm5, %v2580_v58, %v2584_v36  ;;  %v2795_v7 = vor.u32 %v2794_v59, %v2790_v42  ;;  %v4841_v21 = vpop.permute.xlu1 %857  ;;  %v386_v50 = vld [vmem:[%s4432_s19 + $0x38] sm:$0x1] }
  0x9a   : > { %2423 = vrot.lane.b32.xlu1 %v4319_v45, %s4385_s25  ;;  %v2592_v8 = vrot.slane %v2590_v61, 5  ;;  %v2606_v9 = vshll.u32 %v4051_v55, 16  ;;  %v4090_v14 = vcombine.low %v2575_v53, %v2585_v6  ;;  %v2791_v15 = vsel %vm4484_vm5, %v2786_v63, %v2790_v42  ;;  %v4324_v6 = vld [vmem:[%s4432_s19 + $0x60] sm:$0xff]  }
  0x9b   : > { %v2598_v16 = vrot.slane %v2596_v2, 5  ;;  %v2602_v17 = vrot.slane %v2600_v3, 4  ;;  %v2796_v22 = vrot.slane %v2795_v7, 4  ;;  %v4162_v25 = vrot.slane %v4134_v62, 9  ;;  %v4321_v2 = vld [vmem:[%s4432_s19 + $0xc] sm:$0xff]   ;;  %v4322_v3 = vld [vmem:[%s4432_s19] sm:$0xff]  }
  0x9c   : > { %v2593_v23 = vor.u32 %v2592_v8, %v2589_v1  ;;  %v2608_v24 = vrot.slane %v2606_v9, 5  ;;  %v3179_v27 = vrot.slane %v4135_v4, 5  ;;  %v3182_v28 = vrot.slane %v4136_v10, 5  ;;  %v4865_v55 = vpop.permute.xlu0 %855  ;;  %v4323_v4 = vld [vmem:[%s4432_s19 + $0x6c] sm:$0xff]   ;;  %v4333_v7 = vld [vmem:[%s4432_s19 + $0x78] sm:$0xff]   ;;  %v4337_v9 = vld [vmem:[%s4432_s19 + $0x84] sm:$0xff]  }
  0x9d   : > { %v2603_v26 = vor.u32 %v2602_v17, %v2598_v16  ;;  %v4154_v29 = vrot.slane %v4110_v12, 9  ;;  %2407 = vrot.lane.b32.xlu0 %v4320_v57, %s4385_s25  ;;  %v2801_v31 = vsel %vm4484_vm5, %v2796_v22, %v2800_v60  ;;  %v3123_v33 = vrot.slane %v4111_v18, 5  ;;  %v4334_v8 = vld [vmem:[%s4432_s19 + $0x18] sm:$0xff]   ;;  %357 = vst.msk [vmem:[#allocation2 + $0x8] sm:$0xff] %vm355_vm6, %v4321_v2  ;;  %356 = vst.msk [vmem:[#allocation2] sm:$0xff] %vm355_vm6, %v4322_v3 }
  0x9e   : > { %2966 = vrot.lane.b32.xlu1 %v4098_v52, %s4386_s26  ;;  %v2594_v32 = vrot.slane %v2593_v23, 4  ;;  %v3126_v34 = vrot.slane %v4112_v19, 5  ;;  %v4099_v36 = vcombine.low %v2791_v15, %v2801_v31  ;;  %v3180_v38 = vsel %vm4434_vm2, %v4162_v25, %v3179_v27  ;;  %v4138_v23 = vld [vmem:[%s4432_s19 + $0xa0] sm:$0xf]  ;;  %v4113_v25 = vld [vmem:[%s4432_s19 + $0x3c] sm:$0xe] }
  0x9f   : > { %v2604_v37 = vrot.slane %v2603_v26, 4  ;;  %v3181_v39 = vrot.slane %v3179_v27, 4  ;;  %v4857_v45 = vsel %vm4434_vm2, %v4154_v29, %v3123_v33  ;;  %v3125_v47 = vrot.slane %v3123_v33, 4  ;;  %v4338_v26 = vld [vmem:[%s4432_s19 + $0x24] sm:$0xff]   ;;  %365 = vst.msk [vmem:[#allocation2 + $0x48] sm:$0xff] %vm355_vm6, %v4323_v4  ;;  %364 = vst.msk [vmem:[#allocation2 + $0x40] sm:$0xff] %vm355_vm6, %v4324_v6 }
  0xa0   : > { %v2599_v42 = vsel %vm4484_vm5, %v2594_v32, %v2598_v16  ;;  %v712_v48 = vshrl.u32 %v408_v30, 16  ;;  %v715_v53 = vshll.u32 %v408_v30, 16  ;;  %v721_v54 = vshll.u32 %v409_v35, 16  ;;  %v4884_v16 = vld [vmem:[%s4432_s19 + $0x9c] sm:$0xe]  ;;  %366 = vst.msk [vmem:[#allocation2 + $0x50] sm:$0xff] %vm355_vm6, %v4333_v7 }
  0xa1   : > { %v2609_v51 = vsel %vm4484_vm5, %v2604_v37, %v2608_v24  ;;  %v3183_v52 = vsel %vm4434_vm2, %v3181_v39, %v3182_v28  ;;  %v4867_v56 = vpop.permute.xlu1 %873  ;;  %2950 = vrot.lane.b32.xlu0 %v4090_v14, %s4386_s26  ;;  %v3127_v59 = vsel %vm4434_vm2, %v3125_v47, %v3126_v34  ;;  %v725_v1 = vshrl.u32 %v409_v35, 16  ;;  %v4888_v24 = vld [vmem:[%s4432_s19 + $0xa4] sm:$0x1]  ;;  %v4114_v35 = vld [vmem:[%s4432_s19 + $0x40] sm:$0xf]  ;;  %358 = vst.msk [vmem:[#allocation2 + $0x10] sm:$0xff] %vm355_vm6, %v4334_v8 }
  0xa2   : > { %2968 = vrot.lane.b32.xlu1 %v4099_v36, %s4386_s26  ;;  %v4091_v57 = vcombine.low %v2599_v42, %v2609_v51  ;;  %v4178_v58 = vcombine.low %v3180_v38, %v3183_v52  ;;  %v714_v60 = vrot.slane %v712_v48, 4  ;;  %v4170_v61 = vcombine.low %v4857_v45, %v3127_v59  ;;  %v4115_v39 = vld [vmem:[%s4432_s19 + $0x44] sm:$0x1]  ;;  %367 = vst.msk [vmem:[#allocation2 + $0x58] sm:$0xff] %vm355_vm6, %v4337_v9  ;;  %v411_v51 = vld [vmem:[%s4432_s19 + $0x9c] sm:$0xf] }
  0xa3   : > { %v717_v62 = vrot.slane %v715_v53, 5  ;;  %v4874_v63 = vrot.slane %v721_v54, 5  ;;  %v731_v10 = vshll.u32 %v410_v40, 16  ;;  %v520_v12 = vshrl.u32 %v384_v41, 16  ;;  %359 = vst.msk [vmem:[#allocation2 + $0x18] sm:$0xff] %vm355_vm6, %v4338_v26 }
  0xa4   : > { %v523_v14 = vshll.u32 %v384_v41, 16  ;;  %v529_v15 = vshll.u32 %v385_v49, 16  ;;  %v727_v18 = vrot.slane %v725_v1, 4  ;;  %v533_v19 = vshrl.u32 %v385_v49, 16  ;;  %905 = vst.msk [vmem:[#allocation2 + $0x8] sm:$0xff] %vm903_vm7, %v4841_v21  ;;  %904 = vst.msk [vmem:[#allocation2] sm:$0xff] %vm903_vm7, %v4865_v55 }
  0xa5   : > { %v718_v17 = vor.u32 %v717_v62, %v714_v60  ;;  %v539_v22 = vshll.u32 %v386_v50, 16  ;;  %2952 = vrot.lane.b32.xlu0 %v4091_v57, %s4386_s26  ;;  %v733_v27 = vrot.slane %v731_v10, 5  ;;  %v522_v28 = vrot.slane %v520_v12, 4  ;;  %v4896_v37 = vpop.permute.xlu1 %1375  ;;  %913 = vst.msk [vmem:[#allocation2 + $0x48] sm:$0xff] %vm903_vm7, %v4867_v56  ;;  %v412_v55 = vld [vmem:[%s4432_s19 + $0xa0] sm:$0xf] }
  0xa6   : > { %3287 = vrot.lane.b32.xlu1 %v4178_v58, %s4387_s27  ;;  %v525_v29 = vrot.slane %v523_v14, 5  ;;  %v531_v30 = vrot.slane %v529_v15, 5  ;;  %v728_v32 = vor.u32 %v727_v18, %v4874_v63  ;;  %v535_v33 = vrot.slane %v533_v19, 4  ;;  %v872_v36 = vpop.permute.xlu0 %871  ;;  %1228 = vst.msk [vmem:[#allocation2] sm:$0xff] %vm1227_vm8, %v4813_v43  ;;  %1229 = vst.msk [vmem:[#allocation2 + $0x8] sm:$0xff] %vm1227_vm8, %v4839_v20 }
  0xa7   : > { %v719_v31 = vrot.slane %v718_v17, 4  ;;  %v541_v34 = vrot.slane %v539_v22, 5  ;;  %v4163_v45 = vrot.slane %v4884_v16, 9  ;;  %v3186_v48 = vrot.slane %v4138_v23, 5  ;;  %912 = vst.msk [vmem:[#allocation2 + $0x40] sm:$0xff] %vm903_vm7, %v872_v36 }
  0xa8   : > { %v526_v38 = vor.u32 %v525_v29, %v522_v28  ;;  %v729_v41 = vrot.slane %v728_v32, 4  ;;  %v536_v42 = vor.u32 %v535_v33, %v531_v30  ;;  %v3189_v49 = vrot.slane %v4888_v24, 5  ;;  %1237 = vst.msk [vmem:[#allocation2 + $0x48] sm:$0xff] %vm1227_vm8, %v4815_v44  ;;  %1236 = vst.msk [vmem:[#allocation2 + $0x40] sm:$0xff] %vm1227_vm8, %v4802_v13  ;;  %v413_v60 = vld [vmem:[%s4432_s19 + $0xa4] sm:$0x1] }
  0xa9   : > { %v724_v40 = vsel %vm4484_vm5, %v719_v31, %v4874_v63  ;;  %3271 = vrot.lane.b32.xlu0 %v4170_v61, %s4387_s27  ;;  %v4155_v50 = vrot.slane %v4113_v25, 9  ;;  %v3130_v21 = vrot.slane %v4114_v35, 5  ;;  %v3133_v54 = vrot.slane %v4115_v39, 5  ;;  %v387_v4 = vld [vmem:[%s4432_s19 + $0x3c] sm:$0xf]  ;;  %1415 = vst.msk [vmem:[#allocation2 + $0x48] sm:$0xff] %vm1405_vm9, %v4896_v37 }
  0xaa   : > { %v527_v47 = vrot.slane %v526_v38, 4  ;;  %v734_v52 = vsel %vm4484_vm5, %v729_v41, %v733_v27  ;;  %v537_v53 = vrot.slane %v536_v42, 4  ;;  %v1360_v56 = vpop.permute.xlu0 %1359  ;;  %v3187_v43 = vsel %vm4434_vm2, %v4163_v45, %v3186_v48  ;;  %v4941_v62 = vpop.permute.xlu1 %1918  ;;  %v388_v6 = vld [vmem:[%s4432_s19 + $0x40] sm:$0xf]  ;;  %v389_v12 = vld [vmem:[%s4432_s19 + $0x44] sm:$0x1] }
  0xab   : > { %v3764_v57 = vcombine.low %v724_v40, %v734_v52  ;;  %v3188_v20 = vrot.slane %v3186_v48, 4  ;;  %v3131_v44 = vsel %vm4434_vm2, %v4155_v50, %v3130_v21  ;;  %v3132_v13 = vrot.slane %v3130_v21, 4  ;;  %v956_v18 = vld [vmem:[%s4432_s19 + $0x90] sm:$0xe]  ;;  %v957_v19 = vld [vmem:[%s4432_s19 + $0x94] sm:$0xf] }
  0xac   : > { %v532_v58 = vsel %vm4484_vm5, %v527_v47, %v531_v30  ;;  %v542_v59 = vsel %vm4484_vm5, %v537_v53, %v541_v34  ;;  %v736_v61 = vshrl.u32 %v411_v51, 16  ;;  %v739_v2 = vshll.u32 %v411_v51, 16  ;;  %v958_v27 = vld [vmem:[%s4432_s19 + $0x98] sm:$0x1]  ;;  %v932_v32 = vld [vmem:[%s4432_s19 + $0x30] sm:$0xe] }
  0xad   : > { %879 = vrot.lane.b32.xlu1 %v3764_v57, %s4382_s22  ;;  %v3756_v63 = vcombine.low %v532_v58, %v542_v59  ;;  %v3190_v1 = vsel %vm4434_vm2, %v3188_v20, %v3189_v49  ;;  %v745_v3 = vshll.u32 %v412_v55, 16  ;;  %v3134_v8 = vsel %vm4434_vm2, %v3132_v13, %v3133_v54  ;;  %v933_v38 = vld [vmem:[%s4432_s19 + $0x34] sm:$0xf]  ;;  %v934_v47 = vld [vmem:[%s4432_s19 + $0x38] sm:$0x1]  ;;  %1406 = vst.msk [vmem:[#allocation2] sm:$0xff] %vm1405_vm9, %v4799_v11 }
  0xae   : > { %v4179_v7 = vcombine.low %v3187_v43, %v3190_v1  ;;  %v738_v9 = vrot.slane %v736_v61, 4  ;;  %v749_v10 = vshrl.u32 %v412_v55, 16  ;;  %v4171_v14 = vcombine.low %v3131_v44, %v3134_v8  ;;  %v4954_v22 = vpop.permute.xlu0 %1902  ;;  %v4348_v40 = vld [vmem:[%s4432_s19 + $0x90] sm:$0xff]   ;;  %1414 = vst.msk [vmem:[#allocation2 + $0x40] sm:$0xff] %vm1405_vm9, %v4780_v46  ;;  %1407 = vst.msk [vmem:[#allocation2 + $0x8] sm:$0xff] %vm1405_vm9, %v1360_v56 }
  0xaf   : > { %863 = vrot.lane.b32.xlu0 %v3756_v63, %s4382_s22  ;;  %v741_v15 = vrot.slane %v739_v2, 5  ;;  %v747_v16 = vrot.slane %v745_v3, 5  ;;  %v755_v17 = vshll.u32 %v413_v60, 16  ;;  %v544_v24 = vshrl.u32 %v387_v4, 16  ;;  %v959_v52 = vld [vmem:[%s4432_s19 + $0x9c] sm:$0xe] }
  0xb0   : > { %v751_v23 = vrot.slane %v749_v10, 4  ;;  %v547_v25 = vshll.u32 %v387_v4, 16  ;;  %v553_v26 = vshll.u32 %v388_v6, 16  ;;  %v557_v30 = vshrl.u32 %v388_v6, 16  ;;  %368 = vst.msk [vmem:[#allocation2 + $0x60] sm:$0xff] %vm355_vm6, %v4348_v40  ;;  %v4349_v53 = vld [vmem:[%s4432_s19 + $0x30] sm:$0xff]  }
  0xb1   : > { %3289 = vrot.lane.b32.xlu1 %v4179_v7, %s4387_s27  ;;  %v742_v28 = vor.u32 %v741_v15, %v738_v9  ;;  %v757_v29 = vrot.slane %v755_v17, 5  ;;  %v563_v31 = vshll.u32 %v389_v12, 16  ;;  %v546_v34 = vrot.slane %v544_v24, 4  ;;  %v960_v11 = vld [vmem:[%s4432_s19 + $0xa0] sm:$0xf]  ;;  %360 = vst.msk [vmem:[#allocation2 + $0x20] sm:$0xff] %vm355_vm6, %v4349_v53 }
  0xb2   : > { %v752_v33 = vor.u32 %v751_v23, %v747_v16  ;;  %v549_v35 = vrot.slane %v547_v25, 5  ;;  %v555_v36 = vrot.slane %v553_v26, 5  ;;  %v1921_v39 = vpop.permute.xlu1 %1920  ;;  %v559_v42 = vrot.slane %v557_v30, 4  ;;  %v4977_v57 = vld [vmem:[%s4432_s19 + $0xa4] sm:$0x1]  ;;  %1959 = vst.msk [vmem:[#allocation2 + $0x40] sm:$0xff] %vm1950_vm10, %v4941_v62 }
  0xb3   : > { %3273 = vrot.lane.b32.xlu0 %v4171_v14, %s4387_s27  ;;  %v743_v41 = vrot.slane %v742_v28, 4  ;;  %v565_v45 = vrot.slane %v563_v31, 5  ;;  %v3780_v50 = vrot.slane %v956_v18, 9  ;;  %v1105_v51 = vrot.slane %v957_v19, 5  ;;  %v935_v46 = vld [vmem:[%s4432_s19 + $0x3c] sm:$0xe] }
  0xb4   : > { %v753_v48 = vrot.slane %v752_v33, 4  ;;  %v550_v49 = vor.u32 %v549_v35, %v546_v34  ;;  %v560_v37 = vor.u32 %v559_v42, %v555_v36  ;;  %v1108_v54 = vrot.slane %v958_v27, 5  ;;  %v936_v44 = vld [vmem:[%s4432_s19 + $0x40] sm:$0xf]  ;;  %v937_v13 = vld [vmem:[%s4432_s19 + $0x44] sm:$0x1] }
  0xb5   : > { %v748_v21 = vsel %vm4484_vm5, %v743_v41, %v747_v16  ;;  %v3772_v55 = vrot.slane %v932_v32, 9  ;;  %v1106_v20 = vsel %vm4434_vm2, %v3780_v50, %v1105_v51  ;;  %v1107_v59 = vrot.slane %v1105_v51, 4  ;;  %v3884_v3 = vld [vmem:[%s4432_s19 + $0x9c] sm:$0xf]  ;;  %v3885_v8 = vld [vmem:[%s4432_s19 + $0xa0] sm:$0xf] }
  0xb6   : > { %v1905_v56 = vpop.permute.xlu0 %1904  ;;  %v758_v58 = vsel %vm4484_vm5, %v753_v48, %v757_v29  ;;  %v551_v43 = vrot.slane %v550_v49, 4  ;;  %v2240_v60 = vpop.permute.xlu1 %2239  ;;  %v561_v63 = vrot.slane %v560_v37, 4  ;;  %v1049_v1 = vrot.slane %v933_v38, 5  ;;  %1951 = vst.msk [vmem:[#allocation2] sm:$0xff] %vm1950_vm10, %v4954_v22  ;;  %1960 = vst.msk [vmem:[#allocation2 + $0x48] sm:$0xff] %vm1950_vm10, %v1921_v39  ;;  %v4350_v17 = vld [vmem:[%s4432_s19 + $0x9c] sm:$0xff]  }
  0xb7   : > { %v3765_v61 = vcombine.low %v748_v21, %v758_v58  ;;  %v1052_v2 = vrot.slane %v934_v47, 5  ;;  %v1109_v6 = vsel %vm4434_vm2, %v1107_v59, %v1108_v54  ;;  %v3781_v7 = vrot.slane %v959_v52, 9  ;;  %1952 = vst.msk [vmem:[#allocation2 + $0x8] sm:$0xff] %vm1950_vm10, %v1905_v56  ;;  %v3886_v16 = vld [vmem:[%s4432_s19 + $0xa4] sm:$0x1]  ;;  %v4351_v26 = vld [vmem:[%s4432_s19 + $0x3c] sm:$0xff]  }
  0xb8   : > { %v556_v4 = vsel %vm4484_vm5, %v551_v43, %v555_v36  ;;  %v566_v9 = vsel %vm4484_vm5, %v561_v63, %v565_v45  ;;  %v3796_v10 = vcombine.low %v1106_v20, %v1109_v6  ;;  %v1050_v12 = vsel %vm4434_vm2, %v3772_v55, %v1049_v1  ;;  %v3860_v28 = vld [vmem:[%s4432_s19 + $0x3c] sm:$0xf]  ;;  %369 = vst.msk [vmem:[#allocation2 + $0x68] sm:$0xff] %vm355_vm6, %v4350_v17  ;;  %v3861_v33 = vld [vmem:[%s4432_s19 + $0x40] sm:$0xf] }
  0xb9   : > { %881 = vrot.lane.b32.xlu1 %v3765_v61, %s4382_s22  ;;  %v1051_v14 = vrot.slane %v1049_v1, 4  ;;  %v3757_v18 = vcombine.low %v556_v4, %v566_v9  ;;  %v1112_v19 = vrot.slane %v960_v11, 5  ;;  %v1115_v23 = vrot.slane %v4977_v57, 5  ;;  %2280 = vst.msk [vmem:[#allocation2 + $0x40] sm:$0xff] %vm2271_vm11, %v2240_v60  ;;  %v3862_v52 = vld [vmem:[%s4432_s19 + $0x44] sm:$0x1] }
  0xba   : > { %v2224_v15 = vpop.permute.xlu0 %2223  ;;  %v3773_v24 = vrot.slane %v935_v46, 9  ;;  %v2242_v25 = vpop.permute.xlu1 %2241  ;;  %v1056_v22 = vrot.slane %v936_v44, 5  ;;  %v1059_v27 = vrot.slane %v937_v13, 5  ;;  %v1759_v32 = vshrl.u32 %v3884_v3, 16  ;;  %361 = vst.msk [vmem:[#allocation2 + $0x28] sm:$0xff] %vm355_vm6, %v4351_v26  ;;  %v4325_v55 = vld [vmem:[%s4432_s19 + $0x9c] sm:$0xff]  }
  0xbb   : > { %v1053_v62 = vsel %vm4434_vm2, %v1051_v14, %v1052_v2  ;;  %865 = vrot.lane.b32.xlu0 %v3757_v18, %s4382_s22  ;;  %v1113_v30 = vsel %vm4434_vm2, %v3781_v7, %v1112_v19  ;;  %v1114_v31 = vrot.slane %v1112_v19, 4  ;;  %2272 = vst.msk [vmem:[#allocation2] sm:$0xff] %vm2271_vm11, %v2224_v15  ;;  %2281 = vst.msk [vmem:[#allocation2 + $0x48] sm:$0xff] %vm2271_vm11, %v2242_v25  ;;  %v1762_v38 = vshll.u32 %v3884_v3, 16  ;;  %v3887_v43 = vld [vmem:[%s4432_s19 + $0xa8] sm:$0xf] }
  0xbc   : > { %v3788_v29 = vcombine.low %v1050_v12, %v1053_v62  ;;  %v1057_v34 = vsel %vm4434_vm2, %v3773_v24, %v1056_v22  ;;  %v1058_v35 = vrot.slane %v1056_v22, 4  ;;  %v1768_v39 = vshll.u32 %v3885_v8, 16  ;;  %v3888_v13 = vld [vmem:[%s4432_s19 + $0xac] sm:$0xf]  ;;  %v4326_v3 = vld [vmem:[%s4432_s19 + $0x3c] sm:$0xff]  }
  0xbd   : > { %1203 = vrot.lane.b32.xlu1 %v3796_v10, %s4381_s21  ;;  %v1116_v40 = vsel %vm4434_vm2, %v1114_v31, %v1115_v23  ;;  %v1761_v41 = vrot.slane %v1759_v32, 4  ;;  %v1772_v42 = vshrl.u32 %v3885_v8, 16  ;;  %v1778_v45 = vshll.u32 %v3886_v16, 16  ;;  %v4327_v9 = vld [vmem:[%s4432_s19 + $0xa8] sm:$0xff]   ;;  %v3889_v15 = vld [vmem:[%s4432_s19 + $0xb0] sm:$0x1] }
  0xbe   : > { %v2226_v36 = vpop.permute.xlu0 %2225  ;;  %v2418_v47 = vpop.permute.xlu1 %2417  ;;  %v3797_v48 = vcombine.low %v1113_v30, %v1116_v40  ;;  %v1060_v49 = vsel %vm4434_vm2, %v1058_v35, %v1059_v27  ;;  %v1764_v50 = vrot.slane %v1762_v38, 5  ;;  %v1770_v51 = vrot.slane %v1768_v39, 5  ;;  %v3863_v17 = vld [vmem:[%s4432_s19 + $0x48] sm:$0xf]  ;;  %v3864_v26 = vld [vmem:[%s4432_s19 + $0x4c] sm:$0xf] }
  0xbf   : > { %2273 = vst.msk [vmem:[#allocation2 + $0x8] sm:$0xff] %vm2271_vm11, %v2226_v36  ;;  %1187 = vrot.lane.b32.xlu0 %v3788_v29, %s4381_s21  ;;  %v3789_v53 = vcombine.low %v1057_v34, %v1060_v49  ;;  %v1774_v21 = vrot.slane %v1772_v42, 4  ;;  %v1780_v37 = vrot.slane %v1778_v45, 5  ;;  %v1567_v54 = vshrl.u32 %v3860_v28, 16  ;;  %v3865_v30 = vld [vmem:[%s4432_s19 + $0x50] sm:$0x1] }
  0xc0   : > { %v1765_v11 = vor.u32 %v1764_v50, %v1761_v41  ;;  %v1570_v57 = vshll.u32 %v3860_v28, 16  ;;  %v1576_v46 = vshll.u32 %v3861_v33, 16  ;;  %v1580_v56 = vshrl.u32 %v3861_v33, 16  ;;  %2458 = vst.msk [vmem:[#allocation2 + $0x40] sm:$0xff] %vm2449_vm12, %v2418_v47  ;;  %v3948_v31 = vld [vmem:[%s4432_s19 + $0x9c] sm:$0xe] }
  0xc1   : > { %1205 = vrot.lane.b32.xlu1 %v3797_v48, %s4381_s21  ;;  %v1775_v20 = vor.u32 %v1774_v21, %v1770_v51  ;;  %v1569_v59 = vrot.slane %v1567_v54, 4  ;;  %v1586_v44 = vshll.u32 %v3862_v52, 16  ;;  %v1783_v7 = vshrl.u32 %v3887_v43, 16  ;;  %v4328_v32 = vld [vmem:[%s4432_s19 + $0x48] sm:$0xff]   ;;  %v3949_v38 = vld [vmem:[%s4432_s19 + $0xa0] sm:$0xf] }
  0xc2   : > { %v2402_v58 = vpop.permute.xlu0 %2401  ;;  %v2420_v60 = vpop.permute.xlu1 %2419  ;;  %v1766_v61 = vrot.slane %v1765_v11, 4  ;;  %v1572_v63 = vrot.slane %v1570_v57, 5  ;;  %v1578_v1 = vrot.slane %v1576_v46, 5  ;;  %v1582_v2 = vrot.slane %v1580_v56, 4  ;;  %v3950_v39 = vld [vmem:[%s4432_s19 + $0xa4] sm:$0x1] }
  0xc3   : > { %2450 = vst.msk [vmem:[#allocation2] sm:$0xff] %vm2449_vm12, %v2402_v58  ;;  %2459 = vst.msk [vmem:[#allocation2 + $0x48] sm:$0xff] %vm2449_vm12, %v2420_v60  ;;  %1189 = vrot.lane.b32.xlu0 %v3789_v53, %s4381_s21  ;;  %v1776_v4 = vrot.slane %v1775_v20, 4  ;;  %v1588_v6 = vrot.slane %v1586_v44, 5  ;;  %v1786_v8 = vshll.u32 %v3887_v43, 16  ;;  %v1792_v16 = vshll.u32 %v3888_v13, 16 }
  0xc4   : > { %v1771_v10 = vsel %vm4484_vm5, %v1766_v61, %v1770_v51  ;;  %v1573_v12 = vor.u32 %v1572_v63, %v1569_v59  ;;  %v1583_v14 = vor.u32 %v1582_v2, %v1578_v1  ;;  %v1785_v23 = vrot.slane %v1783_v7, 4  ;;  %v3924_v47 = vld [vmem:[%s4432_s19 + $0x3c] sm:$0xe]  ;;  %v3925_v48 = vld [vmem:[%s4432_s19 + $0x40] sm:$0xf] }
  0xc5   : > { %1381 = vrot.lane.b32.xlu1 %v4325_v55, %s4380_s20  ;;  %v1781_v19 = vsel %vm4484_vm5, %v1776_v4, %v1780_v37  ;;  %v1788_v24 = vrot.slane %v1786_v8, 5  ;;  %v1796_v25 = vshrl.u32 %v3888_v13, 16  ;;  %v1794_v29 = vrot.slane %v1792_v16, 5  ;;  %v3926_v13 = vld [vmem:[%s4432_s19 + $0x44] sm:$0x1] }
  0xc6   : > { %v2404_v18 = vpop.permute.xlu0 %2403  ;;  %v5049_v62 = vpop.permute.xlu1 %2962  ;;  %v3908_v22 = vcombine.low %v1771_v10, %v1781_v19  ;;  %v1574_v27 = vrot.slane %v1573_v12, 4  ;;  %v1584_v28 = vrot.slane %v1583_v14, 4  ;;  %v1802_v35 = vshll.u32 %v3889_v15, 16  ;;  %v3951_v2 = vld [vmem:[%s4432_s19 + $0xa8] sm:$0xe] }
  0xc7   : > { %2451 = vst.msk [vmem:[#allocation2 + $0x8] sm:$0xff] %vm2449_vm12, %v2404_v18  ;;  %1365 = vrot.lane.b32.xlu0 %v4326_v3, %s4380_s20  ;;  %v1789_v33 = vor.u32 %v1788_v24, %v1785_v23  ;;  %v1798_v34 = vrot.slane %v1796_v25, 4  ;;  %v1591_v36 = vshrl.u32 %v3863_v17, 16  ;;  %v1594_v42 = vshll.u32 %v3863_v17, 16  ;;  %v3952_v8 = vld [vmem:[%s4432_s19 + $0xac] sm:$0xf] }
  0xc8   : > { %v1579_v40 = vsel %vm4484_vm5, %v1574_v27, %v1578_v1  ;;  %v1589_v41 = vsel %vm4484_vm5, %v1584_v28, %v1588_v6  ;;  %v1600_v45 = vshll.u32 %v3864_v26, 16  ;;  %v1804_v53 = vrot.slane %v1802_v35, 5  ;;  %v3927_v17 = vld [vmem:[%s4432_s19 + $0x48] sm:$0xe]  ;;  %v3928_v25 = vld [vmem:[%s4432_s19 + $0x4c] sm:$0xf] }
  0xc9   : > { %1383 = vrot.lane.b32.xlu1 %v4327_v9, %s4380_s20  ;;  %v3900_v50 = vcombine.low %v1579_v40, %v1589_v41  ;;  %v1790_v51 = vrot.slane %v1789_v33, 4  ;;  %v1799_v52 = vor.u32 %v1798_v34, %v1794_v29  ;;  %v1593_v37 = vrot.slane %v1591_v36, 4  ;;  %v3953_v9 = vld [vmem:[%s4432_s19 + $0xb0] sm:$0x1]  ;;  %3003 = vst.msk [vmem:[#allocation2 + $0x40] sm:$0xff] %vm2994_vm13, %v5049_v62 }
  0xca   : > { %v2947_v49 = vpop.permute.xlu0 %2946  ;;  %v1596_v54 = vrot.slane %v1594_v42, 5  ;;  %v1602_v55 = vrot.slane %v1600_v45, 5  ;;  %v1604_v11 = vshrl.u32 %v3864_v26, 16  ;;  %v1610_v56 = vshll.u32 %v3865_v30, 16  ;;  %v4076_v30 = vld [vmem:[%s4432_s19 + $0xa8] sm:$0xf] }
  0xcb   : > { %v2965_v21 = vpop.permute.xlu1 %2964  ;;  %1367 = vrot.lane.b32.xlu0 %v4328_v32, %s4380_s20  ;;  %v1795_v57 = vsel %vm4484_vm5, %v1790_v51, %v1794_v29  ;;  %v1800_v46 = vrot.slane %v1799_v52, 4  ;;  %v3972_v58 = vrot.slane %v3948_v31, 9  ;;  %v2149_v59 = vrot.slane %v3949_v38, 5  ;;  %2995 = vst.msk [vmem:[#allocation2] sm:$0xff] %vm2994_vm13, %v2947_v49  ;;  %v3929_v29 = vld [vmem:[%s4432_s19 + $0x50] sm:$0x1] }
  0xcc   : > { %v1597_v43 = vor.u32 %v1596_v54, %v1593_v37  ;;  %v1606_v20 = vrot.slane %v1604_v11, 4  ;;  %v2152_v44 = vrot.slane %v3950_v39, 5  ;;  %v1612_v61 = vrot.slane %v1610_v56, 5  ;;  %3004 = vst.msk [vmem:[#allocation2 + $0x48] sm:$0xff] %vm2994_vm13, %v2965_v21  ;;  %v4077_v35 = vld [vmem:[%s4432_s19 + $0xac] sm:$0xf] }
  0xcd   : > { %1926 = vrot.lane.b32.xlu1 %v3908_v22, %s4383_s23  ;;  %v1805_v60 = vsel %vm4484_vm5, %v1800_v46, %v1804_v53  ;;  %v3964_v63 = vrot.slane %v3924_v47, 9  ;;  %v2093_v1 = vrot.slane %v3925_v48, 5  ;;  %v2150_v7 = vsel %vm4434_vm2, %v3972_v58, %v2149_v59  ;;  %v4078_v41 = vld [vmem:[%s4432_s19 + $0xb0] sm:$0x1]  ;;  %v4052_v48 = vld [vmem:[%s4432_s19 + $0x48] sm:$0xf] }
  0xce   : > { %v3909_v3 = vcombine.low %v1795_v57, %v1805_v60  ;;  %v1598_v4 = vrot.slane %v1597_v43, 4  ;;  %v1607_v6 = vor.u32 %v1606_v20, %v1602_v55  ;;  %v2151_v12 = vrot.slane %v2149_v59, 4  ;;  %v4053_v11 = vld [vmem:[%s4432_s19 + $0x4c] sm:$0xf]  ;;  %v4054_v58 = vld [vmem:[%s4432_s19 + $0x50] sm:$0x1] }
  0xcf   : > { %v2949_v10 = vpop.permute.xlu0 %2948  ;;  %1910 = vrot.lane.b32.xlu0 %v3900_v50, %s4383_s23  ;;  %v5079_v14 = vsel %vm4434_vm2, %v3964_v63, %v2093_v1  ;;  %v2095_v15 = vrot.slane %v2093_v1, 4  ;;  %v2096_v16 = vrot.slane %v3926_v13, 5  ;;  %v3284_v18 = vpop.permute.xlu1 %3283  ;;  %v3973_v24 = vrot.slane %v3951_v2, 9  ;;  %v4329_v59 = vld [vmem:[%s4432_s19 + $0xa8] sm:$0xff]   ;;  %v4079_v63 = vld [vmem:[%s4432_s19 + $0xb4] sm:$0xf] }
  0xd0   : > { %v1603_v19 = vsel %vm4484_vm5, %v1598_v4, %v1602_v55  ;;  %v1608_v23 = vrot.slane %v1607_v6, 4  ;;  %v2153_v26 = vsel %vm4434_vm2, %v2151_v12, %v2152_v44  ;;  %v2156_v27 = vrot.slane %v3952_v8, 5  ;;  %2996 = vst.msk [vmem:[#allocation2 + $0x8] sm:$0xff] %vm2994_vm13, %v2949_v10  ;;  %v4080_v12 = vld [vmem:[%s4432_s19 + $0xb8] sm:$0xf] }
  0xd1   : > { %1928 = vrot.lane.b32.xlu1 %v3909_v3, %s4383_s23  ;;  %v2097_v22 = vsel %vm4434_vm2, %v2095_v15, %v2096_v16  ;;  %v2159_v28 = vrot.slane %v3953_v9, 5  ;;  %v3988_v32 = vcombine.low %v2150_v7, %v2153_v26  ;;  %v3965_v34 = vrot.slane %v3927_v17, 9  ;;  %3324 = vst.msk [vmem:[#allocation2 + $0x40] sm:$0xff] %vm3315_vm14, %v3284_v18  ;;  %v4081_v16 = vld [vmem:[%s4432_s19 + $0xbc] sm:$0x1]  ;;  %v4331_v18 = vld [vmem:[%s4432_s19 + $0xb4] sm:$0xff]  }
  0xd2   : > { %v1613_v31 = vsel %vm4484_vm5, %v1608_v23, %v1612_v61  ;;  %v3980_v33 = vcombine.low %v5079_v14, %v2097_v22  ;;  %v2157_v38 = vsel %vm4434_vm2, %v3973_v24, %v2156_v27  ;;  %v2158_v39 = vrot.slane %v2156_v27, 4 }
  0xd3   : > { %v3268_v62 = vpop.permute.xlu0 %3267  ;;  %v3901_v36 = vcombine.low %v1603_v19, %v1613_v31  ;;  %v2100_v40 = vrot.slane %v3928_v25, 5  ;;  %v2103_v42 = vrot.slane %v3929_v29, 5  ;;  %v2803_v45 = vshrl.u32 %v4076_v30, 16 }
  0xd4   : > { %v2806_v47 = vshll.u32 %v4076_v30, 16  ;;  %v2160_v49 = vsel %vm4434_vm2, %v2158_v39, %v2159_v28  ;;  %3316 = vst.msk [vmem:[#allocation2] sm:$0xff] %vm3315_vm14, %v3268_v62  ;;  %v2812_v53 = vshll.u32 %v4077_v35, 16  ;;  %v2816_v55 = vshrl.u32 %v4077_v35, 16  ;;  %v4330_v28 = vld [vmem:[%s4432_s19 + $0x48] sm:$0xff]  }
  0xd5   : > { %2247 = vrot.lane.b32.xlu1 %v3988_v32, %s4384_s24  ;;  %1912 = vrot.lane.b32.xlu0 %v3901_v36, %s4383_s23  ;;  %v2101_v50 = vsel %vm4434_vm2, %v3965_v34, %v2100_v40  ;;  %v2102_v51 = vrot.slane %v2100_v40, 4  ;;  %v3989_v21 = vcombine.low %v2157_v38, %v2160_v49  ;;  %v2805_v37 = vrot.slane %v2803_v45, 4  ;;  %v4056_v38 = vld [vmem:[%s4432_s19 + $0x58] sm:$0xf]  ;;  %v4057_v45 = vld [vmem:[%s4432_s19 + $0x5c] sm:$0x1] }
  0xd6   : > { %v876_v52 = vpop.permute.xlu1 %875  ;;  %v2808_v54 = vrot.slane %v2806_v47, 5  ;;  %v2814_v46 = vrot.slane %v2812_v53, 5  ;;  %v2822_v56 = vshll.u32 %v4078_v41, 16  ;;  %v2611_v43 = vshrl.u32 %v4052_v48, 16 }
  0xd7   : > { %914 = vst.msk [vmem:[#allocation2 + $0x50] sm:$0xff] %vm903_vm7, %v876_v52  ;;  %v2104_v57 = vsel %vm4434_vm2, %v2102_v51, %v2103_v42  ;;  %v2818_v60 = vrot.slane %v2816_v55, 4  ;;  %v2614_v61 = vshll.u32 %v4052_v48, 16  ;;  %v2620_v3 = vshll.u32 %v4053_v11, 16  ;;  %v4332_v52 = vld [vmem:[%s4432_s19 + $0x54] sm:$0xff]  }
  0xd8   : > { %v3981_v20 = vcombine.low %v2101_v50, %v2104_v57  ;;  %v2809_v13 = vor.u32 %v2808_v54, %v2805_v37  ;;  %v2824_v1 = vrot.slane %v2822_v56, 5  ;;  %v2613_v2 = vrot.slane %v2611_v43, 4  ;;  %v3340_v27 = vld [vmem:[#allocation2 + $0x40] sm:$0xff]  ;;  %v4339_v51 = vld [vmem:[%s5616_s1 + $0x10] ss:$0 sps:$4 sm:$0x33]  }
  0xd9   : > { %2249 = vrot.lane.b32.xlu1 %v3989_v21, %s4384_s24  ;;  %2231 = vrot.lane.b32.xlu0 %v3980_v33, %s4384_s24  ;;  %v2624_v4 = vshrl.u32 %v4053_v11, 16  ;;  %v2819_v8 = vor.u32 %v2818_v60, %v2814_v46  ;;  %v2616_v9 = vrot.slane %v2614_v61, 5  ;;  %v2630_v10 = vshll.u32 %v4054_v58, 16  ;;  %v4055_v33 = vld [vmem:[%s4432_s19 + $0x54] sm:$0xf] }
  0xda   : > { %v860_v44 = vpop.permute.xlu0 %859  ;;  %v3286_v6 = vpop.permute.xlu1 %3285  ;;  %v2810_v7 = vrot.slane %v2809_v13, 4  ;;  %v2622_v14 = vrot.slane %v2620_v3, 5  ;;  %v2827_v17 = vshrl.u32 %v4079_v63, 16  ;;  %v2830_v31 = vshll.u32 %v4079_v63, 16  ;;  %4248 = vmatprep.mubr.msk.bf16.mxu1 %vm3375_vm15, %v3340_v27  ;;  %v4140_v55 = vld [vmem:[%s4432_s19 + $0xa8] sm:$0xe]  ;;  %4270 = vmatprep.subr.msk.bf16.mxu0 %vm3424_vm0, %v4339_v51 }
  0xdb   : > { %906 = vst.msk [vmem:[#allocation2 + $0x10] sm:$0xff] %vm903_vm7, %v860_v44  ;;  %v2626_v15 = vrot.slane %v2624_v4, 4  ;;  %v2820_v23 = vrot.slane %v2819_v8, 4  ;;  %v2617_v24 = vor.u32 %v2616_v9, %v2613_v2  ;;  %v2632_v25 = vrot.slane %v2630_v10, 5  ;;  %v3332_v22 = vld [vmem:[#allocation2] sm:$0xff]  ;;  %4271 = vmatprep.subr.msk.bf16.mxu1 %vm3424_vm0, %v4339_v51 }
  0xdc   : > { %3325 = vst.msk [vmem:[#allocation2 + $0x48] sm:$0xff] %vm3315_vm14, %v3286_v6  ;;  %v2815_v19 = vsel %vm4484_vm5, %v2810_v7, %v2814_v46  ;;  %4232 = vmatprep.mubr.msk.bf16.mxu0 %vm3375_vm15, %v3332_v22  ;;  %v2829_v30 = vrot.slane %v2827_v17, 4  ;;  %v2836_v32 = vshll.u32 %v4080_v12, 16  ;;  %v2840_v35 = vshrl.u32 %v4080_v12, 16  ;;  %v4141_v43 = vld [vmem:[%s4432_s19 + $0xac] sm:$0xf] }
  0xdd   : > { %2425 = vrot.lane.b32.xlu1 %v4329_v59, %s4385_s25  ;;  %2233 = vrot.lane.b32.xlu0 %v3981_v20, %s4384_s24  ;;  %v2627_v29 = vor.u32 %v2626_v15, %v2622_v14  ;;  %v2825_v34 = vsel %vm4484_vm5, %v2820_v23, %v2824_v1  ;;  %v2618_v62 = vrot.slane %v2617_v24, 4  ;;  %v2846_v36 = vshll.u32 %v4081_v16, 16  ;;  %v4142_v20 = vld [vmem:[%s4432_s19 + $0xb0] sm:$0x1]  ;;  %v4116_v61 = vld [vmem:[%s4432_s19 + $0x48] sm:$0xe] }
  0xde   : > { %v3270_v26 = vpop.permute.xlu0 %3269  ;;  %v4100_v39 = vcombine.low %v2815_v19, %v2825_v34  ;;  %v2832_v41 = vrot.slane %v2830_v31, 5  ;;  %v2838_v42 = vrot.slane %v2836_v32, 5  ;;  %v2842_v48 = vrot.slane %v2840_v35, 4  ;;  %v4117_v4 = vld [vmem:[%s4432_s19 + $0x4c] sm:$0xf] }
  0xdf   : > { %3317 = vst.msk [vmem:[#allocation2 + $0x8] sm:$0xff] %vm3315_vm14, %v3270_v26  ;;  %v2628_v40 = vrot.slane %v2627_v29, 4  ;;  %v2623_v47 = vsel %vm4484_vm5, %v2618_v62, %v2622_v14  ;;  %v2848_v49 = vrot.slane %v2846_v36, 5  ;;  %v2635_v50 = vshrl.u32 %v4055_v33, 16  ;;  %v4118_v10 = vld [vmem:[%s4432_s19 + $0x50] sm:$0x1] }
  0xe0   : > { %v2833_v21 = vor.u32 %v2832_v41, %v2829_v30  ;;  %v2638_v37 = vshll.u32 %v4055_v33, 16  ;;  %v2644_v54 = vshll.u32 %v4056_v38, 16  ;;  %v2843_v57 = vor.u32 %v2842_v48, %v2838_v42  ;;  %v415_v19 = vld [vmem:[%s4432_s19 + $0xac] sm:$0xf]  ;;  %v416_v33 = vld [vmem:[%s4432_s19 + $0xb0] sm:$0x1] }
  0xe1   : > { %2427 = vrot.lane.b32.xlu1 %v4331_v18, %s4385_s25  ;;  %2409 = vrot.lane.b32.xlu0 %v4330_v28, %s4385_s25  ;;  %v2633_v53 = vsel %vm4484_vm5, %v2628_v40, %v2632_v25  ;;  %v2637_v46 = vrot.slane %v2635_v50, 4  ;;  %v2648_v56 = vshrl.u32 %v4056_v38, 16  ;;  %v2654_v60 = vshll.u32 %v4057_v45, 16  ;;  %v414_v18 = vld [vmem:[%s4432_s19 + $0xa8] sm:$0xf] }
  0xe2   : > { %v4092_v11 = vcombine.low %v2623_v47, %v2633_v53  ;;  %v2834_v59 = vrot.slane %v2833_v21, 4  ;;  %v2640_v44 = vrot.slane %v2638_v37, 5  ;;  %v2646_v13 = vrot.slane %v2644_v54, 5  ;;  %v390_v34 = vld [vmem:[%s4432_s19 + $0x48] sm:$0xf] }
  0xe3   : > { %v2844_v63 = vrot.slane %v2843_v57, 4  ;;  %v2650_v1 = vrot.slane %v2648_v56, 4  ;;  %v4164_v3 = vrot.slane %v4140_v55, 9  ;;  %v2656_v8 = vrot.slane %v2654_v60, 5  ;;  %v3341_v27 = vld [vmem:[#allocation2 + $0x48] sm:$0xff] }
  0xe4   : > { %v878_v58 = vpop.permute.xlu1 %877  ;;  %v2839_v6 = vsel %vm4484_vm5, %v2834_v59, %v2838_v42  ;;  %v2641_v7 = vor.u32 %v2640_v44, %v2637_v46  ;;  %v3426_v9 = vsel %vm3424_vm0, %v4339_v51, 0  ;;  %v3193_v15 = vrot.slane %v4141_v43, 5  ;;  %v391_v62 = vld [vmem:[%s4432_s19 + $0x4c] sm:$0xf]  ;;  %v392_v40 = vld [vmem:[%s4432_s19 + $0x50] sm:$0x1] }
  0xe5   : > { %915 = vst.msk [vmem:[#allocation2 + $0x58] sm:$0xff] %vm903_vm7, %v878_v58  ;;  %2970 = vrot.lane.b32.xlu1 %v4100_v39, %s4386_s26  ;;  %v862_v2 = vpop.permute.xlu0 %861  ;;  %2411 = vrot.lane.b32.xlu0 %v4332_v52, %s4385_s25  ;;  %v2849_v12 = vsel %vm4484_vm5, %v2844_v63, %v2848_v49  ;;  %v2651_v14 = vor.u32 %v2650_v1, %v2646_v13  ;;  %v3196_v16 = vrot.slane %v4142_v20, 5  ;;  %v4156_v25 = vrot.slane %v4116_v61, 9  ;;  %v4352_v53 = vld [vmem:[%s4432_s19 + $0xa8] sm:$0xff]   ;;  %v4143_v57 = vld [vmem:[%s4432_s19 + $0xb4] sm:$0xe] }
  0xe6   : > { %907 = vst.msk [vmem:[#allocation2 + $0x18] sm:$0xff] %vm903_vm7, %v862_v2  ;;  %4231 = vmatpush3.bf16.msra.mxu0 %v3426_v9  ;;  %v4101_v23 = vcombine.low %v2839_v6, %v2849_v12  ;;  %v2642_v24 = vrot.slane %v2641_v7, 4  ;;  %4269 = vmatpush3.bf16.msra.mxu1 %v3426_v9  ;;  %v3137_v26 = vrot.slane %v4117_v4, 5  ;;  %v3333_v22 = vld [vmem:[#allocation2 + $0x8] sm:$0xff]  ;;  %v3194_v29 = vsel %vm4434_vm2, %v4164_v3, %v3193_v15  ;;  %v4144_v46 = vld [vmem:[%s4432_s19 + $0xb8] sm:$0xf] }
  0xe7   : > { %v2652_v28 = vrot.slane %v2651_v14, 4  ;;  %v3195_v30 = vrot.slane %v3193_v15, 4  ;;  %v3140_v31 = vrot.slane %v4118_v10, 5  ;;  %v760_v39 = vshrl.u32 %v414_v18, 16  ;;  %v4353_v56 = vld [vmem:[%s4432_s19 + $0x48] sm:$0xff]   ;;  %370 = vst.msk [vmem:[#allocation2 + $0x70] sm:$0xff] %vm355_vm6, %v4352_v53 }
  0xe8   : > { %v1200_v17 = vpop.permute.xlu1 %1199  ;;  %v2647_v35 = vsel %vm4484_vm5, %v2642_v24, %v2646_v13  ;;  %v3138_v36 = vsel %vm4434_vm2, %v4156_v25, %v3137_v26  ;;  %v3139_v38 = vrot.slane %v3137_v26, 4  ;;  %v763_v45 = vshll.u32 %v414_v18, 16  ;;  %v4145_v44 = vld [vmem:[%s4432_s19 + $0xbc] sm:$0x1]  ;;  %v4119_v1 = vld [vmem:[%s4432_s19 + $0x54] sm:$0xe] }
  0xe9   : > { %1238 = vst.msk [vmem:[#allocation2 + $0x50] sm:$0xff] %vm1227_vm8, %v1200_v17  ;;  %v1184_v32 = vpop.permute.xlu0 %1183  ;;  %2954 = vrot.lane.b32.xlu0 %v4092_v11, %s4386_s26  ;;  %2972 = vrot.lane.b32.xlu1 %v4101_v23, %s4386_s26  ;;  %v2657_v41 = vsel %vm4484_vm5, %v2652_v28, %v2656_v8  ;;  %v3197_v42 = vsel %vm4434_vm2, %v3195_v30, %v3196_v16  ;;  %v769_v47 = vshll.u32 %v415_v19, 16  ;;  %v762_v52 = vrot.slane %v760_v39, 4  ;;  %v4120_v8 = vld [vmem:[%s4432_s19 + $0x58] sm:$0xf] }
  0xea   : > { %1230 = vst.msk [vmem:[#allocation2 + $0x10] sm:$0xff] %vm1227_vm8, %v1184_v32  ;;  %4233 = vmatmul.mubr.msk.bf16.vlgmr.msra.gmra.mrb[0].mxu0 %vm3375_vm15, %v3333_v22  ;;  %4249 = vmatmul.mubr.msk.bf16.vlgmr.msra.gmra.mrb[0].mxu1 %vm3375_vm15, %v3341_v27  ;;  %v4093_v49 = vcombine.low %v2647_v35, %v2657_v41  ;;  %v4180_v50 = vcombine.low %v3194_v29, %v3197_v42  ;;  %v765_v37 = vrot.slane %v763_v45, 5  ;;  %v773_v55 = vshrl.u32 %v415_v19, 16  ;;  %v4121_v15 = vld [vmem:[%s4432_s19 + $0x5c] sm:$0x1]  ;;  %v4354_v39 = vld [vmem:[%s4432_s19 + $0xb4] sm:$0xff]  }
  0xeb   : > { %v3141_v51 = vsel %vm4434_vm2, %v3139_v38, %v3140_v31  ;;  %v771_v54 = vrot.slane %v769_v47, 5  ;;  %v779_v58 = vshll.u32 %v416_v33, 16  ;;  %v568_v43 = vshrl.u32 %v390_v34, 16  ;;  %362 = vst.msk [vmem:[#allocation2 + $0x30] sm:$0xff] %vm355_vm6, %v4353_v56  ;;  %v417_v24 = vld [vmem:[%s4432_s19 + $0xb4] sm:$0xf] }
  0xec   : > { %v1202_v48 = vpop.permute.xlu1 %1201  ;;  %v4172_v21 = vcombine.low %v3138_v36, %v3141_v51  ;;  %v571_v20 = vshll.u32 %v390_v34, 16  ;;  %v577_v59 = vshll.u32 %v391_v62, 16  ;;  %v766_v13 = vor.u32 %v765_v37, %v762_v52  ;;  %v418_v35 = vld [vmem:[%s4432_s19 + $0xb8] sm:$0xf]  ;;  %v419_v47 = vld [vmem:[%s4432_s19 + $0xbc] sm:$0x1] }
  0xed   : > { %1239 = vst.msk [vmem:[#allocation2 + $0x58] sm:$0xff] %vm1227_vm8, %v1202_v48  ;;  %v1186_v11 = vpop.permute.xlu0 %1185  ;;  %2956 = vrot.lane.b32.xlu0 %v4093_v49, %s4386_s26  ;;  %3291 = vrot.lane.b32.xlu1 %v4180_v50, %s4387_s27  ;;  %v775_v60 = vrot.slane %v773_v55, 4  ;;  %v581_v61 = vshrl.u32 %v391_v62, 16  ;;  %v587_v63 = vshll.u32 %v392_v40, 16  ;;  %v781_v3 = vrot.slane %v779_v58, 5 }
  0xee   : > { %1231 = vst.msk [vmem:[#allocation2 + $0x18] sm:$0xff] %vm1227_vm8, %v1186_v11  ;;  %v570_v4 = vrot.slane %v568_v43, 4  ;;  %v573_v6 = vrot.slane %v571_v20, 5  ;;  %v579_v7 = vrot.slane %v577_v59, 5  ;;  %v767_v9 = vrot.slane %v766_v13, 4 }
  0xef   : > { %v776_v10 = vor.u32 %v775_v60, %v771_v54  ;;  %v583_v12 = vrot.slane %v581_v61, 4  ;;  %v589_v14 = vrot.slane %v587_v63, 5  ;;  %v4165_v18 = vrot.slane %v4143_v57, 9  ;;  %v393_v48 = vld [vmem:[%s4432_s19 + $0x54] sm:$0xf]  ;;  %371 = vst.msk [vmem:[#allocation2 + $0x78] sm:$0xff] %vm355_vm6, %v4354_v39 }
  0xf0   : > { %v1378_v2 = vpop.permute.xlu1 %1377  ;;  %v574_v17 = vor.u32 %v573_v6, %v570_v4  ;;  %v3200_v19 = vrot.slane %v4144_v46, 5  ;;  %v3203_v23 = vrot.slane %v4145_v44, 5  ;;  %v772_v25 = vsel %vm4484_vm5, %v767_v9, %v771_v54  ;;  %v394_v53 = vld [vmem:[%s4432_s19 + $0x58] sm:$0xf]  ;;  %v395_v57 = vld [vmem:[%s4432_s19 + $0x5c] sm:$0x1] }
  0xf1   : > { %1416 = vst.msk [vmem:[#allocation2 + $0x50] sm:$0xff] %vm1405_vm9, %v1378_v2  ;;  %v1362_v16 = vpop.permute.xlu0 %1361  ;;  %3275 = vrot.lane.b32.xlu0 %v4172_v21, %s4387_s27  ;;  %v777_v26 = vrot.slane %v776_v10, 4  ;;  %v584_v22 = vor.u32 %v583_v12, %v579_v7  ;;  %v4157_v27 = vrot.slane %v4119_v1, 9  ;;  %v3144_v32 = vrot.slane %v4120_v8, 5  ;;  %v4355_v46 = vld [vmem:[%s4432_s19 + $0x54] sm:$0xff]  }
  0xf2   : > { %1408 = vst.msk [vmem:[#allocation2 + $0x10] sm:$0xff] %vm1405_vm9, %v1362_v16  ;;  %v575_v29 = vrot.slane %v574_v17, 4  ;;  %v3201_v30 = vsel %vm4434_vm2, %v4165_v18, %v3200_v19  ;;  %v3202_v31 = vrot.slane %v3200_v19, 4  ;;  %v3147_v62 = vrot.slane %v4121_v15, 5  ;;  %v962_v59 = vld [vmem:[%s4432_s19 + $0xa8] sm:$0xe] }
  0xf3   : > { %v782_v33 = vsel %vm4484_vm5, %v777_v26, %v781_v3  ;;  %v585_v34 = vrot.slane %v584_v22, 4  ;;  %v784_v36 = vshrl.u32 %v417_v24, 16  ;;  %v3145_v45 = vsel %vm4434_vm2, %v4157_v27, %v3144_v32  ;;  %v963_v1 = vld [vmem:[%s4432_s19 + $0xac] sm:$0xf]  ;;  %363 = vst.msk [vmem:[#allocation2 + $0x38] sm:$0xff] %vm355_vm6, %v4355_v46 }
  0xf4   : > { %v1380_v28 = vpop.permute.xlu1 %1379  ;;  %v3766_v40 = vcombine.low %v772_v25, %v782_v33  ;;  %v580_v41 = vsel %vm4484_vm5, %v575_v29, %v579_v7  ;;  %v3204_v42 = vsel %vm4434_vm2, %v3202_v31, %v3203_v23  ;;  %v3146_v51 = vrot.slane %v3144_v32, 4  ;;  %v964_v7 = vld [vmem:[%s4432_s19 + $0xb0] sm:$0x1]  ;;  %v938_v15 = vld [vmem:[%s4432_s19 + $0x48] sm:$0xe] }
  0xf5   : > { %1417 = vst.msk [vmem:[#allocation2 + $0x58] sm:$0xff] %vm1405_vm9, %v1380_v28  ;;  %v1364_v38 = vpop.permute.xlu0 %1363  ;;  %v590_v49 = vsel %vm4484_vm5, %v585_v34, %v589_v14  ;;  %v4181_v50 = vcombine.low %v3201_v30, %v3204_v42  ;;  %v786_v52 = vrot.slane %v784_v36, 4  ;;  %v787_v54 = vshll.u32 %v417_v24, 16  ;;  %v939_v16 = vld [vmem:[%s4432_s19 + $0x4c] sm:$0xf] }
  0xf6   : > { %1409 = vst.msk [vmem:[#allocation2 + $0x18] sm:$0xff] %vm1405_vm9, %v1364_v38  ;;  %883 = vrot.lane.b32.xlu1 %v3766_v40, %s4382_s22  ;;  %v3758_v37 = vcombine.low %v580_v41, %v590_v49  ;;  %v793_v55 = vshll.u32 %v418_v35, 16  ;;  %v797_v11 = vshrl.u32 %v418_v35, 16  ;;  %v3148_v56 = vsel %vm4434_vm2, %v3146_v51, %v3147_v62  ;;  %v940_v24 = vld [vmem:[%s4432_s19 + $0x50] sm:$0x1] }
  0xf7   : > { %v803_v58 = vshll.u32 %v419_v47, 16  ;;  %v592_v43 = vshrl.u32 %v393_v48, 16  ;;  %v595_v20 = vshll.u32 %v393_v48, 16  ;;  %v4173_v13 = vcombine.low %v3145_v45, %v3148_v56  ;;  %v965_v25 = vld [vmem:[%s4432_s19 + $0xb4] sm:$0xe] }
  0xf8   : > { %v1923_v21 = vpop.permute.xlu1 %1922  ;;  %867 = vrot.lane.b32.xlu0 %v3758_v37, %s4382_s22  ;;  %v789_v60 = vrot.slane %v787_v54, 5  ;;  %v795_v61 = vrot.slane %v793_v55, 5  ;;  %v799_v63 = vrot.slane %v797_v11, 4  ;;  %v601_v6 = vshll.u32 %v394_v53, 16  ;;  %v966_v29 = vld [vmem:[%s4432_s19 + $0xb8] sm:$0xf] }
  0xf9   : > { %1961 = vst.msk [vmem:[#allocation2 + $0x50] sm:$0xff] %vm1950_vm10, %v1923_v21  ;;  %v1907_v44 = vpop.permute.xlu0 %1906  ;;  %v805_v2 = vrot.slane %v803_v58, 5  ;;  %v594_v3 = vrot.slane %v592_v43, 4  ;;  %v597_v4 = vrot.slane %v595_v20, 5  ;;  %v605_v12 = vshrl.u32 %v394_v53, 16 }
  0xfa   : > { %1953 = vst.msk [vmem:[#allocation2 + $0x10] sm:$0xff] %vm1950_vm10, %v1907_v44  ;;  %3293 = vrot.lane.b32.xlu1 %v4181_v50, %s4387_s27  ;;  %v790_v9 = vor.u32 %v789_v60, %v786_v52  ;;  %v800_v10 = vor.u32 %v799_v63, %v795_v61  ;;  %v611_v14 = vshll.u32 %v395_v57, 16  ;;  %v603_v18 = vrot.slane %v601_v6, 5  ;;  %v967_v30 = vld [vmem:[%s4432_s19 + $0xbc] sm:$0x1] }
  0xfb   : > { %v598_v17 = vor.u32 %v597_v4, %v594_v3  ;;  %v3782_v19 = vrot.slane %v962_v59, 9  ;;  %v1119_v23 = vrot.slane %v963_v1, 5  ;;  %v607_v27 = vrot.slane %v605_v12, 4  ;;  %v941_v62 = vld [vmem:[%s4432_s19 + $0x54] sm:$0xe] }
  0xfc   : > { %v1925_v8 = vpop.permute.xlu1 %1924  ;;  %3277 = vrot.lane.b32.xlu0 %v4173_v13, %s4387_s27  ;;  %v791_v26 = vrot.slane %v790_v9, 4  ;;  %v801_v22 = vrot.slane %v800_v10, 4  ;;  %v613_v28 = vrot.slane %v611_v14, 5  ;;  %v1122_v34 = vrot.slane %v964_v7, 5  ;;  %v942_v35 = vld [vmem:[%s4432_s19 + $0x58] sm:$0xf] }
  0xfd   : > { %1962 = vst.msk [vmem:[#allocation2 + $0x58] sm:$0xff] %vm1950_vm10, %v1925_v8  ;;  %v599_v31 = vrot.slane %v598_v17, 4  ;;  %v1120_v32 = vsel %vm4434_vm2, %v3782_v19, %v1119_v23  ;;  %v1121_v33 = vrot.slane %v1119_v23, 4  ;;  %v608_v41 = vor.u32 %v607_v27, %v603_v18  ;;  %v943_v45 = vld [vmem:[%s4432_s19 + $0x5c] sm:$0x1] }
  0xfe   : > { %v796_v39 = vsel %vm4484_vm5, %v791_v26, %v795_v61  ;;  %v806_v40 = vsel %vm4484_vm5, %v801_v22, %v805_v2  ;;  %v3774_v42 = vrot.slane %v938_v15, 9  ;;  %v1063_v50 = vrot.slane %v939_v16, 5  ;;  %v3890_v51 = vld [vmem:[%s4432_s19 + $0xb4] sm:$0xf]  ;;  %v3891_v54 = vld [vmem:[%s4432_s19 + $0xb8] sm:$0xf] }
  0xff   : > { %v1909_v36 = vpop.permute.xlu0 %1908  ;;  %v3767_v47 = vcombine.low %v796_v39, %v806_v40  ;;  %v604_v48 = vsel %vm4484_vm5, %v599_v31, %v603_v18  ;;  %v1123_v49 = vsel %vm4434_vm2, %v1121_v33, %v1122_v34  ;;  %v609_v52 = vrot.slane %v608_v41, 4  ;;  %v3892_v43 = vld [vmem:[%s4432_s19 + $0xbc] sm:$0x1]  ;;  %v3866_v2 = vld [vmem:[%s4432_s19 + $0x54] sm:$0xf] }
 0x100   : > { %v2244_v38 = vpop.permute.xlu1 %2243  ;;  %1954 = vst.msk [vmem:[#allocation2 + $0x18] sm:$0xff] %vm1950_vm10, %v1909_v36  ;;  %v3798_v53 = vcombine.low %v1120_v32, %v1123_v49  ;;  %v1066_v21 = vrot.slane %v940_v24, 5  ;;  %v3783_v37 = vrot.slane %v965_v25, 9  ;;  %v1064_v55 = vsel %vm4434_vm2, %v3774_v42, %v1063_v50  ;;  %v3867_v3 = vld [vmem:[%s4432_s19 + $0x58] sm:$0xf] }
 0x101   : > { %2282 = vst.msk [vmem:[#allocation2 + $0x50] sm:$0xff] %vm2271_vm11, %v2244_v38  ;;  %885 = vrot.lane.b32.xlu1 %v3767_v47, %s4382_s22  ;;  %v1065_v11 = vrot.slane %v1063_v50, 4  ;;  %v1126_v57 = vrot.slane %v966_v29, 5  ;;  %v1129_v46 = vrot.slane %v967_v30, 5  ;;  %v614_v20 = vsel %vm4484_vm5, %v609_v52, %v613_v28  ;;  %v3868_v24 = vld [vmem:[%s4432_s19 + $0x5c] sm:$0x1] }
 0x102   : > { %v3775_v59 = vrot.slane %v941_v62, 9  ;;  %v1070_v44 = vrot.slane %v942_v35, 5  ;;  %v1073_v13 = vrot.slane %v943_v45, 5  ;;  %v3759_v60 = vcombine.low %v604_v48, %v614_v20  ;;  %v3893_v28 = vld [vmem:[%s4432_s19 + $0xc0] sm:$0xf]  ;;  %v4340_v33 = vld [vmem:[%s4432_s19 + $0xb4] sm:$0xff]  }
 0x103   : > { %v2228_v56 = vpop.permute.xlu0 %2227  ;;  %v1067_v61 = vsel %vm4434_vm2, %v1065_v11, %v1066_v21  ;;  %v1127_v63 = vsel %vm4434_vm2, %v3783_v37, %v1126_v57  ;;  %v1128_v1 = vrot.slane %v1126_v57, 4  ;;  %v1807_v8 = vshrl.u32 %v3890_v51, 16  ;;  %v3894_v39 = vld [vmem:[%s4432_s19 + $0xc4] sm:$0xf]  ;;  %v3895_v52 = vld [vmem:[%s4432_s19 + $0xc8] sm:$0x1] }
 0x104   : > { %v2246_v58 = vpop.permute.xlu1 %2245  ;;  %2274 = vst.msk [vmem:[#allocation2 + $0x10] sm:$0xff] %vm2271_vm11, %v2228_v56  ;;  %v3790_v4 = vcombine.low %v1064_v55, %v1067_v61  ;;  %v1071_v6 = vsel %vm4434_vm2, %v3775_v59, %v1070_v44  ;;  %v1072_v7 = vrot.slane %v1070_v44, 4  ;;  %869 = vrot.lane.b32.xlu0 %v3759_v60, %s4382_s22  ;;  %v1810_v12 = vshll.u32 %v3890_v51, 16  ;;  %v3869_v11 = vld [vmem:[%s4432_s19 + $0x60] sm:$0xf] }
 0x105   : > { %2283 = vst.msk [vmem:[#allocation2 + $0x58] sm:$0xff] %vm2271_vm11, %v2246_v58  ;;  %1207 = vrot.lane.b32.xlu1 %v3798_v53, %s4381_s21  ;;  %v1130_v9 = vsel %vm4434_vm2, %v1128_v1, %v1129_v46  ;;  %v1816_v14 = vshll.u32 %v3891_v54, 16  ;;  %v1820_v15 = vshrl.u32 %v3891_v54, 16  ;;  %v1809_v19 = vrot.slane %v1807_v8, 4  ;;  %v4341_v53 = vld [vmem:[%s4432_s19 + $0x54] sm:$0xff]   ;;  %v4342_v57 = vld [vmem:[%s4432_s19 + $0xc0] sm:$0xff]  }
 0x106   : > { %v3799_v17 = vcombine.low %v1127_v63, %v1130_v9  ;;  %v1074_v18 = vsel %vm4434_vm2, %v1072_v7, %v1073_v13  ;;  %v1826_v23 = vshll.u32 %v3892_v43, 16  ;;  %v1812_v26 = vrot.slane %v1810_v12, 5  ;;  %v3870_v20 = vld [vmem:[%s4432_s19 + $0x64] sm:$0xf]  ;;  %v3871_v1 = vld [vmem:[%s4432_s19 + $0x68] sm:$0x1] }
 0x107   : > { %v2230_v10 = vpop.permute.xlu0 %2229  ;;  %v3791_v25 = vcombine.low %v1071_v6, %v1074_v18  ;;  %v1818_v22 = vrot.slane %v1816_v14, 5  ;;  %v1822_v27 = vrot.slane %v1820_v15, 4  ;;  %v1615_v30 = vshrl.u32 %v3866_v2, 16  ;;  %v3955_v9 = vld [vmem:[%s4432_s19 + $0xb8] sm:$0xf] }
 0x108   : > { %v2422_v16 = vpop.permute.xlu1 %2421  ;;  %2275 = vst.msk [vmem:[#allocation2 + $0x18] sm:$0xff] %vm2271_vm11, %v2230_v10  ;;  %v1828_v29 = vrot.slane %v1826_v23, 5  ;;  %v1618_v31 = vshll.u32 %v3866_v2, 16  ;;  %v1624_v32 = vshll.u32 %v3867_v3, 16  ;;  %1191 = vrot.lane.b32.xlu0 %v3790_v4, %s4381_s21  ;;  %v1813_v34 = vor.u32 %v1812_v26, %v1809_v19  ;;  %v3954_v2 = vld [vmem:[%s4432_s19 + $0xb4] sm:$0xe] }
 0x109   : > { %2460 = vst.msk [vmem:[#allocation2 + $0x50] sm:$0xff] %vm2449_vm12, %v2422_v16  ;;  %1209 = vrot.lane.b32.xlu1 %v3799_v17, %s4381_s21  ;;  %v1823_v62 = vor.u32 %v1822_v27, %v1818_v22  ;;  %v1628_v35 = vshrl.u32 %v3867_v3, 16  ;;  %v1634_v36 = vshll.u32 %v3868_v24, 16  ;;  %v1617_v41 = vrot.slane %v1615_v30, 4  ;;  %v4343_v3 = vld [vmem:[%s4432_s19 + $0x60] sm:$0xff]  }
 0x10a   : > { %v1620_v42 = vrot.slane %v1618_v31, 5  ;;  %v1626_v45 = vrot.slane %v1624_v32, 5  ;;  %v1831_v47 = vshrl.u32 %v3893_v28, 16  ;;  %v1814_v48 = vrot.slane %v1813_v34, 4  ;;  %v3956_v10 = vld [vmem:[%s4432_s19 + $0xbc] sm:$0x1] }
 0x10b   : > { %v2406_v38 = vpop.permute.xlu0 %2405  ;;  %v1824_v49 = vrot.slane %v1823_v62, 4  ;;  %v1630_v50 = vrot.slane %v1628_v35, 4  ;;  %v1636_v51 = vrot.slane %v1634_v36, 5  ;;  %v1834_v54 = vshll.u32 %v3893_v28, 16  ;;  %v3930_v17 = vld [vmem:[%s4432_s19 + $0x54] sm:$0xe] }
 0x10c   : > { %v2424_v40 = vpop.permute.xlu1 %2423  ;;  %2452 = vst.msk [vmem:[#allocation2 + $0x10] sm:$0xff] %vm2449_vm12, %v2406_v38  ;;  %v1621_v21 = vor.u32 %v1620_v42, %v1617_v41  ;;  %v1833_v37 = vrot.slane %v1831_v47, 4  ;;  %v1840_v55 = vshll.u32 %v3894_v39, 16  ;;  %1193 = vrot.lane.b32.xlu0 %v3791_v25, %s4381_s21  ;;  %v1819_v46 = vsel %vm4484_vm5, %v1814_v48, %v1818_v22  ;;  %v3931_v30 = vld [vmem:[%s4432_s19 + $0x58] sm:$0xf] }
 0x10d   : > { %2461 = vst.msk [vmem:[#allocation2 + $0x58] sm:$0xff] %vm2449_vm12, %v2424_v40  ;;  %1385 = vrot.lane.b32.xlu1 %v4340_v33, %s4380_s20  ;;  %v1829_v56 = vsel %vm4484_vm5, %v1824_v49, %v1828_v29  ;;  %v1631_v58 = vor.u32 %v1630_v50, %v1626_v45  ;;  %v1844_v43 = vshrl.u32 %v3894_v39, 16  ;;  %v1836_v61 = vrot.slane %v1834_v54, 5  ;;  %v3932_v62 = vld [vmem:[%s4432_s19 + $0x5c] sm:$0x1] }
 0x10e   : > { %v3910_v13 = vcombine.low %v1819_v46, %v1829_v56  ;;  %v1622_v60 = vrot.slane %v1621_v21, 4  ;;  %v1842_v63 = vrot.slane %v1840_v55, 5  ;;  %v1850_v7 = vshll.u32 %v3895_v52, 16  ;;  %v3957_v40 = vld [vmem:[%s4432_s19 + $0xc0] sm:$0xe] }
 0x10f   : > { %v2408_v59 = vpop.permute.xlu0 %2407  ;;  %v1632_v4 = vrot.slane %v1631_v58, 4  ;;  %v1846_v6 = vrot.slane %v1844_v43, 4  ;;  %v1639_v8 = vshrl.u32 %v3869_v11, 16  ;;  %v1837_v14 = vor.u32 %v1836_v61, %v1833_v37  ;;  %v3958_v41 = vld [vmem:[%s4432_s19 + $0xc4] sm:$0xf] }
 0x110   : > { %v2967_v44 = vpop.permute.xlu1 %2966  ;;  %2453 = vst.msk [vmem:[#allocation2 + $0x18] sm:$0xff] %vm2449_vm12, %v2408_v59  ;;  %v1627_v12 = vsel %vm4484_vm5, %v1622_v60, %v1626_v45  ;;  %v1642_v15 = vshll.u32 %v3869_v11, 16  ;;  %v1648_v16 = vshll.u32 %v3870_v20, 16  ;;  %1369 = vrot.lane.b32.xlu0 %v4341_v53, %s4380_s20  ;;  %v1852_v23 = vrot.slane %v1850_v7, 5  ;;  %v3959_v49 = vld [vmem:[%s4432_s19 + $0xc8] sm:$0x1] }
 0x111   : > { %3005 = vst.msk [vmem:[#allocation2 + $0x50] sm:$0xff] %vm2994_vm13, %v2967_v44  ;;  %1387 = vrot.lane.b32.xlu1 %v4342_v57, %s4380_s20  ;;  %v1637_v18 = vsel %vm4484_vm5, %v1632_v4, %v1636_v51  ;;  %v1847_v19 = vor.u32 %v1846_v6, %v1842_v63  ;;  %v1641_v24 = vrot.slane %v1639_v8, 4  ;;  %v1838_v27 = vrot.slane %v1837_v14, 4  ;;  %v3933_v54 = vld [vmem:[%s4432_s19 + $0x60] sm:$0xe] }
 0x112   : > { %v3902_v22 = vcombine.low %v1627_v12, %v1637_v18  ;;  %v1644_v28 = vrot.slane %v1642_v15, 5  ;;  %v5323_v29 = vrot.slane %v1648_v16, 5  ;;  %v1652_v32 = vshrl.u32 %v3870_v20, 16  ;;  %v3934_v56 = vld [vmem:[%s4432_s19 + $0x64] sm:$0xf] }
 0x113   : > { %v2951_v25 = vpop.permute.xlu0 %2950  ;;  %v1848_v31 = vrot.slane %v1847_v19, 4  ;;  %v1658_v33 = vshll.u32 %v3871_v1, 16  ;;  %v3974_v34 = vrot.slane %v3954_v2, 9  ;;  %v1843_v35 = vsel %vm4484_vm5, %v1838_v27, %v1842_v63  ;;  %v3935_v44 = vld [vmem:[%s4432_s19 + $0x68] sm:$0x1] }
 0x114   : > { %v2969_v26 = vpop.permute.xlu1 %2968  ;;  %2997 = vst.msk [vmem:[#allocation2 + $0x10] sm:$0xff] %vm2994_vm13, %v2951_v25  ;;  %v1645_v36 = vor.u32 %v1644_v28, %v1641_v24  ;;  %v2163_v38 = vrot.slane %v3955_v9, 5  ;;  %v2166_v39 = vrot.slane %v3956_v10, 5  ;;  %1371 = vrot.lane.b32.xlu0 %v4343_v3, %s4380_s20  ;;  %v1654_v45 = vrot.slane %v1652_v32, 4  ;;  %v4083_v3 = vld [vmem:[%s4432_s19 + $0xc4] sm:$0xf] }
 0x115   : > { %3006 = vst.msk [vmem:[#allocation2 + $0x58] sm:$0xff] %vm2994_vm13, %v2969_v26  ;;  %1930 = vrot.lane.b32.xlu1 %v3910_v13, %s4383_s23  ;;  %v1853_v42 = vsel %vm4484_vm5, %v1848_v31, %v1852_v23  ;;  %v1660_v47 = vrot.slane %v1658_v33, 5  ;;  %v3966_v48 = vrot.slane %v3930_v17, 9  ;;  %v2107_v11 = vrot.slane %v3931_v30, 5  ;;  %v4082_v13 = vld [vmem:[%s4432_s19 + $0xc0] sm:$0xf] }
 0x116   : > { %v3911_v52 = vcombine.low %v1843_v35, %v1853_v42  ;;  %v1646_v53 = vrot.slane %v1645_v36, 4  ;;  %v2164_v21 = vsel %vm4434_vm2, %v3974_v34, %v2163_v38  ;;  %v2165_v37 = vrot.slane %v2163_v38, 4  ;;  %v4084_v4 = vld [vmem:[%s4432_s19 + $0xc8] sm:$0x1]  ;;  %v4058_v6 = vld [vmem:[%s4432_s19 + $0x60] sm:$0xf] }
 0x117   : > { %v2953_v50 = vpop.permute.xlu0 %2952  ;;  %v1655_v55 = vor.u32 %v1654_v45, %v5323_v29  ;;  %v2110_v57 = vrot.slane %v3932_v62, 5  ;;  %v3975_v46 = vrot.slane %v3957_v40, 9  ;;  %v2170_v20 = vrot.slane %v3958_v41, 5  ;;  %v4059_v12 = vld [vmem:[%s4432_s19 + $0x64] sm:$0xf] }
 0x118   : > { %v3288_v51 = vpop.permute.xlu1 %3287  ;;  %2998 = vst.msk [vmem:[#allocation2 + $0x18] sm:$0xff] %vm2994_vm13, %v2953_v50  ;;  %v1651_v58 = vsel %vm4484_vm5, %v1646_v53, %v5323_v29  ;;  %v2167_v43 = vsel %vm4434_vm2, %v2165_v37, %v2166_v39  ;;  %v2173_v59 = vrot.slane %v3959_v49, 5  ;;  %1914 = vrot.lane.b32.xlu0 %v3902_v22, %s4383_s23  ;;  %v2108_v63 = vsel %vm4434_vm2, %v3966_v48, %v2107_v11  ;;  %v4060_v29 = vld [vmem:[%s4432_s19 + $0x68] sm:$0x1]  ;;  %v4085_v40 = vld [vmem:[%s4432_s19 + $0xcc] sm:$0xf] }
 0x119   : > { %3326 = vst.msk [vmem:[#allocation2 + $0x50] sm:$0xff] %vm3315_vm14, %v3288_v51  ;;  %1932 = vrot.lane.b32.xlu1 %v3911_v52, %s4383_s23  ;;  %v1656_v60 = vrot.slane %v1655_v55, 4  ;;  %v3990_v61 = vcombine.low %v2164_v21, %v2167_v43  ;;  %v2109_v1 = vrot.slane %v2107_v11, 4  ;;  %v2171_v7 = vsel %vm4434_vm2, %v3975_v46, %v2170_v20  ;;  %v4086_v48 = vld [vmem:[%s4432_s19 + $0xd0] sm:$0xf]  ;;  %v4344_v49 = vld [vmem:[%s4432_s19 + $0xc0] sm:$0xff]  }
 0x11a   : > { %v2172_v8 = vrot.slane %v2170_v20, 4  ;;  %v3967_v9 = vrot.slane %v3933_v54, 9  ;;  %v2114_v10 = vrot.slane %v3934_v56, 5  ;;  %v2117_v16 = vrot.slane %v3935_v44, 5  ;;  %v4087_v43 = vld [vmem:[%s4432_s19 + $0xd4] sm:$0x1] }
 0x11b   : > { %v3272_v2 = vpop.permute.xlu0 %3271  ;;  %v1661_v14 = vsel %vm4484_vm5, %v1656_v60, %v1660_v47  ;;  %v2111_v15 = vsel %vm4434_vm2, %v2109_v1, %v2110_v57  ;;  %v2851_v17 = vshrl.u32 %v4082_v13, 16  ;;  %v2854_v28 = vshll.u32 %v4082_v13, 16  ;;  %v4346_v1 = vld [vmem:[%s4432_s19 + $0xcc] sm:$0xff]  }
 0x11c   : > { %3318 = vst.msk [vmem:[#allocation2 + $0x10] sm:$0xff] %vm3315_vm14, %v3272_v2  ;;  %v3903_v18 = vcombine.low %v1651_v58, %v1661_v14  ;;  %v3982_v19 = vcombine.low %v2108_v63, %v2111_v15  ;;  %v2174_v23 = vsel %vm4434_vm2, %v2172_v8, %v2173_v59  ;;  %v2115_v24 = vsel %vm4434_vm2, %v3967_v9, %v2114_v10  ;;  %v4061_v63 = vld [vmem:[%s4432_s19 + $0x6c] sm:$0xf]  ;;  %v4062_v14 = vld [vmem:[%s4432_s19 + $0x70] sm:$0xf] }
 0x11d   : > { %2251 = vrot.lane.b32.xlu1 %v3990_v61, %s4384_s24  ;;  %v3991_v25 = vcombine.low %v2171_v7, %v2174_v23  ;;  %v2116_v26 = vrot.slane %v2114_v10, 4  ;;  %v2853_v27 = vrot.slane %v2851_v17, 4  ;;  %v2860_v31 = vshll.u32 %v4083_v3, 16  ;;  %v4345_v7 = vld [vmem:[%s4432_s19 + $0x60] sm:$0xff]  }
 0x11e   : > { %1916 = vrot.lane.b32.xlu0 %v3903_v18, %s4383_s23  ;;  %v2864_v32 = vshrl.u32 %v4083_v3, 16  ;;  %v2870_v33 = vshll.u32 %v4084_v4, 16  ;;  %v2659_v34 = vshrl.u32 %v4058_v6, 16  ;;  %v2856_v36 = vrot.slane %v2854_v28, 5  ;;  %v4063_v18 = vld [vmem:[%s4432_s19 + $0x74] sm:$0x1] }
 0x11f   : > { %v880_v22 = vpop.permute.xlu1 %879  ;;  %v2118_v62 = vsel %vm4434_vm2, %v2116_v26, %v2117_v16  ;;  %v2662_v38 = vshll.u32 %v4058_v6, 16  ;;  %v2668_v39 = vshll.u32 %v4059_v12, 16  ;;  %v2862_v42 = vrot.slane %v2860_v31, 5  ;;  %v4146_v23 = vld [vmem:[%s4432_s19 + $0xc0] sm:$0xe] }
 0x120   : > { %v3342_v30 = vld [vmem:[#allocation2 + $0x50] sm:$0xff]  ;;  %916 = vst.msk [vmem:[#allocation2 + $0x60] sm:$0xff] %vm903_vm7, %v880_v22  ;;  %v3983_v41 = vcombine.low %v2115_v24, %v2118_v62  ;;  %v2866_v45 = vrot.slane %v2864_v32, 4  ;;  %v2872_v47 = vrot.slane %v2870_v33, 5  ;;  %v2857_v50 = vor.u32 %v2856_v36, %v2853_v27  ;;  %v4147_v27 = vld [vmem:[%s4432_s19 + $0xc4] sm:$0xf] }
 0x121   : > { %4252 = vmatprep.mubr.msk.bf16.mxu1 %vm3375_vm15, %v3342_v30  ;;  %v864_v35 = vpop.permute.xlu0 %863  ;;  %2253 = vrot.lane.b32.xlu1 %v3991_v25, %s4384_s24  ;;  %v2661_v51 = vrot.slane %v2659_v34, 4  ;;  %v2664_v52 = vrot.slane %v2662_v38, 5  ;;  %v5383_v53 = vrot.slane %v2668_v39, 5  ;;  %v2672_v55 = vshrl.u32 %v4059_v12, 16  ;;  %v4148_v28 = vld [vmem:[%s4432_s19 + $0xc8] sm:$0x1] }
 0x122   : > { %908 = vst.msk [vmem:[#allocation2 + $0x20] sm:$0xff] %vm903_vm7, %v864_v35  ;;  %2235 = vrot.lane.b32.xlu0 %v3982_v19, %s4384_s24  ;;  %v2867_v54 = vor.u32 %v2866_v45, %v2862_v42  ;;  %v2678_v11 = vshll.u32 %v4060_v29, 16  ;;  %v2875_v57 = vshrl.u32 %v4085_v40, 16  ;;  %v2858_v46 = vrot.slane %v2857_v50, 4  ;;  %v4347_v29 = vld [vmem:[%s4432_s19 + $0x6c] sm:$0xff]  }
 0x123   : > { %v3290_v21 = vpop.permute.xlu1 %3289  ;;  %v3334_v37 = vld [vmem:[#allocation2 + $0x10] sm:$0xff]  ;;  %v2665_v56 = vor.u32 %v2664_v52, %v2661_v51  ;;  %v2878_v20 = vshll.u32 %v4085_v40, 16  ;;  %v2884_v59 = vshll.u32 %v4086_v48, 16  ;;  %v2674_v13 = vrot.slane %v2672_v55, 4  ;;  %v4122_v40 = vld [vmem:[%s4432_s19 + $0x60] sm:$0xe] }
 0x124   : > { %3327 = vst.msk [vmem:[#allocation2 + $0x58] sm:$0xff] %vm3315_vm14, %v3290_v21  ;;  %4236 = vmatprep.mubr.msk.bf16.mxu0 %vm3375_vm15, %v3334_v37  ;;  %v2868_v44 = vrot.slane %v2867_v54, 4  ;;  %v2680_v60 = vrot.slane %v2678_v11, 5  ;;  %v2877_v61 = vrot.slane %v2875_v57, 4  ;;  %v2863_v2 = vsel %vm4484_vm5, %v2858_v46, %v2862_v42  ;;  %v4149_v54 = vld [vmem:[%s4432_s19 + $0xcc] sm:$0xe] }
 0x125   : > { %v3274_v58 = vpop.permute.xlu0 %3273  ;;  %2429 = vrot.lane.b32.xlu1 %v4344_v49, %s4385_s25  ;;  %v2666_v3 = vrot.slane %v2665_v56, 4  ;;  %v2880_v4 = vrot.slane %v2878_v20, 5  ;;  %v5395_v6 = vrot.slane %v2884_v59, 5  ;;  %v2675_v9 = vor.u32 %v2674_v13, %v5383_v53  ;;  %v4124_v49 = vld [vmem:[%s4432_s19 + $0x68] sm:$0x1] }
 0x126   : > { %3319 = vst.msk [vmem:[#allocation2 + $0x18] sm:$0xff] %vm3315_vm14, %v3274_v58  ;;  %2237 = vrot.lane.b32.xlu0 %v3983_v41, %s4384_s24  ;;  %v2873_v8 = vsel %vm4484_vm5, %v2868_v44, %v2872_v47  ;;  %v2888_v10 = vshrl.u32 %v4086_v48, 16  ;;  %v2894_v12 = vshll.u32 %v4087_v43, 16  ;;  %v2683_v19 = vshrl.u32 %v4061_v63, 16  ;;  %v4123_v41 = vld [vmem:[%s4432_s19 + $0x64] sm:$0xf] }
 0x127   : > { %v4102_v15 = vcombine.low %v2863_v2, %v2873_v8  ;;  %v2671_v16 = vsel %vm4484_vm5, %v2666_v3, %v5383_v53  ;;  %v2881_v17 = vor.u32 %v2880_v4, %v2877_v61  ;;  %v2676_v24 = vrot.slane %v2675_v9, 4  ;;  %v4150_v58 = vld [vmem:[%s4432_s19 + $0xd0] sm:$0xf]  ;;  %v4151_v13 = vld [vmem:[%s4432_s19 + $0xd4] sm:$0x1] }
 0x128   : > { %v2890_v25 = vrot.slane %v2888_v10, 4  ;;  %v2896_v26 = vrot.slane %v2894_v12, 5  ;;  %v2686_v22 = vshll.u32 %v4061_v63, 16  ;;  %v2685_v31 = vrot.slane %v2683_v19, 4  ;;  %v4126_v8 = vld [vmem:[%s4432_s19 + $0x70] sm:$0xf] }
 0x129   : > { %2431 = vrot.lane.b32.xlu1 %v4346_v1, %s4385_s25  ;;  %v2882_v30 = vrot.slane %v2881_v17, 4  ;;  %v2692_v32 = vshll.u32 %v4062_v14, 16  ;;  %v2696_v33 = vshrl.u32 %v4062_v14, 16  ;;  %v2681_v35 = vsel %vm4484_vm5, %v2676_v24, %v2680_v60 }
 0x12a   : > { %2413 = vrot.lane.b32.xlu0 %v4345_v7, %s4385_s25  ;;  %v2891_v36 = vor.u32 %v2890_v25, %v5395_v6  ;;  %v2688_v38 = vrot.slane %v2686_v22, 5  ;;  %v2702_v39 = vshll.u32 %v4063_v18, 16  ;;  %v4094_v42 = vcombine.low %v2671_v16, %v2681_v35  ;;  %v4125_v7 = vld [vmem:[%s4432_s19 + $0x6c] sm:$0xe] }
 0x12b   : > { %v882_v34 = vpop.permute.xlu1 %881  ;;  %v3343_v62 = vld [vmem:[#allocation2 + $0x58] sm:$0xff]  ;;  %v2887_v45 = vsel %vm4484_vm5, %v2882_v30, %v5395_v6  ;;  %v2694_v47 = vrot.slane %v2692_v32, 5  ;;  %v2698_v48 = vrot.slane %v2696_v33, 4  ;;  %v4166_v37 = vrot.slane %v4146_v23, 9 }
 0x12c   : > { %917 = vst.msk [vmem:[#allocation2 + $0x68] sm:$0xff] %vm903_vm7, %v882_v34  ;;  %4253 = vmatmul.mubr.msk.bf16.gmra.mrb[4].mxu1 %vm3375_vm15, %v3343_v62  ;;  %v2892_v51 = vrot.slane %v2891_v36, 4  ;;  %v2689_v52 = vor.u32 %v2688_v38, %v2685_v31  ;;  %v2704_v53 = vrot.slane %v2702_v39, 5  ;;  %v3207_v11 = vrot.slane %v4147_v27, 5 }
 0x12d   : > { %v3335_v50 = vld [vmem:[#allocation2 + $0x18] sm:$0xff]  ;;  %v866_v21 = vpop.permute.xlu0 %865  ;;  %2974 = vrot.lane.b32.xlu1 %v4102_v15, %s4386_s26  ;;  %v2699_v55 = vor.u32 %v2698_v48, %v2694_v47  ;;  %v3210_v57 = vrot.slane %v4148_v28, 5  ;;  %v4158_v46 = vrot.slane %v4122_v40, 9  ;;  %v3151_v59 = vrot.slane %v4123_v41, 5  ;;  %v4127_v15 = vld [vmem:[%s4432_s19 + $0x74] sm:$0x1] }
 0x12e   : > { %4237 = vmatmul.mubr.msk.bf16.gmra.mrb[4].mxu0 %vm3375_vm15, %v3335_v50  ;;  %909 = vst.msk [vmem:[#allocation2 + $0x28] sm:$0xff] %vm903_vm7, %v866_v21  ;;  %2415 = vrot.lane.b32.xlu0 %v4347_v29, %s4385_s25  ;;  %v2897_v43 = vsel %vm4484_vm5, %v2892_v51, %v2896_v26  ;;  %v2690_v20 = vrot.slane %v2689_v52, 4  ;;  %v3154_v44 = vrot.slane %v4124_v49, 5  ;;  %v3208_v63 = vsel %vm4434_vm2, %v4166_v37, %v3207_v11 }
 0x12f   : > { %v1204_v56 = vpop.permute.xlu1 %1203  ;;  %v4103_v60 = vcombine.low %v2887_v45, %v2897_v43  ;;  %v2700_v61 = vrot.slane %v2699_v55, 4  ;;  %v3209_v1 = vrot.slane %v3207_v11, 4  ;;  %v3153_v3 = vrot.slane %v3151_v59, 4 }
 0x130   : > { %1240 = vst.msk [vmem:[#allocation2 + $0x60] sm:$0xff] %vm1227_vm8, %v1204_v56  ;;  %v2695_v2 = vsel %vm4484_vm5, %v2690_v20, %v2694_v47  ;;  %v4167_v6 = vrot.slane %v4149_v54, 9  ;;  %v3214_v12 = vrot.slane %v4150_v58, 5  ;;  %v3217_v14 = vrot.slane %v4151_v13, 5 }
 0x131   : > { %v1188_v4 = vpop.permute.xlu0 %1187  ;;  %2976 = vrot.lane.b32.xlu1 %v4103_v60, %s4386_s26  ;;  %v2705_v9 = vsel %vm4484_vm5, %v2700_v61, %v2704_v53  ;;  %v3211_v10 = vsel %vm4434_vm2, %v3209_v1, %v3210_v57  ;;  %v3152_v19 = vsel %vm4434_vm2, %v4158_v46, %v3151_v59  ;;  %v3155_v5 = vsel %vm4434_vm2, %v3153_v3, %v3154_v44 }
 0x132   : > { %1232 = vst.msk [vmem:[#allocation2 + $0x20] sm:$0xff] %vm1227_vm8, %v1188_v4  ;;  %2958 = vrot.lane.b32.xlu0 %v4094_v42, %s4386_s26  ;;  %v4095_v17 = vcombine.low %v2695_v2, %v2705_v9  ;;  %v4182_v18 = vcombine.low %v3208_v63, %v3211_v10  ;;  %v3215_v23 = vsel %vm4434_vm2, %v4167_v6, %v3214_v12  ;;  %v3216_v24 = vrot.slane %v3214_v12, 4 }
 0x133   : > { %v1206_v16 = vpop.permute.xlu1 %1205  ;;  %v4159_v25 = vrot.slane %v4125_v7, 9  ;;  %v3158_v26 = vrot.slane %v4126_v8, 5  ;;  %v3161_v22 = vrot.slane %v4127_v15, 5  ;;  %v4174_v31 = vcombine.low %v3152_v19, %v3155_v5 }
 0x134   : > { %1241 = vst.msk [vmem:[#allocation2 + $0x68] sm:$0xff] %vm1227_vm8, %v1206_v16  ;;  %v3218_v28 = vsel %vm4434_vm2, %v3216_v24, %v3217_v14 }
 0x135   : > { %v1190_v27 = vpop.permute.xlu0 %1189  ;;  %3295 = vrot.lane.b32.xlu1 %v4182_v18, %s4387_s27  ;;  %v3160_v29 = vrot.slane %v3158_v26, 4  ;;  %v4183_v32 = vcombine.low %v3215_v23, %v3218_v28  ;;  %v3159_v33 = vsel %vm4434_vm2, %v4159_v25, %v3158_v26 }
 0x136   : > { %1233 = vst.msk [vmem:[#allocation2 + $0x28] sm:$0xff] %vm1227_vm8, %v1190_v27  ;;  %2960 = vrot.lane.b32.xlu0 %v4095_v17, %s4386_s26 }
 0x137   : > { %v1382_v30 = vpop.permute.xlu1 %1381  ;;  %v3162_v34 = vsel %vm4434_vm2, %v3160_v29, %v3161_v22 }
 0x138   : > { %1418 = vst.msk [vmem:[#allocation2 + $0x60] sm:$0xff] %vm1405_vm9, %v1382_v30  ;;  %v4175_v36 = vcombine.low %v3159_v33, %v3162_v34 }
 0x139   : > { %v1366_v62 = vpop.permute.xlu0 %1365  ;;  %3297 = vrot.lane.b32.xlu1 %v4183_v32, %s4387_s27 }
 0x13a   : > { %1410 = vst.msk [vmem:[#allocation2 + $0x20] sm:$0xff] %vm1405_vm9, %v1366_v62  ;;  %3279 = vrot.lane.b32.xlu0 %v4174_v31, %s4387_s27  ;;  %v5535_v62 = vld [vmem:[%s5617_s2] ss:$0 sm:$0xff] }
 0x13b   : > { %v1384_v35 = vpop.permute.xlu1 %1383 }
 0x13c   : > { %1419 = vst.msk [vmem:[#allocation2 + $0x68] sm:$0xff] %vm1405_vm9, %v1384_v35 }
 0x13d   : > { %v1368_v38 = vpop.permute.xlu0 %1367 }
 0x13e   : > { %1411 = vst.msk [vmem:[#allocation2 + $0x28] sm:$0xff] %vm1405_vm9, %v1368_v38  ;;  %3281 = vrot.lane.b32.xlu0 %v4175_v36, %s4387_s27 }
 0x13f   : > { %v1927_v39 = vpop.permute.xlu1 %1926 }
 0x140   : > { %1963 = vst.msk [vmem:[#allocation2 + $0x60] sm:$0xff] %vm1950_vm10, %v1927_v39 }
 0x141   : > { %v1911_v0 = vpop.permute.xlu0 %1910 }
 0x142   : > { %1955 = vst.msk [vmem:[#allocation2 + $0x20] sm:$0xff] %vm1950_vm10, %v1911_v0 }
 0x143   : > { %v1929_v40 = vpop.permute.xlu1 %1928 }
 0x144   : > { %1964 = vst.msk [vmem:[#allocation2 + $0x68] sm:$0xff] %vm1950_vm10, %v1929_v40 }
 0x147   : > { %v2248_v41 = vpop.permute.xlu1 %2247  ;;  %v1913_v42 = vpop.permute.xlu0 %1912 }
 0x148   : > { %2284 = vst.msk [vmem:[#allocation2 + $0x60] sm:$0xff] %vm2271_vm11, %v2248_v41 }
 0x149   : > { %1956 = vst.msk [vmem:[#allocation2 + $0x28] sm:$0xff] %vm1950_vm10, %v1913_v42 }
 0x14b   : > { %v2250_v45 = vpop.permute.xlu1 %2249  ;;  %v2232_v47 = vpop.permute.xlu0 %2231 }
 0x14c   : > { %2285 = vst.msk [vmem:[#allocation2 + $0x68] sm:$0xff] %vm2271_vm11, %v2250_v45  ;;  %2276 = vst.msk [vmem:[#allocation2 + $0x20] sm:$0xff] %vm2271_vm11, %v2232_v47 }
 0x14f   : > { %v2426_v48 = vpop.permute.xlu1 %2425  ;;  %v2234_v49 = vpop.permute.xlu0 %2233 }
 0x150   : > { %2462 = vst.msk [vmem:[#allocation2 + $0x60] sm:$0xff] %vm2449_vm12, %v2426_v48 }
 0x151   : > { %2277 = vst.msk [vmem:[#allocation2 + $0x28] sm:$0xff] %vm2271_vm11, %v2234_v49 }
 0x153   : > { %v2428_v50 = vpop.permute.xlu1 %2427  ;;  %v2410_v51 = vpop.permute.xlu0 %2409 }
 0x154   : > { %2463 = vst.msk [vmem:[#allocation2 + $0x68] sm:$0xff] %vm2449_vm12, %v2428_v50  ;;  %2454 = vst.msk [vmem:[#allocation2 + $0x20] sm:$0xff] %vm2449_vm12, %v2410_v51 }
 0x157   : > { %v2971_v52 = vpop.permute.xlu1 %2970  ;;  %v2412_v53 = vpop.permute.xlu0 %2411 }
 0x158   : > { %3007 = vst.msk [vmem:[#allocation2 + $0x60] sm:$0xff] %vm2994_vm13, %v2971_v52 }
 0x159   : > { %2455 = vst.msk [vmem:[#allocation2 + $0x28] sm:$0xff] %vm2449_vm12, %v2412_v53 }
 0x15b   : > { %v2955_v21 = vpop.permute.xlu0 %2954  ;;  %v2973_v37 = vpop.permute.xlu1 %2972 }
 0x15c   : > { %2999 = vst.msk [vmem:[#allocation2 + $0x20] sm:$0xff] %vm2994_vm13, %v2955_v21  ;;  %3008 = vst.msk [vmem:[#allocation2 + $0x68] sm:$0xff] %vm2994_vm13, %v2973_v37 }
 0x15f   : > { %v2957_v54 = vpop.permute.xlu0 %2956  ;;  %v3292_v55 = vpop.permute.xlu1 %3291 }
 0x160   : > { %3000 = vst.msk [vmem:[#allocation2 + $0x28] sm:$0xff] %vm2994_vm13, %v2957_v54 }
 0x161   : > { %3328 = vst.msk [vmem:[#allocation2 + $0x60] sm:$0xff] %vm3315_vm14, %v3292_v55 }
 0x163   : > { %v3276_v11 = vpop.permute.xlu0 %3275 }
 0x164   : > { %3320 = vst.msk [vmem:[#allocation2 + $0x20] sm:$0xff] %vm3315_vm14, %v3276_v11 }
 0x168   : > { %v3344_v57 = vld [vmem:[#allocation2 + $0x60] sm:$0xff]  ;;  %v884_v46 = vpop.permute.xlu1 %883 }
 0x169   : > { %4256 = vmatprep.mubr.msk.bf16.mxu1 %vm3375_vm15, %v3344_v57  ;;  %918 = vst.msk [vmem:[#allocation2 + $0x70] sm:$0xff] %vm903_vm7, %v884_v46 }
 0x16a   : > { %v868_v56 = vpop.permute.xlu0 %867 }
 0x16b   : > { %v3336_v58 = vld [vmem:[#allocation2 + $0x20] sm:$0xff]  ;;  %910 = vst.msk [vmem:[#allocation2 + $0x30] sm:$0xff] %vm903_vm7, %v868_v56 }
 0x16c   : > { %4240 = vmatprep.mubr.msk.bf16.mxu0 %vm3375_vm15, %v3336_v58  ;;  %v3294_v43 = vpop.permute.xlu1 %3293 }
 0x16d   : > { %3329 = vst.msk [vmem:[#allocation2 + $0x68] sm:$0xff] %vm3315_vm14, %v3294_v43 }
 0x16e   : > { %v3278_v20 = vpop.permute.xlu0 %3277 }
 0x16f   : > { %3321 = vst.msk [vmem:[#allocation2 + $0x28] sm:$0xff] %vm3315_vm14, %v3278_v20 }
 0x173   : > { %v886_v59 = vpop.permute.xlu1 %885 }
 0x174   : > { %919 = vst.msk [vmem:[#allocation2 + $0x78] sm:$0xff] %vm903_vm7, %v886_v59  ;;  %v3345_v44 = vld [vmem:[#allocation2 + $0x68] sm:$0xff] }
 0x175   : > { %4257 = vmatmul.mubr.msk.bf16.gmra.mrb[8].mxu1 %vm3375_vm15, %v3345_v44 }
 0x176   : > { %v3337_v13 = vld [vmem:[#allocation2 + $0x28] sm:$0xff]  ;;  %v870_v60 = vpop.permute.xlu0 %869 }
 0x177   : > { %v1208_v61 = vpop.permute.xlu1 %1207  ;;  %4241 = vmatmul.mubr.msk.bf16.gmra.mrb[8].mxu0 %vm3375_vm15, %v3337_v13  ;;  %911 = vst.msk [vmem:[#allocation2 + $0x38] sm:$0xff] %vm903_vm7, %v870_v60 }
 0x178   : > { %1242 = vst.msk [vmem:[#allocation2 + $0x70] sm:$0xff] %vm1227_vm8, %v1208_v61 }
 0x17a   : > { %v1192_v63 = vpop.permute.xlu0 %1191 }
 0x17b   : > { %v1210_v1 = vpop.permute.xlu1 %1209  ;;  %1234 = vst.msk [vmem:[#allocation2 + $0x30] sm:$0xff] %vm1227_vm8, %v1192_v63 }
 0x17c   : > { %1243 = vst.msk [vmem:[#allocation2 + $0x78] sm:$0xff] %vm1227_vm8, %v1210_v1 }
 0x17e   : > { %v1194_v2 = vpop.permute.xlu0 %1193 }
 0x17f   : > { %v1386_v3 = vpop.permute.xlu1 %1385  ;;  %1235 = vst.msk [vmem:[#allocation2 + $0x38] sm:$0xff] %vm1227_vm8, %v1194_v2 }
 0x180   : > { %1420 = vst.msk [vmem:[#allocation2 + $0x70] sm:$0xff] %vm1405_vm9, %v1386_v3 }
 0x182   : > { %v1370_v4 = vpop.permute.xlu0 %1369 }
 0x183   : > { %v1388_v6 = vpop.permute.xlu1 %1387  ;;  %1412 = vst.msk [vmem:[#allocation2 + $0x30] sm:$0xff] %vm1405_vm9, %v1370_v4 }
 0x184   : > { %1421 = vst.msk [vmem:[#allocation2 + $0x78] sm:$0xff] %vm1405_vm9, %v1388_v6 }
 0x186   : > { %v1372_v7 = vpop.permute.xlu0 %1371 }
 0x187   : > { %v1931_v8 = vpop.permute.xlu1 %1930  ;;  %1413 = vst.msk [vmem:[#allocation2 + $0x38] sm:$0xff] %vm1405_vm9, %v1372_v7 }
 0x188   : > { %1965 = vst.msk [vmem:[#allocation2 + $0x70] sm:$0xff] %vm1950_vm10, %v1931_v8 }
 0x18a   : > { %v1915_v9 = vpop.permute.xlu0 %1914 }
 0x18b   : > { %v1933_v10 = vpop.permute.xlu1 %1932  ;;  %1957 = vst.msk [vmem:[#allocation2 + $0x30] sm:$0xff] %vm1950_vm10, %v1915_v9 }
 0x18c   : > { %1966 = vst.msk [vmem:[#allocation2 + $0x78] sm:$0xff] %vm1950_vm10, %v1933_v10 }
 0x18f   : > { %v2252_v12 = vpop.permute.xlu1 %2251 }
 0x190   : > { %v1917_v14 = vpop.permute.xlu0 %1916  ;;  %2286 = vst.msk [vmem:[#allocation2 + $0x70] sm:$0xff] %vm2271_vm11, %v2252_v12 }
 0x191   : > { %1958 = vst.msk [vmem:[#allocation2 + $0x38] sm:$0xff] %vm1950_vm10, %v1917_v14 }
 0x193   : > { %v2254_v15 = vpop.permute.xlu1 %2253 }
 0x194   : > { %v2236_v16 = vpop.permute.xlu0 %2235  ;;  %2287 = vst.msk [vmem:[#allocation2 + $0x78] sm:$0xff] %vm2271_vm11, %v2254_v15 }
 0x195   : > { %2278 = vst.msk [vmem:[#allocation2 + $0x30] sm:$0xff] %vm2271_vm11, %v2236_v16 }
 0x197   : > { %v2430_v17 = vpop.permute.xlu1 %2429 }
 0x198   : > { %v2238_v18 = vpop.permute.xlu0 %2237  ;;  %2464 = vst.msk [vmem:[#allocation2 + $0x70] sm:$0xff] %vm2449_vm12, %v2430_v17 }
 0x199   : > { %2279 = vst.msk [vmem:[#allocation2 + $0x38] sm:$0xff] %vm2271_vm11, %v2238_v18 }
 0x19b   : > { %v2432_v19 = vpop.permute.xlu1 %2431 }
 0x19c   : > { %v2414_v5 = vpop.permute.xlu0 %2413  ;;  %2465 = vst.msk [vmem:[#allocation2 + $0x78] sm:$0xff] %vm2449_vm12, %v2432_v19 }
 0x19d   : > { %2456 = vst.msk [vmem:[#allocation2 + $0x30] sm:$0xff] %vm2449_vm12, %v2414_v5 }
 0x19f   : > { %v2975_v23 = vpop.permute.xlu1 %2974 }
 0x1a0   : > { %v2416_v24 = vpop.permute.xlu0 %2415  ;;  %3009 = vst.msk [vmem:[#allocation2 + $0x70] sm:$0xff] %vm2994_vm13, %v2975_v23 }
 0x1a1   : > { %2457 = vst.msk [vmem:[#allocation2 + $0x38] sm:$0xff] %vm2449_vm12, %v2416_v24 }
 0x1a3   : > { %v2977_v25 = vpop.permute.xlu1 %2976 }
 0x1a4   : > { %v2959_v26 = vpop.permute.xlu0 %2958  ;;  %3010 = vst.msk [vmem:[#allocation2 + $0x78] sm:$0xff] %vm2994_vm13, %v2977_v25 }
 0x1a5   : > { %3001 = vst.msk [vmem:[#allocation2 + $0x30] sm:$0xff] %vm2994_vm13, %v2959_v26 }
 0x1a7   : > { %v3296_v22 = vpop.permute.xlu1 %3295 }
 0x1a8   : > { %v2961_v27 = vpop.permute.xlu0 %2960  ;;  %3330 = vst.msk [vmem:[#allocation2 + $0x70] sm:$0xff] %vm3315_vm14, %v3296_v22 }
 0x1a9   : > { %3002 = vst.msk [vmem:[#allocation2 + $0x38] sm:$0xff] %vm2994_vm13, %v2961_v27 }
 0x1ab   : > { %v3298_v28 = vpop.permute.xlu1 %3297 }
 0x1ac   : > { %v3280_v29 = vpop.permute.xlu0 %3279  ;;  %3331 = vst.msk [vmem:[#allocation2 + $0x78] sm:$0xff] %vm3315_vm14, %v3298_v28 }
 0x1ad   : > { %3322 = vst.msk [vmem:[#allocation2 + $0x30] sm:$0xff] %vm3315_vm14, %v3280_v29 }
 0x1af   : > { %v3346_v30 = vld [vmem:[#allocation2 + $0x70] sm:$0xff] }
 0x1b0   : > { %v3282_v31 = vpop.permute.xlu0 %3281  ;;  %4260 = vmatprep.mubr.msk.bf16.mxu1 %vm3375_vm15, %v3346_v30 }
 0x1b1   : > { %3323 = vst.msk [vmem:[#allocation2 + $0x38] sm:$0xff] %vm3315_vm14, %v3282_v31 }
 0x1b3   : > { %v3347_v32 = vld [vmem:[#allocation2 + $0x78] sm:$0xff] }
 0x1b4   : > { %v3338_v33 = vld [vmem:[#allocation2 + $0x30] sm:$0xff]  ;;  %4261 = vmatmul.mubr.msk.bf16.gmra.mrb[12].mxu1 %vm3375_vm15, %v3347_v32 }
 0x1b5   : > { %4244 = vmatprep.mubr.msk.bf16.mxu0 %vm3375_vm15, %v3338_v33 }
 0x1b8   : > { %v3339_v34 = vld [vmem:[#allocation2 + $0x38] sm:$0xff] }
 0x1b9   : > { %4245 = vmatmul.mubr.msk.bf16.gmra.mrb[12].mxu0 %vm3375_vm15, %v3339_v34 }
 0x1bd   : > { %v4234_v35 = vpop.f32.mrb[0].mxu0  ;;  %v4250_v36 = vpop.f32.mrb[0].mxu1 }
 0x1be   : > { %v3471_v38 = vadd.f32 %v4234_v35, %v5535_v62  ;;  %v3535_v39 = vadd.f32 %v4250_v36, %v5535_v62  ;;  %v3462_v0 = vpop.f32.mrb[1].mxu0  ;;  %v3526_v40 = vpop.f32.mrb[1].mxu1 }
 0x1bf   : > { %v3463_v41 = vadd.f32 %v5535_v62, %v3462_v0  ;;  %v3527_v42 = vadd.f32 %v5535_v62, %v3526_v40  ;;  %v4235_v45 = vpop.f32.mrb[2].mxu0  ;;  %v4251_v47 = vpop.f32.mrb[2].mxu1 }
 0x1c0   : > { %3591 = vst [vmem:[%s5540_s16 + $0x10] sm:$0xff] %v3471_v38  ;;  %3607 = vst [vmem:[%s5540_s16 + $0x90] sm:$0xff] %v3535_v39  ;;  %v3474_v48 = vadd.f32 %v4235_v45, %v5535_v62  ;;  %v3538_v49 = vadd.f32 %v4251_v47, %v5535_v62  ;;  %v3465_v50 = vpop.f32.mrb[3].mxu0  ;;  %v3529_v51 = vpop.f32.mrb[3].mxu1 }
 0x1c1   : > { %3589 = vst [vmem:[%s5540_s16] sm:$0xff] %v3463_v41  ;;  %3605 = vst [vmem:[%s5540_s16 + $0x80] sm:$0xff] %v3527_v42  ;;  %v3466_v52 = vadd.f32 %v5535_v62, %v3465_v50  ;;  %v3530_v53 = vadd.f32 %v5535_v62, %v3529_v51 }
 0x1c2   : > { %3592 = vst [vmem:[%s5540_s16 + $0x18] sm:$0xff] %v3474_v48  ;;  %3608 = vst [vmem:[%s5540_s16 + $0x98] sm:$0xff] %v3538_v49 }
 0x1c3   : > { %3590 = vst [vmem:[%s5540_s16 + $0x8] sm:$0xff] %v3466_v52  ;;  %3606 = vst [vmem:[%s5540_s16 + $0x88] sm:$0xff] %v3530_v53 }
 0x1ff   : > { %v4254_v21 = vpop.f32.mrb[4].mxu1 }
 0x200   : > { %v3551_v37 = vadd.f32 %v4254_v21, %v5535_v62  ;;  %v3542_v54 = vpop.f32.mrb[5].mxu1 }
 0x201   : > { %v4238_v55 = vpop.f32.mrb[4].mxu0  ;;  %v3543_v11 = vadd.f32 %v5535_v62, %v3542_v54  ;;  %v4255_v57 = vpop.f32.mrb[6].mxu1 }
 0x202   : > { %v3487_v46 = vadd.f32 %v4238_v55, %v5535_v62  ;;  %3611 = vst [vmem:[%s5540_s16 + $0xb0] sm:$0xff] %v3551_v37  ;;  %v3478_v56 = vpop.f32.mrb[5].mxu0  ;;  %v3554_v58 = vadd.f32 %v4255_v57, %v5535_v62  ;;  %v3545_v43 = vpop.f32.mrb[7].mxu1 }
 0x203   : > { %v3479_v20 = vadd.f32 %v5535_v62, %v3478_v56  ;;  %3609 = vst [vmem:[%s5540_s16 + $0xa0] sm:$0xff] %v3543_v11  ;;  %v4239_v59 = vpop.f32.mrb[6].mxu0  ;;  %v3546_v44 = vadd.f32 %v5535_v62, %v3545_v43 }
 0x204   : > { %3595 = vst [vmem:[%s5540_s16 + $0x30] sm:$0xff] %v3487_v46  ;;  %v3490_v13 = vadd.f32 %v4239_v59, %v5535_v62  ;;  %3612 = vst [vmem:[%s5540_s16 + $0xb8] sm:$0xff] %v3554_v58  ;;  %v3481_v60 = vpop.f32.mrb[7].mxu0 }
 0x205   : > { %3593 = vst [vmem:[%s5540_s16 + $0x20] sm:$0xff] %v3479_v20  ;;  %v3482_v61 = vadd.f32 %v5535_v62, %v3481_v60  ;;  %3610 = vst [vmem:[%s5540_s16 + $0xa8] sm:$0xff] %v3546_v44 }
 0x206   : > { %3596 = vst [vmem:[%s5540_s16 + $0x38] sm:$0xff] %v3490_v13 }
 0x207   : > { %3594 = vst [vmem:[%s5540_s16 + $0x28] sm:$0xff] %v3482_v61 }
 0x248   : > { %v4258_v63 = vpop.f32.mrb[8].mxu1 }
 0x249   : > { %v3567_v1 = vadd.f32 %v4258_v63, %v5535_v62  ;;  %v3558_v2 = vpop.f32.mrb[9].mxu1 }
 0x24a   : > { %v4242_v3 = vpop.f32.mrb[8].mxu0  ;;  %v3559_v4 = vadd.f32 %v5535_v62, %v3558_v2  ;;  %v4259_v6 = vpop.f32.mrb[10].mxu1 }
 0x24b   : > { %v3503_v7 = vadd.f32 %v4242_v3, %v5535_v62  ;;  %3615 = vst [vmem:[%s5540_s16 + $0xd0] sm:$0xff] %v3567_v1  ;;  %v3494_v8 = vpop.f32.mrb[9].mxu0  ;;  %v3570_v9 = vadd.f32 %v4259_v6, %v5535_v62  ;;  %v3561_v10 = vpop.f32.mrb[11].mxu1 }
 0x24c   : > { %v3495_v12 = vadd.f32 %v5535_v62, %v3494_v8  ;;  %3613 = vst [vmem:[%s5540_s16 + $0xc0] sm:$0xff] %v3559_v4  ;;  %v4243_v14 = vpop.f32.mrb[10].mxu0  ;;  %v3562_v15 = vadd.f32 %v5535_v62, %v3561_v10 }
 0x24d   : > { %3599 = vst [vmem:[%s5540_s16 + $0x50] sm:$0xff] %v3503_v7  ;;  %v3506_v16 = vadd.f32 %v4243_v14, %v5535_v62  ;;  %3616 = vst [vmem:[%s5540_s16 + $0xd8] sm:$0xff] %v3570_v9  ;;  %v3497_v17 = vpop.f32.mrb[11].mxu0 }
 0x24e   : > { %3597 = vst [vmem:[%s5540_s16 + $0x40] sm:$0xff] %v3495_v12  ;;  %v3498_v18 = vadd.f32 %v5535_v62, %v3497_v17  ;;  %3614 = vst [vmem:[%s5540_s16 + $0xc8] sm:$0xff] %v3562_v15 }
 0x24f   : > { %3600 = vst [vmem:[%s5540_s16 + $0x58] sm:$0xff] %v3506_v16 }
 0x250   : > { %3598 = vst [vmem:[%s5540_s16 + $0x48] sm:$0xff] %v3498_v18 }
 0x287   : > { %v4262_v19 = vpop.f32.mrb[12].mxu1 }
 0x288   : > { %v3583_v5 = vadd.f32 %v4262_v19, %v5535_v62  ;;  %v3574_v23 = vpop.f32.mrb[13].mxu1 }
 0x289   : > { %v3575_v24 = vadd.f32 %v5535_v62, %v3574_v23  ;;  %v4263_v25 = vpop.f32.mrb[14].mxu1 }
 0x28a   : > { %3619 = vst [vmem:[%s5540_s16 + $0xf0] sm:$0xff] %v3583_v5  ;;  %v3586_v26 = vadd.f32 %v4263_v25, %v5535_v62  ;;  %v3577_v22 = vpop.f32.mrb[15].mxu1 }
 0x28b   : > { %3617 = vst [vmem:[%s5540_s16 + $0xe0] sm:$0xff] %v3575_v24  ;;  %v3578_v27 = vadd.f32 %v5535_v62, %v3577_v22 }
 0x28c   : > { %v4246_v28 = vpop.f32.mrb[12].mxu0  ;;  %3620 = vst [vmem:[%s5540_s16 + $0xf8] sm:$0xff] %v3586_v26 }
 0x28d   : > { %v3519_v29 = vadd.f32 %v4246_v28, %v5535_v62  ;;  %v3510_v30 = vpop.f32.mrb[13].mxu0  ;;  %3618 = vst [vmem:[%s5540_s16 + $0xe8] sm:$0xff] %v3578_v27 }
 0x28e   : > { %v3511_v31 = vadd.f32 %v5535_v62, %v3510_v30  ;;  %v4247_v32 = vpop.f32.mrb[14].mxu0 }
 0x28f   : > { %3603 = vst [vmem:[%s5540_s16 + $0x70] sm:$0xff] %v3519_v29  ;;  %v3522_v33 = vadd.f32 %v4247_v32, %v5535_v62  ;;  %v3513_v34 = vpop.f32.mrb[15].mxu0 }
 0x290   : > { %3601 = vst [vmem:[%s5540_s16 + $0x60] sm:$0xff] %v3511_v31  ;;  %v3514_v35 = vadd.f32 %v5535_v62, %v3513_v34 }
 0x291   : > { %3604 = vst [vmem:[%s5540_s16 + $0x78] sm:$0xff] %v3522_v33 }
 0x292   : > { %3602 = vst [vmem:[%s5540_s16 + $0x68] sm:$0xff] %v3514_v35 }
 0x293 PF: > { %s13_s14 = sadd.s32 1, %s4378_s14   ;;  %s5623_s12 = smov %s4374_s13 }
 0x294   : > { %p10_p5 = scmp.ge.s32.totalorder %s13_s14, 4   ;;  %s5624_s13 = smov %s5626_s15 }
 0x296   :  { %12 = sbr.rel (!%p10_p5) target bundleno = 2 (0x2), region = 74 }

</bundles_post_ra>
